<compile_context>
chip_gen: v6e
topology: v6e:2x2x1
jax: 0.10.0
libtpu: 0.0.40
codegen_flags: <defaults>
</compile_context>

<pallas_src>
import math
from functools import partial

import jax
import jax.numpy as jnp
from jax.experimental import pallas as pl
from jax.experimental.pallas import tpu as pltpu


LABEL_SLOT = 8   # labels (5) padded to 8 lanes; 7 layer slots fit in 128 lanes


# ---------------------------------------------------------------------------
# Fused kernel: 6 x (conv1d(k=3,same) -> ReLU -> Linear cls) -> proj -> cls
# ---------------------------------------------------------------------------

def fused_cws_kernel(x_ref, convw_ref, convb_ref, clsw_ref, clsb_ref,
                     pw_ref, pb_ref, pcw_ref, pcb_ref,
                     hidden_ref, logits_ref):
    """Bt batch elements per grid step; all layers fused, weights resident.

    x_ref     : (Bt, S, HP)       embedded input, bf16 (H padded to 128)
    convw_ref : (NL, 3, HP, HP)   bf16 conv taps, w[l,k][ci,co]==torch w[co,ci,k]
    convb_ref : (NL, 1, HP)       f32 conv biases
    clsw_ref  : (NL, HP, LW)      bf16 classifier weights, layer l's label
                                  columns live at lanes [l*8, l*8+label_num)
    clsb_ref  : (NL, 1, LW)       f32 classifier biases (same lane placement)
    pw_ref    : (HP, PP)          bf16 projection weight (P padded)
    pb_ref    : (1, PP)           f32
    pcw_ref   : (PP, LW)          bf16 final classifier (lanes at slot NL)
    pcb_ref   : (1, LW)           f32
    hidden_ref: (Bt, S, PP)       f32 projected hidden states
    logits_ref: (Bt, S, LW)       f32 packed logits slab (8 lanes per layer)
    """
    n_layers = convw_ref.shape[0]
    bt, s, hp = x_ref.shape
    lw = logits_ref.shape[-1]
    m = bt * s

    # Activation carried in f32 (VPU work in f32 on all generations); cast to
    # bf16 only at the matmul inputs.
    x = x_ref[...].reshape(m, hp).astype(jnp.float32)

    # Per-sequence position of every row of the folded (M, HP) activation.
    seq_pos = jax.lax.broadcasted_iota(jnp.int32, (bt, s, 1), 1).reshape(m, 1)
    is_first = seq_pos == 0
    is_last = seq_pos == s - 1

    logits_acc = jnp.zeros((m, lw), jnp.float32)

    for l in range(n_layers):                             # unrolled, NL fixed
        # k=3 'same' conv as three shifted matmuls.  Shifts via XLU roll over
        # the folded rows; rows that wrapped across a sequence (or batch)
        # boundary are zeroed, which equals zero padding.
        x_prev = jnp.where(is_first, 0.0, pltpu.roll(x, shift=1, axis=0))
        x_next = jnp.where(is_last, 0.0, pltpu.roll(x, shift=m - 1, axis=0))

        acc = jnp.dot(x_prev.astype(jnp.bfloat16), convw_ref[l, 0],
                      preferred_element_type=jnp.float32)
        acc = acc + jnp.dot(x.astype(jnp.bfloat16), convw_ref[l, 1],
                            preferred_element_type=jnp.float32)
        acc = acc + jnp.dot(x_next.astype(jnp.bfloat16), convw_ref[l, 2],
                            preferred_element_type=jnp.float32)
        x = jnp.maximum(acc + convb_ref[l], 0.0)          # ReLU, next input

        # Layer-l classifier: its weight columns occupy only lane slot l, so
        # accumulating into the shared slab keeps each layer's logits exact.
        logits_acc = logits_acc + jnp.dot(x.astype(jnp.bfloat16), clsw_ref[l],
                                          preferred_element_type=jnp.float32)
        logits_acc = logits_acc + clsb_ref[l]

    # ProjectClsLayer: Linear(H -> P) then Linear(P -> L).  No activation.
    hidden = (jnp.dot(x.astype(jnp.bfloat16), pw_ref[...],
                      preferred_element_type=jnp.float32) + pb_ref[...])
    hidden_ref[...] = hidden.reshape(bt, s, hidden.shape[-1]).astype(
        hidden_ref.dtype)

    logits_acc = logits_acc + jnp.dot(hidden.astype(jnp.bfloat16), pcw_ref[...],
                                      preferred_element_type=jnp.float32)
    logits_acc = logits_acc + pcb_ref[...]
    logits_ref[...] = logits_acc.reshape(bt, s, lw).astype(logits_ref.dtype)


# ---------------------------------------------------------------------------
# Wrapper
# ---------------------------------------------------------------------------

@partial(jax.jit, static_argnums=(2, 3, 4))
def _cws_cnn_forward_impl(input_ids, kparams, label_num, proj_dim,
                          single_buffer_weights):
    """Full CWSCNNModelWithEE.forward.  Returns {'hidden_x', 'logits_list'}."""
    # Embedding lookup on the lane-padded bf16 table (glue, plain JAX gather).
    x = jnp.take(kparams["embedding"], input_ids, axis=0)   # (B, S, HP) bf16
    B, S, HP = x.shape
    NL = kparams["convw"].shape[0]
    PP = kparams["pw"].shape[1]
    LW = kparams["clsw"].shape[2]
    n_out = NL + 1

    # --- Batch folding: raise MXU M = Bt*S towards 256-512 rows. ---
    target_rows = 512
    Bt = max(1, min(B, pl.cdiv(target_rows, S)))
    steps = pl.cdiv(B, Bt)
    if steps > 1 and steps % 2 == 1:
        steps += 1                      # even grid -> balanced v7x 2-TC split
    B_pad = steps * Bt
    if B_pad != B:
        x = jnp.pad(x, ((0, B_pad - B), (0, 0), (0, 0)))

    # --- Explicit VMEM budget (weights + double-buffered blocks + scratch). ---
    weight_names = ("convw", "convb", "clsw", "clsb", "pw", "pb", "pcw", "pcb")
    wbytes = sum(int(kparams[k].size) * kparams[k].dtype.itemsize
                 for k in weight_names)
    wbufs = 1 if single_buffer_weights else 2
    M = Bt * S
    io_bytes = 2 * (M * HP * x.dtype.itemsize + M * PP * 4 + M * LW * 4)
    work_bytes = M * (6 * HP + 2 * PP + 2 * LW) * 4
    vmem_limit = int(min(56 * 2**20,
                         max(32 * 2**20,
                             wbytes * wbufs + io_bytes + work_bytes
                             + (4 << 20))))

    # Grid-invariant weight specs: same block every step -> DMA'd once and
    # kept resident; single-buffered to avoid paying a useless double buffer.
    def wspec(shape):
        imap = lambda i, _n=len(shape): (0,) * _n
        if single_buffer_weights:
            return pl.BlockSpec(shape, imap, pipeline_mode=pl.Buffered(1))
        return pl.BlockSpec(shape, imap)

    hidden_pad, logits_pad = pl.pallas_call(
        fused_cws_kernel,
        grid=(steps,),
        in_specs=[
            pl.BlockSpec((Bt, S, HP), lambda i: (i, 0, 0)),
            wspec(kparams["convw"].shape),
            wspec(kparams["convb"].shape),
            wspec(kparams["clsw"].shape),
            wspec(kparams["clsb"].shape),
            wspec(kparams["pw"].shape),
            wspec(kparams["pb"].shape),
            wspec(kparams["pcw"].shape),
            wspec(kparams["pcb"].shape),
        ],
        out_specs=[
            pl.BlockSpec((Bt, S, PP), lambda i: (i, 0, 0)),
            pl.BlockSpec((Bt, S, LW), lambda i: (i, 0, 0)),
        ],
        out_shape=(
            jax.ShapeDtypeStruct((B_pad, S, PP), jnp.float32),
            jax.ShapeDtypeStruct((B_pad, S, LW), jnp.float32),
        ),
        compiler_params=pltpu.CompilerParams(
            dimension_semantics=("parallel",),
            vmem_limit_bytes=vmem_limit),
    )(x, kparams["convw"], kparams["convb"], kparams["clsw"],
      kparams["clsb"], kparams["pw"], kparams["pb"], kparams["pcw"],
      kparams["pcb"])

    hidden_x = hidden_pad[:B, :, :proj_dim]
    logits_list = [
        logits_pad[:B, :, l * LABEL_SLOT: l * LABEL_SLOT + label_num]
        for l in range(n_out)
    ]
    return {"hidden_x": hidden_x, "logits_list": logits_list}


def cws_cnn_forward(input_ids, kparams, label_num, proj_dim):
    """Entry point with a safe fallback if pl.Buffered(1) is unsupported."""
    try:
        out = _cws_cnn_forward_impl(input_ids, kparams, label_num, proj_dim,
                                    True)
        return jax.tree_util.tree_map(jax.block_until_ready, out)
    except Exception:
        out = _cws_cnn_forward_impl(input_ids, kparams, label_num, proj_dim,
                                    False)
        return jax.tree_util.tree_map(jax.block_until_ready, out)


# ---------------------------------------------------------------------------
# Pure-JAX reference (correctness check only, uses unpadded f32 params)
# ---------------------------------------------------------------------------

def cws_cnn_forward_ref(input_ids, params):
    x = jnp.take(params["embedding"], input_ids, axis=0)
    logits_list = []
    for layer in params["conv_layers"]:
        xp = jnp.pad(x, ((0, 0), (1, 0), (0, 0)))[:, :-1, :]
        xn = jnp.pad(x, ((0, 0), (0, 1), (0, 0)))[:, 1:, :]
        y = xp @ layer["w0"] + x @ layer["w1"] + xn @ layer["w2"] + layer["b"]
        x = jnp.maximum(y, 0.0)
        logits_list.append(x @ layer["cw"] + layer["cb"])
    proj = params["proj"]
    hidden_x = x @ proj["pw"] + proj["pb"]
    logits_list.append(hidden_x @ proj["cw"] + proj["cb"])
    return {"hidden_x": hidden_x, "logits_list": logits_list}


# ---------------------------------------------------------------------------
# Deterministic parameter construction + lane-padded / bf16 packing
# ---------------------------------------------------------------------------

def make_params(key, vocab, emb_dim, hidden, label_num, proj_dim, n_layers):
    state = [key]

    def nrm(shape, scale):
        state[0], sub = jax.random.split(state[0])
        return scale * jax.random.normal(sub, shape, jnp.float32)

    params = {"embedding": nrm((vocab, emb_dim), 0.5)}

    conv_layers = []
    c_scale = 1.0 / math.sqrt(hidden * 3)
    l_scale = 1.0 / math.sqrt(hidden)
    for _ in range(n_layers):
        conv_layers.append({
            # wK[ci, co] corresponds to torch conv weight[co, ci, K]
            "w0": nrm((hidden, hidden), c_scale),
            "w1": nrm((hidden, hidden), c_scale),
            "w2": nrm((hidden, hidden), c_scale),
            "b": nrm((1, hidden), c_scale),
            "cw": nrm((hidden, label_num), l_scale),
            "cb": nrm((1, label_num), l_scale),
        })
    params["conv_layers"] = conv_layers

    params["proj"] = {
        "pw": nrm((hidden, proj_dim), 1.0 / math.sqrt(hidden)),
        "pb": nrm((1, proj_dim), 1.0 / math.sqrt(hidden)),
        "cw": nrm((proj_dim, label_num), 1.0 / math.sqrt(proj_dim)),
        "cb": nrm((1, label_num), 1.0 / math.sqrt(proj_dim)),
    }
    return params


def _round_up(n, m):
    return ((n + m - 1) // m) * m


def pack_params(params, hidden, label_num, proj_dim, lane=128):
    """Pad channel dims to 128 lanes, place per-layer label columns at lane
    offsets l*LABEL_SLOT inside one 128-wide slab, cast matmul weights +
    embedding to bf16 (biases stay f32)."""
    HP = _round_up(hidden, lane)
    PP = _round_up(proj_dim, lane)
    layers = params["conv_layers"]
    NL = len(layers)
    LW = _round_up((NL + 1) * LABEL_SLOT, lane)
    assert (NL + 1) * LABEL_SLOT <= LW

    def pad2(a, rows, cols, col_off=0, dtype=None):
        dtype = dtype if dtype is not None else a.dtype
        out = jnp.zeros((rows, cols), dtype)
        return out.at[:a.shape[0], col_off:col_off + a.shape[1]].set(
            a.astype(dtype))

    convw = jnp.stack(
        [jnp.stack([pad2(l[f"w{k}"], HP, HP, dtype=jnp.bfloat16)
                    for k in range(3)], axis=0)
         for l in layers], axis=0)                          # (NL, 3, HP, HP)
    convb = jnp.stack([pad2(l["b"], 1, HP) for l in layers], axis=0)
    clsw = jnp.stack(
        [pad2(l["cw"], HP, LW, col_off=i * LABEL_SLOT, dtype=jnp.bfloat16)
         for i, l in enumerate(layers)], axis=0)            # (NL, HP, LW)
    clsb = jnp.stack(
        [pad2(l["cb"], 1, LW, col_off=i * LABEL_SLOT)
         for i, l in enumerate(layers)], axis=0)

    proj = params["proj"]
    emb = params["embedding"]
    return {
        "embedding": pad2(emb, emb.shape[0], HP, dtype=jnp.bfloat16),
        "convw": convw, "convb": convb, "clsw": clsw, "clsb": clsb,
        "pw": pad2(proj["pw"], HP, PP, dtype=jnp.bfloat16),
        "pb": pad2(proj["pb"], 1, PP),
        "pcw": pad2(proj["cw"], PP, LW, col_off=NL * LABEL_SLOT,
                    dtype=jnp.bfloat16),
        "pcb": pad2(proj["cb"], 1, LW, col_off=NL * LABEL_SLOT),
    }


# ---------------------------------------------------------------------------
# Main
# ---------------------------------------------------------------------------

if __name__ == "__main__":
    # Small, module-consistent shapes (module: H=300, L=5, P=768, 6 layers).
    B, S = 2, 16           # batch, seq (S multiple of 8)
    VOCAB = 1000           # module uses 21128; kept small & synthetic
    EMB = HIDDEN = 32      # embedding_dim == conv channels (300 in module)
    LABELS = 5
    PROJ = 64              # proj_hidden_dim (768 in module)
    N_LAYERS = 6

    key = jax.random.PRNGKey(0)
    pkey, ikey = jax.random.split(key)
    params = make_params(pkey, VOCAB, EMB, HIDDEN, LABELS, PROJ, N_LAYERS)
    kparams = pack_params(params, HIDDEN, LABELS, PROJ)
    input_ids = jax.random.randint(ikey, (B, S), 0, VOCAB, dtype=jnp.int32)

    out = cws_cnn_forward(input_ids, kparams, LABELS, PROJ)

    # Sanity-check against the pure-JAX (unpadded, f32) reference.  Tolerance
    # is 2e-2 to cover bf16 matmul inputs (f32 accumulation) across 6 stacked
    # layers; orientation/indexing errors would be O(1) and still caught.
    ref = cws_cnn_forward_ref(input_ids, params)
    assert out["hidden_x"].shape == (B, S, PROJ)
    assert len(out["logits_list"]) == N_LAYERS + 1
    for got, want in zip(out["logits_list"], ref["logits_list"]):
        assert got.shape == (B, S, LABELS)
        assert jnp.allclose(got, want, rtol=2e-2, atol=2e-2), \
            float(jnp.max(jnp.abs(got - want)))
    assert jnp.allclose(out["hidden_x"], ref["hidden_x"], rtol=2e-2, atol=2e-2)

    print("KERNEL_OK")
</pallas_src>

<mosaic_0001>
module attributes {stable_mosaic.version = 11 : i64} {
  func.func @fused_cws_kernel(%arg0: i32, %arg1: memref<2x16x128xbf16, #tpu.memory_space<vmem>>, %arg2: memref<6x3x128x128xbf16, #tpu.memory_space<vmem>>, %arg3: memref<6x1x128xf32, #tpu.memory_space<vmem>>, %arg4: memref<6x128x128xbf16, #tpu.memory_space<vmem>>, %arg5: memref<6x1x128xf32, #tpu.memory_space<vmem>>, %arg6: memref<128x128xbf16, #tpu.memory_space<vmem>>, %arg7: memref<1x128xf32, #tpu.memory_space<vmem>>, %arg8: memref<128x128xbf16, #tpu.memory_space<vmem>>, %arg9: memref<1x128xf32, #tpu.memory_space<vmem>>, %arg10: memref<2x16x128xf32, #tpu.memory_space<vmem>>, %arg11: memref<2x16x128xf32, #tpu.memory_space<vmem>>) attributes {dimension_semantics = [#tpu.dimension_semantics<parallel>], iteration_bounds = array<i64: 1>, scalar_prefetch = 0 : i64, scratch_operands = 0 : i64, tpu.core_type = #tpu.core_type<tc>, window_params = [{transform_indices = @transform_0, window_bounds = array<i64: 2, 16, 128>}, {pipeline_mode = #tpu.pipeline_mode<synchronous>, transform_indices = @transform_1, window_bounds = array<i64: 6, 3, 128, 128>}, {pipeline_mode = #tpu.pipeline_mode<synchronous>, transform_indices = @transform_2, window_bounds = array<i64: 6, 1, 128>}, {pipeline_mode = #tpu.pipeline_mode<synchronous>, transform_indices = @transform_3, window_bounds = array<i64: 6, 128, 128>}, {pipeline_mode = #tpu.pipeline_mode<synchronous>, transform_indices = @transform_4, window_bounds = array<i64: 6, 1, 128>}, {pipeline_mode = #tpu.pipeline_mode<synchronous>, transform_indices = @transform_5, window_bounds = array<i64: 128, 128>}, {pipeline_mode = #tpu.pipeline_mode<synchronous>, transform_indices = @transform_6, window_bounds = array<i64: 1, 128>}, {pipeline_mode = #tpu.pipeline_mode<synchronous>, transform_indices = @transform_7, window_bounds = array<i64: 128, 128>}, {pipeline_mode = #tpu.pipeline_mode<synchronous>, transform_indices = @transform_8, window_bounds = array<i64: 1, 128>}, {transform_indices = @transform_9, window_bounds = array<i64: 2, 16, 128>}, {transform_indices = @transform_10, window_bounds = array<i64: 2, 16, 128>}]} {
    %c0 = arith.constant 0 : index
    %c0_0 = arith.constant 0 : index
    %c0_1 = arith.constant 0 : index
    %0 = vector.load %arg1[%c0, %c0_0, %c0_1] : memref<2x16x128xbf16, #tpu.memory_space<vmem>>, vector<2x16x128xbf16>
    %1 = vector.shape_cast %0 : vector<2x16x128xbf16> to vector<32x128xbf16>
    %2 = arith.extf %1 : vector<32x128xbf16> to vector<32x128xf32>
    %3 = tpu.iota {dimensions = array<i32: 1>} : vector<2x16x1xi32>
    %4 = vector.shape_cast %3 : vector<2x16x1xi32> to vector<32x1xi32>
    %c0_i32 = arith.constant 0 : i32
    %5 = vector.broadcast %c0_i32 : i32 to vector<32x1xi32>
    %6 = arith.cmpi eq, %4, %5 : vector<32x1xi32>
    %c15_i32 = arith.constant 15 : i32
    %7 = vector.broadcast %c15_i32 : i32 to vector<32x1xi32>
    %8 = arith.cmpi eq, %4, %7 : vector<32x1xi32>
    %cst = arith.constant 0.000000e+00 : f32
    %9 = vector.broadcast %cst : f32 to vector<32x128xf32>
    %c1_i32 = arith.constant 1 : i32
    %10 = tpu.dynamic_rotate %2 by %c1_i32 dim 0 : vector<32x128xf32>, i32 -> vector<32x128xf32>
    %cst_2 = arith.constant 0.000000e+00 : f32
    %11 = vector.shape_cast %6 : vector<32x1xi1> to vector<32x1xi1>
    %12 = vector.broadcast %11 : vector<32x1xi1> to vector<32x128xi1>
    %13 = vector.broadcast %cst_2 : f32 to vector<32x128xf32>
    %14 = arith.select %12, %13, %10 : vector<32x128xi1>, vector<32x128xf32>
    %c31_i32 = arith.constant 31 : i32
    %15 = tpu.dynamic_rotate %2 by %c31_i32 dim 0 : vector<32x128xf32>, i32 -> vector<32x128xf32>
    %cst_3 = arith.constant 0.000000e+00 : f32
    %16 = vector.shape_cast %8 : vector<32x1xi1> to vector<32x1xi1>
    %17 = vector.broadcast %16 : vector<32x1xi1> to vector<32x128xi1>
    %18 = vector.broadcast %cst_3 : f32 to vector<32x128xf32>
    %19 = arith.select %17, %18, %15 : vector<32x128xi1>, vector<32x128xf32>
    %20 = arith.truncf %14 : vector<32x128xf32> to vector<32x128xbf16>
    %c0_4 = arith.constant 0 : index
    %c0_5 = arith.constant 0 : index
    %c0_6 = arith.constant 0 : index
    %c0_7 = arith.constant 0 : index
    %21 = vector.load %arg2[%c0_4, %c0_5, %c0_6, %c0_7] : memref<6x3x128x128xbf16, #tpu.memory_space<vmem>>, vector<1x1x128x128xbf16>
    %22 = vector.shape_cast %21 : vector<1x1x128x128xbf16> to vector<128x128xbf16>
    %cst_8 = arith.constant dense<0.000000e+00> : vector<32x128xf32>
    %23 = tpu.matmul %20, %22, %cst_8 {dimension_numbers = #tpu.dot_dimension_numbers<[1], [0], [0], [1], [0, 0, 1, 1], [], []>} : vector<32x128xbf16>, vector<128x128xbf16>, vector<32x128xf32> -> vector<32x128xf32>
    %24 = arith.truncf %2 : vector<32x128xf32> to vector<32x128xbf16>
    %c0_9 = arith.constant 0 : index
    %c1 = arith.constant 1 : index
    %c0_10 = arith.constant 0 : index
    %c0_11 = arith.constant 0 : index
    %25 = vector.load %arg2[%c0_9, %c1, %c0_10, %c0_11] : memref<6x3x128x128xbf16, #tpu.memory_space<vmem>>, vector<1x1x128x128xbf16>
    %26 = vector.shape_cast %25 : vector<1x1x128x128xbf16> to vector<128x128xbf16>
    %cst_12 = arith.constant dense<0.000000e+00> : vector<32x128xf32>
    %27 = tpu.matmul %24, %26, %cst_12 {dimension_numbers = #tpu.dot_dimension_numbers<[1], [0], [0], [1], [0, 0, 1, 1], [], []>} : vector<32x128xbf16>, vector<128x128xbf16>, vector<32x128xf32> -> vector<32x128xf32>
    %28 = arith.addf %23, %27 : vector<32x128xf32>
    %29 = arith.truncf %19 : vector<32x128xf32> to vector<32x128xbf16>
    %c0_13 = arith.constant 0 : index
    %c2 = arith.constant 2 : index
    %c0_14 = arith.constant 0 : index
    %c0_15 = arith.constant 0 : index
    %30 = vector.load %arg2[%c0_13, %c2, %c0_14, %c0_15] : memref<6x3x128x128xbf16, #tpu.memory_space<vmem>>, vector<1x1x128x128xbf16>
    %31 = vector.shape_cast %30 : vector<1x1x128x128xbf16> to vector<128x128xbf16>
    %cst_16 = arith.constant dense<0.000000e+00> : vector<32x128xf32>
    %32 = tpu.matmul %29, %31, %cst_16 {dimension_numbers = #tpu.dot_dimension_numbers<[1], [0], [0], [1], [0, 0, 1, 1], [], []>} : vector<32x128xbf16>, vector<128x128xbf16>, vector<32x128xf32> -> vector<32x128xf32>
    %33 = arith.addf %28, %32 : vector<32x128xf32>
    %c0_17 = arith.constant 0 : index
    %c0_18 = arith.constant 0 : index
    %c0_19 = arith.constant 0 : index
    %34 = vector.load %arg3[%c0_17, %c0_18, %c0_19] : memref<6x1x128xf32, #tpu.memory_space<vmem>>, vector<1x1x128xf32>
    %35 = vector.shape_cast %34 : vector<1x1x128xf32> to vector<1x128xf32>
    %36 = vector.broadcast %35 : vector<1x128xf32> to vector<32x128xf32>
    %37 = arith.addf %33, %36 : vector<32x128xf32>
    %cst_20 = arith.constant 0.000000e+00 : f32
    %38 = vector.broadcast %cst_20 : f32 to vector<32x128xf32>
    %39 = arith.maximumf %37, %38 : vector<32x128xf32>
    %40 = arith.truncf %39 : vector<32x128xf32> to vector<32x128xbf16>
    %c0_21 = arith.constant 0 : index
    %c0_22 = arith.constant 0 : index
    %c0_23 = arith.constant 0 : index
    %41 = vector.load %arg4[%c0_21, %c0_22, %c0_23] : memref<6x128x128xbf16, #tpu.memory_space<vmem>>, vector<1x128x128xbf16>
    %42 = vector.shape_cast %41 : vector<1x128x128xbf16> to vector<128x128xbf16>
    %cst_24 = arith.constant dense<0.000000e+00> : vector<32x128xf32>
    %43 = tpu.matmul %40, %42, %cst_24 {dimension_numbers = #tpu.dot_dimension_numbers<[1], [0], [0], [1], [0, 0, 1, 1], [], []>} : vector<32x128xbf16>, vector<128x128xbf16>, vector<32x128xf32> -> vector<32x128xf32>
    %44 = arith.addf %9, %43 : vector<32x128xf32>
    %c0_25 = arith.constant 0 : index
    %c0_26 = arith.constant 0 : index
    %c0_27 = arith.constant 0 : index
    %45 = vector.load %arg5[%c0_25, %c0_26, %c0_27] : memref<6x1x128xf32, #tpu.memory_space<vmem>>, vector<1x1x128xf32>
    %46 = vector.shape_cast %45 : vector<1x1x128xf32> to vector<1x128xf32>
    %47 = vector.broadcast %46 : vector<1x128xf32> to vector<32x128xf32>
    %48 = arith.addf %44, %47 : vector<32x128xf32>
    %c1_i32_28 = arith.constant 1 : i32
    %49 = tpu.dynamic_rotate %39 by %c1_i32_28 dim 0 : vector<32x128xf32>, i32 -> vector<32x128xf32>
    %cst_29 = arith.constant 0.000000e+00 : f32
    %50 = vector.shape_cast %6 : vector<32x1xi1> to vector<32x1xi1>
    %51 = vector.broadcast %50 : vector<32x1xi1> to vector<32x128xi1>
    %52 = vector.broadcast %cst_29 : f32 to vector<32x128xf32>
    %53 = arith.select %51, %52, %49 : vector<32x128xi1>, vector<32x128xf32>
    %c31_i32_30 = arith.constant 31 : i32
    %54 = tpu.dynamic_rotate %39 by %c31_i32_30 dim 0 : vector<32x128xf32>, i32 -> vector<32x128xf32>
    %cst_31 = arith.constant 0.000000e+00 : f32
    %55 = vector.shape_cast %8 : vector<32x1xi1> to vector<32x1xi1>
    %56 = vector.broadcast %55 : vector<32x1xi1> to vector<32x128xi1>
    %57 = vector.broadcast %cst_31 : f32 to vector<32x128xf32>
    %58 = arith.select %56, %57, %54 : vector<32x128xi1>, vector<32x128xf32>
    %59 = arith.truncf %53 : vector<32x128xf32> to vector<32x128xbf16>
    %c1_32 = arith.constant 1 : index
    %c0_33 = arith.constant 0 : index
    %c0_34 = arith.constant 0 : index
    %c0_35 = arith.constant 0 : index
    %60 = vector.load %arg2[%c1_32, %c0_33, %c0_34, %c0_35] : memref<6x3x128x128xbf16, #tpu.memory_space<vmem>>, vector<1x1x128x128xbf16>
    %61 = vector.shape_cast %60 : vector<1x1x128x128xbf16> to vector<128x128xbf16>
    %cst_36 = arith.constant dense<0.000000e+00> : vector<32x128xf32>
    %62 = tpu.matmul %59, %61, %cst_36 {dimension_numbers = #tpu.dot_dimension_numbers<[1], [0], [0], [1], [0, 0, 1, 1], [], []>} : vector<32x128xbf16>, vector<128x128xbf16>, vector<32x128xf32> -> vector<32x128xf32>
    %63 = arith.truncf %39 : vector<32x128xf32> to vector<32x128xbf16>
    %c1_37 = arith.constant 1 : index
    %c1_38 = arith.constant 1 : index
    %c0_39 = arith.constant 0 : index
    %c0_40 = arith.constant 0 : index
    %64 = vector.load %arg2[%c1_37, %c1_38, %c0_39, %c0_40] : memref<6x3x128x128xbf16, #tpu.memory_space<vmem>>, vector<1x1x128x128xbf16>
    %65 = vector.shape_cast %64 : vector<1x1x128x128xbf16> to vector<128x128xbf16>
    %cst_41 = arith.constant dense<0.000000e+00> : vector<32x128xf32>
    %66 = tpu.matmul %63, %65, %cst_41 {dimension_numbers = #tpu.dot_dimension_numbers<[1], [0], [0], [1], [0, 0, 1, 1], [], []>} : vector<32x128xbf16>, vector<128x128xbf16>, vector<32x128xf32> -> vector<32x128xf32>
    %67 = arith.addf %62, %66 : vector<32x128xf32>
    %68 = arith.truncf %58 : vector<32x128xf32> to vector<32x128xbf16>
    %c1_42 = arith.constant 1 : index
    %c2_43 = arith.constant 2 : index
    %c0_44 = arith.constant 0 : index
    %c0_45 = arith.constant 0 : index
    %69 = vector.load %arg2[%c1_42, %c2_43, %c0_44, %c0_45] : memref<6x3x128x128xbf16, #tpu.memory_space<vmem>>, vector<1x1x128x128xbf16>
    %70 = vector.shape_cast %69 : vector<1x1x128x128xbf16> to vector<128x128xbf16>
    %cst_46 = arith.constant dense<0.000000e+00> : vector<32x128xf32>
    %71 = tpu.matmul %68, %70, %cst_46 {dimension_numbers = #tpu.dot_dimension_numbers<[1], [0], [0], [1], [0, 0, 1, 1], [], []>} : vector<32x128xbf16>, vector<128x128xbf16>, vector<32x128xf32> -> vector<32x128xf32>
    %72 = arith.addf %67, %71 : vector<32x128xf32>
    %c1_47 = arith.constant 1 : index
    %c0_48 = arith.constant 0 : index
    %c0_49 = arith.constant 0 : index
    %73 = vector.load %arg3[%c1_47, %c0_48, %c0_49] : memref<6x1x128xf32, #tpu.memory_space<vmem>>, vector<1x1x128xf32>
    %74 = vector.shape_cast %73 : vector<1x1x128xf32> to vector<1x128xf32>
    %75 = vector.broadcast %74 : vector<1x128xf32> to vector<32x128xf32>
    %76 = arith.addf %72, %75 : vector<32x128xf32>
    %cst_50 = arith.constant 0.000000e+00 : f32
    %77 = vector.broadcast %cst_50 : f32 to vector<32x128xf32>
    %78 = arith.maximumf %76, %77 : vector<32x128xf32>
    %79 = arith.truncf %78 : vector<32x128xf32> to vector<32x128xbf16>
    %c1_51 = arith.constant 1 : index
    %c0_52 = arith.constant 0 : index
    %c0_53 = arith.constant 0 : index
    %80 = vector.load %arg4[%c1_51, %c0_52, %c0_53] : memref<6x128x128xbf16, #tpu.memory_space<vmem>>, vector<1x128x128xbf16>
    %81 = vector.shape_cast %80 : vector<1x128x128xbf16> to vector<128x128xbf16>
    %cst_54 = arith.constant dense<0.000000e+00> : vector<32x128xf32>
    %82 = tpu.matmul %79, %81, %cst_54 {dimension_numbers = #tpu.dot_dimension_numbers<[1], [0], [0], [1], [0, 0, 1, 1], [], []>} : vector<32x128xbf16>, vector<128x128xbf16>, vector<32x128xf32> -> vector<32x128xf32>
    %83 = arith.addf %48, %82 : vector<32x128xf32>
    %c1_55 = arith.constant 1 : index
    %c0_56 = arith.constant 0 : index
    %c0_57 = arith.constant 0 : index
    %84 = vector.load %arg5[%c1_55, %c0_56, %c0_57] : memref<6x1x128xf32, #tpu.memory_space<vmem>>, vector<1x1x128xf32>
    %85 = vector.shape_cast %84 : vector<1x1x128xf32> to vector<1x128xf32>
    %86 = vector.broadcast %85 : vector<1x128xf32> to vector<32x128xf32>
    %87 = arith.addf %83, %86 : vector<32x128xf32>
    %c1_i32_58 = arith.constant 1 : i32
    %88 = tpu.dynamic_rotate %78 by %c1_i32_58 dim 0 : vector<32x128xf32>, i32 -> vector<32x128xf32>
    %cst_59 = arith.constant 0.000000e+00 : f32
    %89 = vector.shape_cast %6 : vector<32x1xi1> to vector<32x1xi1>
    %90 = vector.broadcast %89 : vector<32x1xi1> to vector<32x128xi1>
    %91 = vector.broadcast %cst_59 : f32 to vector<32x128xf32>
    %92 = arith.select %90, %91, %88 : vector<32x128xi1>, vector<32x128xf32>
    %c31_i32_60 = arith.constant 31 : i32
    %93 = tpu.dynamic_rotate %78 by %c31_i32_60 dim 0 : vector<32x128xf32>, i32 -> vector<32x128xf32>
    %cst_61 = arith.constant 0.000000e+00 : f32
    %94 = vector.shape_cast %8 : vector<32x1xi1> to vector<32x1xi1>
    %95 = vector.broadcast %94 : vector<32x1xi1> to vector<32x128xi1>
    %96 = vector.broadcast %cst_61 : f32 to vector<32x128xf32>
    %97 = arith.select %95, %96, %93 : vector<32x128xi1>, vector<32x128xf32>
    %98 = arith.truncf %92 : vector<32x128xf32> to vector<32x128xbf16>
    %c2_62 = arith.constant 2 : index
    %c0_63 = arith.constant 0 : index
    %c0_64 = arith.constant 0 : index
    %c0_65 = arith.constant 0 : index
    %99 = vector.load %arg2[%c2_62, %c0_63, %c0_64, %c0_65] : memref<6x3x128x128xbf16, #tpu.memory_space<vmem>>, vector<1x1x128x128xbf16>
    %100 = vector.shape_cast %99 : vector<1x1x128x128xbf16> to vector<128x128xbf16>
    %cst_66 = arith.constant dense<0.000000e+00> : vector<32x128xf32>
    %101 = tpu.matmul %98, %100, %cst_66 {dimension_numbers = #tpu.dot_dimension_numbers<[1], [0], [0], [1], [0, 0, 1, 1], [], []>} : vector<32x128xbf16>, vector<128x128xbf16>, vector<32x128xf32> -> vector<32x128xf32>
    %102 = arith.truncf %78 : vector<32x128xf32> to vector<32x128xbf16>
    %c2_67 = arith.constant 2 : index
    %c1_68 = arith.constant 1 : index
    %c0_69 = arith.constant 0 : index
    %c0_70 = arith.constant 0 : index
    %103 = vector.load %arg2[%c2_67, %c1_68, %c0_69, %c0_70] : memref<6x3x128x128xbf16, #tpu.memory_space<vmem>>, vector<1x1x128x128xbf16>
    %104 = vector.shape_cast %103 : vector<1x1x128x128xbf16> to vector<128x128xbf16>
    %cst_71 = arith.constant dense<0.000000e+00> : vector<32x128xf32>
    %105 = tpu.matmul %102, %104, %cst_71 {dimension_numbers = #tpu.dot_dimension_numbers<[1], [0], [0], [1], [0, 0, 1, 1], [], []>} : vector<32x128xbf16>, vector<128x128xbf16>, vector<32x128xf32> -> vector<32x128xf32>
    %106 = arith.addf %101, %105 : vector<32x128xf32>
    %107 = arith.truncf %97 : vector<32x128xf32> to vector<32x128xbf16>
    %c2_72 = arith.constant 2 : index
    %c2_73 = arith.constant 2 : index
    %c0_74 = arith.constant 0 : index
    %c0_75 = arith.constant 0 : index
    %108 = vector.load %arg2[%c2_72, %c2_73, %c0_74, %c0_75] : memref<6x3x128x128xbf16, #tpu.memory_space<vmem>>, vector<1x1x128x128xbf16>
    %109 = vector.shape_cast %108 : vector<1x1x128x128xbf16> to vector<128x128xbf16>
    %cst_76 = arith.constant dense<0.000000e+00> : vector<32x128xf32>
    %110 = tpu.matmul %107, %109, %cst_76 {dimension_numbers = #tpu.dot_dimension_numbers<[1], [0], [0], [1], [0, 0, 1, 1], [], []>} : vector<32x128xbf16>, vector<128x128xbf16>, vector<32x128xf32> -> vector<32x128xf32>
    %111 = arith.addf %106, %110 : vector<32x128xf32>
    %c2_77 = arith.constant 2 : index
    %c0_78 = arith.constant 0 : index
    %c0_79 = arith.constant 0 : index
    %112 = vector.load %arg3[%c2_77, %c0_78, %c0_79] : memref<6x1x128xf32, #tpu.memory_space<vmem>>, vector<1x1x128xf32>
    %113 = vector.shape_cast %112 : vector<1x1x128xf32> to vector<1x128xf32>
    %114 = vector.broadcast %113 : vector<1x128xf32> to vector<32x128xf32>
    %115 = arith.addf %111, %114 : vector<32x128xf32>
    %cst_80 = arith.constant 0.000000e+00 : f32
    %116 = vector.broadcast %cst_80 : f32 to vector<32x128xf32>
    %117 = arith.maximumf %115, %116 : vector<32x128xf32>
    %118 = arith.truncf %117 : vector<32x128xf32> to vector<32x128xbf16>
    %c2_81 = arith.constant 2 : index
    %c0_82 = arith.constant 0 : index
    %c0_83 = arith.constant 0 : index
    %119 = vector.load %arg4[%c2_81, %c0_82, %c0_83] : memref<6x128x128xbf16, #tpu.memory_space<vmem>>, vector<1x128x128xbf16>
    %120 = vector.shape_cast %119 : vector<1x128x128xbf16> to vector<128x128xbf16>
    %cst_84 = arith.constant dense<0.000000e+00> : vector<32x128xf32>
    %121 = tpu.matmul %118, %120, %cst_84 {dimension_numbers = #tpu.dot_dimension_numbers<[1], [0], [0], [1], [0, 0, 1, 1], [], []>} : vector<32x128xbf16>, vector<128x128xbf16>, vector<32x128xf32> -> vector<32x128xf32>
    %122 = arith.addf %87, %121 : vector<32x128xf32>
    %c2_85 = arith.constant 2 : index
    %c0_86 = arith.constant 0 : index
    %c0_87 = arith.constant 0 : index
    %123 = vector.load %arg5[%c2_85, %c0_86, %c0_87] : memref<6x1x128xf32, #tpu.memory_space<vmem>>, vector<1x1x128xf32>
    %124 = vector.shape_cast %123 : vector<1x1x128xf32> to vector<1x128xf32>
    %125 = vector.broadcast %124 : vector<1x128xf32> to vector<32x128xf32>
    %126 = arith.addf %122, %125 : vector<32x128xf32>
    %c1_i32_88 = arith.constant 1 : i32
    %127 = tpu.dynamic_rotate %117 by %c1_i32_88 dim 0 : vector<32x128xf32>, i32 -> vector<32x128xf32>
    %cst_89 = arith.constant 0.000000e+00 : f32
    %128 = vector.shape_cast %6 : vector<32x1xi1> to vector<32x1xi1>
    %129 = vector.broadcast %128 : vector<32x1xi1> to vector<32x128xi1>
    %130 = vector.broadcast %cst_89 : f32 to vector<32x128xf32>
    %131 = arith.select %129, %130, %127 : vector<32x128xi1>, vector<32x128xf32>
    %c31_i32_90 = arith.constant 31 : i32
    %132 = tpu.dynamic_rotate %117 by %c31_i32_90 dim 0 : vector<32x128xf32>, i32 -> vector<32x128xf32>
    %cst_91 = arith.constant 0.000000e+00 : f32
    %133 = vector.shape_cast %8 : vector<32x1xi1> to vector<32x1xi1>
    %134 = vector.broadcast %133 : vector<32x1xi1> to vector<32x128xi1>
    %135 = vector.broadcast %cst_91 : f32 to vector<32x128xf32>
    %136 = arith.select %134, %135, %132 : vector<32x128xi1>, vector<32x128xf32>
    %137 = arith.truncf %131 : vector<32x128xf32> to vector<32x128xbf16>
    %c3 = arith.constant 3 : index
    %c0_92 = arith.constant 0 : index
    %c0_93 = arith.constant 0 : index
    %c0_94 = arith.constant 0 : index
    %138 = vector.load %arg2[%c3, %c0_92, %c0_93, %c0_94] : memref<6x3x128x128xbf16, #tpu.memory_space<vmem>>, vector<1x1x128x128xbf16>
    %139 = vector.shape_cast %138 : vector<1x1x128x128xbf16> to vector<128x128xbf16>
    %cst_95 = arith.constant dense<0.000000e+00> : vector<32x128xf32>
    %140 = tpu.matmul %137, %139, %cst_95 {dimension_numbers = #tpu.dot_dimension_numbers<[1], [0], [0], [1], [0, 0, 1, 1], [], []>} : vector<32x128xbf16>, vector<128x128xbf16>, vector<32x128xf32> -> vector<32x128xf32>
    %141 = arith.truncf %117 : vector<32x128xf32> to vector<32x128xbf16>
    %c3_96 = arith.constant 3 : index
    %c1_97 = arith.constant 1 : index
    %c0_98 = arith.constant 0 : index
    %c0_99 = arith.constant 0 : index
    %142 = vector.load %arg2[%c3_96, %c1_97, %c0_98, %c0_99] : memref<6x3x128x128xbf16, #tpu.memory_space<vmem>>, vector<1x1x128x128xbf16>
    %143 = vector.shape_cast %142 : vector<1x1x128x128xbf16> to vector<128x128xbf16>
    %cst_100 = arith.constant dense<0.000000e+00> : vector<32x128xf32>
    %144 = tpu.matmul %141, %143, %cst_100 {dimension_numbers = #tpu.dot_dimension_numbers<[1], [0], [0], [1], [0, 0, 1, 1], [], []>} : vector<32x128xbf16>, vector<128x128xbf16>, vector<32x128xf32> -> vector<32x128xf32>
    %145 = arith.addf %140, %144 : vector<32x128xf32>
    %146 = arith.truncf %136 : vector<32x128xf32> to vector<32x128xbf16>
    %c3_101 = arith.constant 3 : index
    %c2_102 = arith.constant 2 : index
    %c0_103 = arith.constant 0 : index
    %c0_104 = arith.constant 0 : index
    %147 = vector.load %arg2[%c3_101, %c2_102, %c0_103, %c0_104] : memref<6x3x128x128xbf16, #tpu.memory_space<vmem>>, vector<1x1x128x128xbf16>
    %148 = vector.shape_cast %147 : vector<1x1x128x128xbf16> to vector<128x128xbf16>
    %cst_105 = arith.constant dense<0.000000e+00> : vector<32x128xf32>
    %149 = tpu.matmul %146, %148, %cst_105 {dimension_numbers = #tpu.dot_dimension_numbers<[1], [0], [0], [1], [0, 0, 1, 1], [], []>} : vector<32x128xbf16>, vector<128x128xbf16>, vector<32x128xf32> -> vector<32x128xf32>
    %150 = arith.addf %145, %149 : vector<32x128xf32>
    %c3_106 = arith.constant 3 : index
    %c0_107 = arith.constant 0 : index
    %c0_108 = arith.constant 0 : index
    %151 = vector.load %arg3[%c3_106, %c0_107, %c0_108] : memref<6x1x128xf32, #tpu.memory_space<vmem>>, vector<1x1x128xf32>
    %152 = vector.shape_cast %151 : vector<1x1x128xf32> to vector<1x128xf32>
    %153 = vector.broadcast %152 : vector<1x128xf32> to vector<32x128xf32>
    %154 = arith.addf %150, %153 : vector<32x128xf32>
    %cst_109 = arith.constant 0.000000e+00 : f32
    %155 = vector.broadcast %cst_109 : f32 to vector<32x128xf32>
    %156 = arith.maximumf %154, %155 : vector<32x128xf32>
    %157 = arith.truncf %156 : vector<32x128xf32> to vector<32x128xbf16>
    %c3_110 = arith.constant 3 : index
    %c0_111 = arith.constant 0 : index
    %c0_112 = arith.constant 0 : index
    %158 = vector.load %arg4[%c3_110, %c0_111, %c0_112] : memref<6x128x128xbf16, #tpu.memory_space<vmem>>, vector<1x128x128xbf16>
    %159 = vector.shape_cast %158 : vector<1x128x128xbf16> to vector<128x128xbf16>
    %cst_113 = arith.constant dense<0.000000e+00> : vector<32x128xf32>
    %160 = tpu.matmul %157, %159, %cst_113 {dimension_numbers = #tpu.dot_dimension_numbers<[1], [0], [0], [1], [0, 0, 1, 1], [], []>} : vector<32x128xbf16>, vector<128x128xbf16>, vector<32x128xf32> -> vector<32x128xf32>
    %161 = arith.addf %126, %160 : vector<32x128xf32>
    %c3_114 = arith.constant 3 : index
    %c0_115 = arith.constant 0 : index
    %c0_116 = arith.constant 0 : index
    %162 = vector.load %arg5[%c3_114, %c0_115, %c0_116] : memref<6x1x128xf32, #tpu.memory_space<vmem>>, vector<1x1x128xf32>
    %163 = vector.shape_cast %162 : vector<1x1x128xf32> to vector<1x128xf32>
    %164 = vector.broadcast %163 : vector<1x128xf32> to vector<32x128xf32>
    %165 = arith.addf %161, %164 : vector<32x128xf32>
    %c1_i32_117 = arith.constant 1 : i32
    %166 = tpu.dynamic_rotate %156 by %c1_i32_117 dim 0 : vector<32x128xf32>, i32 -> vector<32x128xf32>
    %cst_118 = arith.constant 0.000000e+00 : f32
    %167 = vector.shape_cast %6 : vector<32x1xi1> to vector<32x1xi1>
    %168 = vector.broadcast %167 : vector<32x1xi1> to vector<32x128xi1>
    %169 = vector.broadcast %cst_118 : f32 to vector<32x128xf32>
    %170 = arith.select %168, %169, %166 : vector<32x128xi1>, vector<32x128xf32>
    %c31_i32_119 = arith.constant 31 : i32
    %171 = tpu.dynamic_rotate %156 by %c31_i32_119 dim 0 : vector<32x128xf32>, i32 -> vector<32x128xf32>
    %cst_120 = arith.constant 0.000000e+00 : f32
    %172 = vector.shape_cast %8 : vector<32x1xi1> to vector<32x1xi1>
    %173 = vector.broadcast %172 : vector<32x1xi1> to vector<32x128xi1>
    %174 = vector.broadcast %cst_120 : f32 to vector<32x128xf32>
    %175 = arith.select %173, %174, %171 : vector<32x128xi1>, vector<32x128xf32>
    %176 = arith.truncf %170 : vector<32x128xf32> to vector<32x128xbf16>
    %c4 = arith.constant 4 : index
    %c0_121 = arith.constant 0 : index
    %c0_122 = arith.constant 0 : index
    %c0_123 = arith.constant 0 : index
    %177 = vector.load %arg2[%c4, %c0_121, %c0_122, %c0_123] : memref<6x3x128x128xbf16, #tpu.memory_space<vmem>>, vector<1x1x128x128xbf16>
    %178 = vector.shape_cast %177 : vector<1x1x128x128xbf16> to vector<128x128xbf16>
    %cst_124 = arith.constant dense<0.000000e+00> : vector<32x128xf32>
    %179 = tpu.matmul %176, %178, %cst_124 {dimension_numbers = #tpu.dot_dimension_numbers<[1], [0], [0], [1], [0, 0, 1, 1], [], []>} : vector<32x128xbf16>, vector<128x128xbf16>, vector<32x128xf32> -> vector<32x128xf32>
    %180 = arith.truncf %156 : vector<32x128xf32> to vector<32x128xbf16>
    %c4_125 = arith.constant 4 : index
    %c1_126 = arith.constant 1 : index
    %c0_127 = arith.constant 0 : index
    %c0_128 = arith.constant 0 : index
    %181 = vector.load %arg2[%c4_125, %c1_126, %c0_127, %c0_128] : memref<6x3x128x128xbf16, #tpu.memory_space<vmem>>, vector<1x1x128x128xbf16>
    %182 = vector.shape_cast %181 : vector<1x1x128x128xbf16> to vector<128x128xbf16>
    %cst_129 = arith.constant dense<0.000000e+00> : vector<32x128xf32>
    %183 = tpu.matmul %180, %182, %cst_129 {dimension_numbers = #tpu.dot_dimension_numbers<[1], [0], [0], [1], [0, 0, 1, 1], [], []>} : vector<32x128xbf16>, vector<128x128xbf16>, vector<32x128xf32> -> vector<32x128xf32>
    %184 = arith.addf %179, %183 : vector<32x128xf32>
    %185 = arith.truncf %175 : vector<32x128xf32> to vector<32x128xbf16>
    %c4_130 = arith.constant 4 : index
    %c2_131 = arith.constant 2 : index
    %c0_132 = arith.constant 0 : index
    %c0_133 = arith.constant 0 : index
    %186 = vector.load %arg2[%c4_130, %c2_131, %c0_132, %c0_133] : memref<6x3x128x128xbf16, #tpu.memory_space<vmem>>, vector<1x1x128x128xbf16>
    %187 = vector.shape_cast %186 : vector<1x1x128x128xbf16> to vector<128x128xbf16>
    %cst_134 = arith.constant dense<0.000000e+00> : vector<32x128xf32>
    %188 = tpu.matmul %185, %187, %cst_134 {dimension_numbers = #tpu.dot_dimension_numbers<[1], [0], [0], [1], [0, 0, 1, 1], [], []>} : vector<32x128xbf16>, vector<128x128xbf16>, vector<32x128xf32> -> vector<32x128xf32>
    %189 = arith.addf %184, %188 : vector<32x128xf32>
    %c4_135 = arith.constant 4 : index
    %c0_136 = arith.constant 0 : index
    %c0_137 = arith.constant 0 : index
    %190 = vector.load %arg3[%c4_135, %c0_136, %c0_137] : memref<6x1x128xf32, #tpu.memory_space<vmem>>, vector<1x1x128xf32>
    %191 = vector.shape_cast %190 : vector<1x1x128xf32> to vector<1x128xf32>
    %192 = vector.broadcast %191 : vector<1x128xf32> to vector<32x128xf32>
    %193 = arith.addf %189, %192 : vector<32x128xf32>
    %cst_138 = arith.constant 0.000000e+00 : f32
    %194 = vector.broadcast %cst_138 : f32 to vector<32x128xf32>
    %195 = arith.maximumf %193, %194 : vector<32x128xf32>
    %196 = arith.truncf %195 : vector<32x128xf32> to vector<32x128xbf16>
    %c4_139 = arith.constant 4 : index
    %c0_140 = arith.constant 0 : index
    %c0_141 = arith.constant 0 : index
    %197 = vector.load %arg4[%c4_139, %c0_140, %c0_141] : memref<6x128x128xbf16, #tpu.memory_space<vmem>>, vector<1x128x128xbf16>
    %198 = vector.shape_cast %197 : vector<1x128x128xbf16> to vector<128x128xbf16>
    %cst_142 = arith.constant dense<0.000000e+00> : vector<32x128xf32>
    %199 = tpu.matmul %196, %198, %cst_142 {dimension_numbers = #tpu.dot_dimension_numbers<[1], [0], [0], [1], [0, 0, 1, 1], [], []>} : vector<32x128xbf16>, vector<128x128xbf16>, vector<32x128xf32> -> vector<32x128xf32>
    %200 = arith.addf %165, %199 : vector<32x128xf32>
    %c4_143 = arith.constant 4 : index
    %c0_144 = arith.constant 0 : index
    %c0_145 = arith.constant 0 : index
    %201 = vector.load %arg5[%c4_143, %c0_144, %c0_145] : memref<6x1x128xf32, #tpu.memory_space<vmem>>, vector<1x1x128xf32>
    %202 = vector.shape_cast %201 : vector<1x1x128xf32> to vector<1x128xf32>
    %203 = vector.broadcast %202 : vector<1x128xf32> to vector<32x128xf32>
    %204 = arith.addf %200, %203 : vector<32x128xf32>
    %c1_i32_146 = arith.constant 1 : i32
    %205 = tpu.dynamic_rotate %195 by %c1_i32_146 dim 0 : vector<32x128xf32>, i32 -> vector<32x128xf32>
    %cst_147 = arith.constant 0.000000e+00 : f32
    %206 = vector.shape_cast %6 : vector<32x1xi1> to vector<32x1xi1>
    %207 = vector.broadcast %206 : vector<32x1xi1> to vector<32x128xi1>
    %208 = vector.broadcast %cst_147 : f32 to vector<32x128xf32>
    %209 = arith.select %207, %208, %205 : vector<32x128xi1>, vector<32x128xf32>
    %c31_i32_148 = arith.constant 31 : i32
    %210 = tpu.dynamic_rotate %195 by %c31_i32_148 dim 0 : vector<32x128xf32>, i32 -> vector<32x128xf32>
    %cst_149 = arith.constant 0.000000e+00 : f32
    %211 = vector.shape_cast %8 : vector<32x1xi1> to vector<32x1xi1>
    %212 = vector.broadcast %211 : vector<32x1xi1> to vector<32x128xi1>
    %213 = vector.broadcast %cst_149 : f32 to vector<32x128xf32>
    %214 = arith.select %212, %213, %210 : vector<32x128xi1>, vector<32x128xf32>
    %215 = arith.truncf %209 : vector<32x128xf32> to vector<32x128xbf16>
    %c5 = arith.constant 5 : index
    %c0_150 = arith.constant 0 : index
    %c0_151 = arith.constant 0 : index
    %c0_152 = arith.constant 0 : index
    %216 = vector.load %arg2[%c5, %c0_150, %c0_151, %c0_152] : memref<6x3x128x128xbf16, #tpu.memory_space<vmem>>, vector<1x1x128x128xbf16>
    %217 = vector.shape_cast %216 : vector<1x1x128x128xbf16> to vector<128x128xbf16>
    %cst_153 = arith.constant dense<0.000000e+00> : vector<32x128xf32>
    %218 = tpu.matmul %215, %217, %cst_153 {dimension_numbers = #tpu.dot_dimension_numbers<[1], [0], [0], [1], [0, 0, 1, 1], [], []>} : vector<32x128xbf16>, vector<128x128xbf16>, vector<32x128xf32> -> vector<32x128xf32>
    %219 = arith.truncf %195 : vector<32x128xf32> to vector<32x128xbf16>
    %c5_154 = arith.constant 5 : index
    %c1_155 = arith.constant 1 : index
    %c0_156 = arith.constant 0 : index
    %c0_157 = arith.constant 0 : index
    %220 = vector.load %arg2[%c5_154, %c1_155, %c0_156, %c0_157] : memref<6x3x128x128xbf16, #tpu.memory_space<vmem>>, vector<1x1x128x128xbf16>
    %221 = vector.shape_cast %220 : vector<1x1x128x128xbf16> to vector<128x128xbf16>
    %cst_158 = arith.constant dense<0.000000e+00> : vector<32x128xf32>
    %222 = tpu.matmul %219, %221, %cst_158 {dimension_numbers = #tpu.dot_dimension_numbers<[1], [0], [0], [1], [0, 0, 1, 1], [], []>} : vector<32x128xbf16>, vector<128x128xbf16>, vector<32x128xf32> -> vector<32x128xf32>
    %223 = arith.addf %218, %222 : vector<32x128xf32>
    %224 = arith.truncf %214 : vector<32x128xf32> to vector<32x128xbf16>
    %c5_159 = arith.constant 5 : index
    %c2_160 = arith.constant 2 : index
    %c0_161 = arith.constant 0 : index
    %c0_162 = arith.constant 0 : index
    %225 = vector.load %arg2[%c5_159, %c2_160, %c0_161, %c0_162] : memref<6x3x128x128xbf16, #tpu.memory_space<vmem>>, vector<1x1x128x128xbf16>
    %226 = vector.shape_cast %225 : vector<1x1x128x128xbf16> to vector<128x128xbf16>
    %cst_163 = arith.constant dense<0.000000e+00> : vector<32x128xf32>
    %227 = tpu.matmul %224, %226, %cst_163 {dimension_numbers = #tpu.dot_dimension_numbers<[1], [0], [0], [1], [0, 0, 1, 1], [], []>} : vector<32x128xbf16>, vector<128x128xbf16>, vector<32x128xf32> -> vector<32x128xf32>
    %228 = arith.addf %223, %227 : vector<32x128xf32>
    %c5_164 = arith.constant 5 : index
    %c0_165 = arith.constant 0 : index
    %c0_166 = arith.constant 0 : index
    %229 = vector.load %arg3[%c5_164, %c0_165, %c0_166] : memref<6x1x128xf32, #tpu.memory_space<vmem>>, vector<1x1x128xf32>
    %230 = vector.shape_cast %229 : vector<1x1x128xf32> to vector<1x128xf32>
    %231 = vector.broadcast %230 : vector<1x128xf32> to vector<32x128xf32>
    %232 = arith.addf %228, %231 : vector<32x128xf32>
    %cst_167 = arith.constant 0.000000e+00 : f32
    %233 = vector.broadcast %cst_167 : f32 to vector<32x128xf32>
    %234 = arith.maximumf %232, %233 : vector<32x128xf32>
    %235 = arith.truncf %234 : vector<32x128xf32> to vector<32x128xbf16>
    %c5_168 = arith.constant 5 : index
    %c0_169 = arith.constant 0 : index
    %c0_170 = arith.constant 0 : index
    %236 = vector.load %arg4[%c5_168, %c0_169, %c0_170] : memref<6x128x128xbf16, #tpu.memory_space<vmem>>, vector<1x128x128xbf16>
    %237 = vector.shape_cast %236 : vector<1x128x128xbf16> to vector<128x128xbf16>
    %cst_171 = arith.constant dense<0.000000e+00> : vector<32x128xf32>
    %238 = tpu.matmul %235, %237, %cst_171 {dimension_numbers = #tpu.dot_dimension_numbers<[1], [0], [0], [1], [0, 0, 1, 1], [], []>} : vector<32x128xbf16>, vector<128x128xbf16>, vector<32x128xf32> -> vector<32x128xf32>
    %239 = arith.addf %204, %238 : vector<32x128xf32>
    %c5_172 = arith.constant 5 : index
    %c0_173 = arith.constant 0 : index
    %c0_174 = arith.constant 0 : index
    %240 = vector.load %arg5[%c5_172, %c0_173, %c0_174] : memref<6x1x128xf32, #tpu.memory_space<vmem>>, vector<1x1x128xf32>
    %241 = vector.shape_cast %240 : vector<1x1x128xf32> to vector<1x128xf32>
    %242 = vector.broadcast %241 : vector<1x128xf32> to vector<32x128xf32>
    %243 = arith.addf %239, %242 : vector<32x128xf32>
    %244 = arith.truncf %234 : vector<32x128xf32> to vector<32x128xbf16>
    %c0_175 = arith.constant 0 : index
    %c0_176 = arith.constant 0 : index
    %245 = vector.load %arg6[%c0_175, %c0_176] : memref<128x128xbf16, #tpu.memory_space<vmem>>, vector<128x128xbf16>
    %cst_177 = arith.constant dense<0.000000e+00> : vector<32x128xf32>
    %246 = tpu.matmul %244, %245, %cst_177 {dimension_numbers = #tpu.dot_dimension_numbers<[1], [0], [0], [1], [0, 0, 1, 1], [], []>} : vector<32x128xbf16>, vector<128x128xbf16>, vector<32x128xf32> -> vector<32x128xf32>
    %c0_178 = arith.constant 0 : index
    %c0_179 = arith.constant 0 : index
    %247 = vector.load %arg7[%c0_178, %c0_179] : memref<1x128xf32, #tpu.memory_space<vmem>>, vector<1x128xf32>
    %248 = vector.broadcast %247 : vector<1x128xf32> to vector<32x128xf32>
    %249 = arith.addf %246, %248 : vector<32x128xf32>
    %250 = vector.shape_cast %249 : vector<32x128xf32> to vector<2x16x128xf32>
    %c0_180 = arith.constant 0 : index
    %c0_181 = arith.constant 0 : index
    %c0_182 = arith.constant 0 : index
    %251 = vector.load %arg10[%c0_180, %c0_181, %c0_182] : memref<2x16x128xf32, #tpu.memory_space<vmem>>, vector<2x16x128xf32>
    tpu.vector_store %arg10[%c0_180, %c0_181, %c0_182], %250 {strides = array<i32>} : memref<2x16x128xf32, #tpu.memory_space<vmem>>, vector<2x16x128xf32>,
    %252 = arith.truncf %249 : vector<32x128xf32> to vector<32x128xbf16>
    %c0_183 = arith.constant 0 : index
    %c0_184 = arith.constant 0 : index
    %253 = vector.load %arg8[%c0_183, %c0_184] : memref<128x128xbf16, #tpu.memory_space<vmem>>, vector<128x128xbf16>
    %cst_185 = arith.constant dense<0.000000e+00> : vector<32x128xf32>
    %254 = tpu.matmul %252, %253, %cst_185 {dimension_numbers = #tpu.dot_dimension_numbers<[1], [0], [0], [1], [0, 0, 1, 1], [], []>} : vector<32x128xbf16>, vector<128x128xbf16>, vector<32x128xf32> -> vector<32x128xf32>
    %255 = arith.addf %243, %254 : vector<32x128xf32>
    %c0_186 = arith.constant 0 : index
    %c0_187 = arith.constant 0 : index
    %256 = vector.load %arg9[%c0_186, %c0_187] : memref<1x128xf32, #tpu.memory_space<vmem>>, vector<1x128xf32>
    %257 = vector.broadcast %256 : vector<1x128xf32> to vector<32x128xf32>
    %258 = arith.addf %255, %257 : vector<32x128xf32>
    %259 = vector.shape_cast %258 : vector<32x128xf32> to vector<2x16x128xf32>
    %c0_188 = arith.constant 0 : index
    %c0_189 = arith.constant 0 : index
    %c0_190 = arith.constant 0 : index
    %260 = vector.load %arg11[%c0_188, %c0_189, %c0_190] : memref<2x16x128xf32, #tpu.memory_space<vmem>>, vector<2x16x128xf32>
    tpu.vector_store %arg11[%c0_188, %c0_189, %c0_190], %259 {strides = array<i32>} : memref<2x16x128xf32, #tpu.memory_space<vmem>>, vector<2x16x128xf32>,
    return
  }
  func.func @transform_0(%arg0: i32) -> (i32, i32, i32) {
    %c0_i32 = arith.constant 0 : i32
    %c0_i32_0 = arith.constant 0 : i32
    %c0_i32_1 = arith.constant 0 : i32
    return %arg0, %c0_i32, %c0_i32_0 : i32, i32, i32
  }
  func.func @transform_1(%arg0: i32) -> (i32, i32, i32, i32) {
    %c0_i32 = arith.constant 0 : i32
    %c0_i32_0 = arith.constant 0 : i32
    %c0_i32_1 = arith.constant 0 : i32
    %c0_i32_2 = arith.constant 0 : i32
    %c0_i32_3 = arith.constant 0 : i32
    return %c0_i32, %c0_i32_0, %c0_i32_1, %c0_i32_2 : i32, i32, i32, i32
  }
  func.func @transform_2(%arg0: i32) -> (i32, i32, i32) {
    %c0_i32 = arith.constant 0 : i32
    %c0_i32_0 = arith.constant 0 : i32
    %c0_i32_1 = arith.constant 0 : i32
    %c0_i32_2 = arith.constant 0 : i32
    return %c0_i32, %c0_i32_0, %c0_i32_1 : i32, i32, i32
  }
  func.func @transform_3(%arg0: i32) -> (i32, i32, i32) {
    %c0_i32 = arith.constant 0 : i32
    %c0_i32_0 = arith.constant 0 : i32
    %c0_i32_1 = arith.constant 0 : i32
    %c0_i32_2 = arith.constant 0 : i32
    return %c0_i32, %c0_i32_0, %c0_i32_1 : i32, i32, i32
  }
  func.func @transform_4(%arg0: i32) -> (i32, i32, i32) {
    %c0_i32 = arith.constant 0 : i32
    %c0_i32_0 = arith.constant 0 : i32
    %c0_i32_1 = arith.constant 0 : i32
    %c0_i32_2 = arith.constant 0 : i32
    return %c0_i32, %c0_i32_0, %c0_i32_1 : i32, i32, i32
  }
  func.func @transform_5(%arg0: i32) -> (i32, i32) {
    %c0_i32 = arith.constant 0 : i32
    %c0_i32_0 = arith.constant 0 : i32
    %c0_i32_1 = arith.constant 0 : i32
    return %c0_i32, %c0_i32_0 : i32, i32
  }
  func.func @transform_6(%arg0: i32) -> (i32, i32) {
    %c0_i32 = arith.constant 0 : i32
    %c0_i32_0 = arith.constant 0 : i32
    %c0_i32_1 = arith.constant 0 : i32
    return %c0_i32, %c0_i32_0 : i32, i32
  }
  func.func @transform_7(%arg0: i32) -> (i32, i32) {
    %c0_i32 = arith.constant 0 : i32
    %c0_i32_0 = arith.constant 0 : i32
    %c0_i32_1 = arith.constant 0 : i32
    return %c0_i32, %c0_i32_0 : i32, i32
  }
  func.func @transform_8(%arg0: i32) -> (i32, i32) {
    %c0_i32 = arith.constant 0 : i32
    %c0_i32_0 = arith.constant 0 : i32
    %c0_i32_1 = arith.constant 0 : i32
    return %c0_i32, %c0_i32_0 : i32, i32
  }
  func.func @transform_9(%arg0: i32) -> (i32, i32, i32) {
    %c0_i32 = arith.constant 0 : i32
    %c0_i32_0 = arith.constant 0 : i32
    %c0_i32_1 = arith.constant 0 : i32
    return %arg0, %c0_i32, %c0_i32_0 : i32, i32, i32
  }
  func.func @transform_10(%arg0: i32) -> (i32, i32, i32) {
    %c0_i32 = arith.constant 0 : i32
    %c0_i32_0 = arith.constant 0 : i32
    %c0_i32_1 = arith.constant 0 : i32
    return %arg0, %c0_i32, %c0_i32_0 : i32, i32, i32
  }
}

module attributes {stable_mosaic.version = 11 : i64} {
  func.func @fused_cws_kernel(%arg0: i32, %arg1: memref<2x16x128xbf16, #tpu.memory_space<vmem>>, %arg2: memref<6x3x128x128xbf16, #tpu.memory_space<vmem>>, %arg3: memref<6x1x128xf32, #tpu.memory_space<vmem>>, %arg4: memref<6x128x128xbf16, #tpu.memory_space<vmem>>, %arg5: memref<6x1x128xf32, #tpu.memory_space<vmem>>, %arg6: memref<128x128xbf16, #tpu.memory_space<vmem>>, %arg7: memref<1x128xf32, #tpu.memory_space<vmem>>, %arg8: memref<128x128xbf16, #tpu.memory_space<vmem>>, %arg9: memref<1x128xf32, #tpu.memory_space<vmem>>, %arg10: memref<2x16x128xf32, #tpu.memory_space<vmem>>, %arg11: memref<2x16x128xf32, #tpu.memory_space<vmem>>) attributes {dimension_semantics = [#tpu.dimension_semantics<parallel>], iteration_bounds = array<i64: 1>, scalar_prefetch = 0 : i64, scratch_operands = 0 : i64, tpu.core_type = #tpu.core_type<tc>, window_params = [{transform_indices = @transform_0, window_bounds = array<i64: 2, 16, 128>}, {pipeline_mode = #tpu.pipeline_mode<synchronous>, transform_indices = @transform_1, window_bounds = array<i64: 6, 3, 128, 128>}, {pipeline_mode = #tpu.pipeline_mode<synchronous>, transform_indices = @transform_2, window_bounds = array<i64: 6, 1, 128>}, {pipeline_mode = #tpu.pipeline_mode<synchronous>, transform_indices = @transform_3, window_bounds = array<i64: 6, 128, 128>}, {pipeline_mode = #tpu.pipeline_mode<synchronous>, transform_indices = @transform_4, window_bounds = array<i64: 6, 1, 128>}, {pipeline_mode = #tpu.pipeline_mode<synchronous>, transform_indices = @transform_5, window_bounds = array<i64: 128, 128>}, {pipeline_mode = #tpu.pipeline_mode<synchronous>, transform_indices = @transform_6, window_bounds = array<i64: 1, 128>}, {pipeline_mode = #tpu.pipeline_mode<synchronous>, transform_indices = @transform_7, window_bounds = array<i64: 128, 128>}, {pipeline_mode = #tpu.pipeline_mode<synchronous>, transform_indices = @transform_8, window_bounds = array<i64: 1, 128>}, {transform_indices = @transform_9, window_bounds = array<i64: 2, 16, 128>}, {transform_indices = @transform_10, window_bounds = array<i64: 2, 16, 128>}]} {
    %c0 = arith.constant 0 : index
    %c0_0 = arith.constant 0 : index
    %c0_1 = arith.constant 0 : index
    %0 = vector.load %arg1[%c0, %c0_0, %c0_1] : memref<2x16x128xbf16, #tpu.memory_space<vmem>>, vector<2x16x128xbf16>
    %1 = vector.shape_cast %0 : vector<2x16x128xbf16> to vector<32x128xbf16>
    %2 = arith.extf %1 : vector<32x128xbf16> to vector<32x128xf32>
    %3 = tpu.iota {dimensions = array<i32: 1>} : vector<2x16x1xi32>
    %4 = vector.shape_cast %3 : vector<2x16x1xi32> to vector<32x1xi32>
    %c0_i32 = arith.constant 0 : i32
    %5 = vector.broadcast %c0_i32 : i32 to vector<32x1xi32>
    %6 = arith.cmpi eq, %4, %5 : vector<32x1xi32>
    %c15_i32 = arith.constant 15 : i32
    %7 = vector.broadcast %c15_i32 : i32 to vector<32x1xi32>
    %8 = arith.cmpi eq, %4, %7 : vector<32x1xi32>
    %cst = arith.constant 0.000000e+00 : f32
    %9 = vector.broadcast %cst : f32 to vector<32x128xf32>
    %c1_i32 = arith.constant 1 : i32
    %10 = tpu.dynamic_rotate %2 by %c1_i32 dim 0 : vector<32x128xf32>, i32 -> vector<32x128xf32>
    %cst_2 = arith.constant 0.000000e+00 : f32
    %11 = vector.shape_cast %6 : vector<32x1xi1> to vector<32x1xi1>
    %12 = vector.broadcast %11 : vector<32x1xi1> to vector<32x128xi1>
    %13 = vector.broadcast %cst_2 : f32 to vector<32x128xf32>
    %14 = arith.select %12, %13, %10 : vector<32x128xi1>, vector<32x128xf32>
    %c31_i32 = arith.constant 31 : i32
    %15 = tpu.dynamic_rotate %2 by %c31_i32 dim 0 : vector<32x128xf32>, i32 -> vector<32x128xf32>
    %cst_3 = arith.constant 0.000000e+00 : f32
    %16 = vector.shape_cast %8 : vector<32x1xi1> to vector<32x1xi1>
    %17 = vector.broadcast %16 : vector<32x1xi1> to vector<32x128xi1>
    %18 = vector.broadcast %cst_3 : f32 to vector<32x128xf32>
    %19 = arith.select %17, %18, %15 : vector<32x128xi1>, vector<32x128xf32>
    %20 = arith.truncf %14 : vector<32x128xf32> to vector<32x128xbf16>
    %c0_4 = arith.constant 0 : index
    %c0_5 = arith.constant 0 : index
    %c0_6 = arith.constant 0 : index
    %c0_7 = arith.constant 0 : index
    %21 = vector.load %arg2[%c0_4, %c0_5, %c0_6, %c0_7] : memref<6x3x128x128xbf16, #tpu.memory_space<vmem>>, vector<1x1x128x128xbf16>
    %22 = vector.shape_cast %21 : vector<1x1x128x128xbf16> to vector<128x128xbf16>
    %cst_8 = arith.constant dense<0.000000e+00> : vector<32x128xf32>
    %23 = tpu.matmul %20, %22, %cst_8 {dimension_numbers = #tpu.dot_dimension_numbers<[1], [0], [0], [1], [0, 0, 1, 1], [], []>} : vector<32x128xbf16>, vector<128x128xbf16>, vector<32x128xf32> -> vector<32x128xf32>
    %24 = arith.truncf %2 : vector<32x128xf32> to vector<32x128xbf16>
    %c0_9 = arith.constant 0 : index
    %c1 = arith.constant 1 : index
    %c0_10 = arith.constant 0 : index
    %c0_11 = arith.constant 0 : index
    %25 = vector.load %arg2[%c0_9, %c1, %c0_10, %c0_11] : memref<6x3x128x128xbf16, #tpu.memory_space<vmem>>, vector<1x1x128x128xbf16>
    %26 = vector.shape_cast %25 : vector<1x1x128x128xbf16> to vector<128x128xbf16>
    %cst_12 = arith.constant dense<0.000000e+00> : vector<32x128xf32>
    %27 = tpu.matmul %24, %26, %cst_12 {dimension_numbers = #tpu.dot_dimension_numbers<[1], [0], [0], [1], [0, 0, 1, 1], [], []>} : vector<32x128xbf16>, vector<128x128xbf16>, vector<32x128xf32> -> vector<32x128xf32>
    %28 = arith.addf %23, %27 : vector<32x128xf32>
    %29 = arith.truncf %19 : vector<32x128xf32> to vector<32x128xbf16>
    %c0_13 = arith.constant 0 : index
    %c2 = arith.constant 2 : index
    %c0_14 = arith.constant 0 : index
    %c0_15 = arith.constant 0 : index
    %30 = vector.load %arg2[%c0_13, %c2, %c0_14, %c0_15] : memref<6x3x128x128xbf16, #tpu.memory_space<vmem>>, vector<1x1x128x128xbf16>
    %31 = vector.shape_cast %30 : vector<1x1x128x128xbf16> to vector<128x128xbf16>
    %cst_16 = arith.constant dense<0.000000e+00> : vector<32x128xf32>
    %32 = tpu.matmul %29, %31, %cst_16 {dimension_numbers = #tpu.dot_dimension_numbers<[1], [0], [0], [1], [0, 0, 1, 1], [], []>} : vector<32x128xbf16>, vector<128x128xbf16>, vector<32x128xf32> -> vector<32x128xf32>
    %33 = arith.addf %28, %32 : vector<32x128xf32>
    %c0_17 = arith.constant 0 : index
    %c0_18 = arith.constant 0 : index
    %c0_19 = arith.constant 0 : index
    %34 = vector.load %arg3[%c0_17, %c0_18, %c0_19] : memref<6x1x128xf32, #tpu.memory_space<vmem>>, vector<1x1x128xf32>
    %35 = vector.shape_cast %34 : vector<1x1x128xf32> to vector<1x128xf32>
    %36 = vector.broadcast %35 : vector<1x128xf32> to vector<32x128xf32>
    %37 = arith.addf %33, %36 : vector<32x128xf32>
    %cst_20 = arith.constant 0.000000e+00 : f32
    %38 = vector.broadcast %cst_20 : f32 to vector<32x128xf32>
    %39 = arith.maximumf %37, %38 : vector<32x128xf32>
    %40 = arith.truncf %39 : vector<32x128xf32> to vector<32x128xbf16>
    %c0_21 = arith.constant 0 : index
    %c0_22 = arith.constant 0 : index
    %c0_23 = arith.constant 0 : index
    %41 = vector.load %arg4[%c0_21, %c0_22, %c0_23] : memref<6x128x128xbf16, #tpu.memory_space<vmem>>, vector<1x128x128xbf16>
    %42 = vector.shape_cast %41 : vector<1x128x128xbf16> to vector<128x128xbf16>
    %cst_24 = arith.constant dense<0.000000e+00> : vector<32x128xf32>
    %43 = tpu.matmul %40, %42, %cst_24 {dimension_numbers = #tpu.dot_dimension_numbers<[1], [0], [0], [1], [0, 0, 1, 1], [], []>} : vector<32x128xbf16>, vector<128x128xbf16>, vector<32x128xf32> -> vector<32x128xf32>
    %44 = arith.addf %9, %43 : vector<32x128xf32>
    %c0_25 = arith.constant 0 : index
    %c0_26 = arith.constant 0 : index
    %c0_27 = arith.constant 0 : index
    %45 = vector.load %arg5[%c0_25, %c0_26, %c0_27] : memref<6x1x128xf32, #tpu.memory_space<vmem>>, vector<1x1x128xf32>
    %46 = vector.shape_cast %45 : vector<1x1x128xf32> to vector<1x128xf32>
    %47 = vector.broadcast %46 : vector<1x128xf32> to vector<32x128xf32>
    %48 = arith.addf %44, %47 : vector<32x128xf32>
    %c1_i32_28 = arith.constant 1 : i32
    %49 = tpu.dynamic_rotate %39 by %c1_i32_28 dim 0 : vector<32x128xf32>, i32 -> vector<32x128xf32>
    %cst_29 = arith.constant 0.000000e+00 : f32
    %50 = vector.shape_cast %6 : vector<32x1xi1> to vector<32x1xi1>
    %51 = vector.broadcast %50 : vector<32x1xi1> to vector<32x128xi1>
    %52 = vector.broadcast %cst_29 : f32 to vector<32x128xf32>
    %53 = arith.select %51, %52, %49 : vector<32x128xi1>, vector<32x128xf32>
    %c31_i32_30 = arith.constant 31 : i32
    %54 = tpu.dynamic_rotate %39 by %c31_i32_30 dim 0 : vector<32x128xf32>, i32 -> vector<32x128xf32>
    %cst_31 = arith.constant 0.000000e+00 : f32
    %55 = vector.shape_cast %8 : vector<32x1xi1> to vector<32x1xi1>
    %56 = vector.broadcast %55 : vector<32x1xi1> to vector<32x128xi1>
    %57 = vector.broadcast %cst_31 : f32 to vector<32x128xf32>
    %58 = arith.select %56, %57, %54 : vector<32x128xi1>, vector<32x128xf32>
    %59 = arith.truncf %53 : vector<32x128xf32> to vector<32x128xbf16>
    %c1_32 = arith.constant 1 : index
    %c0_33 = arith.constant 0 : index
    %c0_34 = arith.constant 0 : index
    %c0_35 = arith.constant 0 : index
    %60 = vector.load %arg2[%c1_32, %c0_33, %c0_34, %c0_35] : memref<6x3x128x128xbf16, #tpu.memory_space<vmem>>, vector<1x1x128x128xbf16>
    %61 = vector.shape_cast %60 : vector<1x1x128x128xbf16> to vector<128x128xbf16>
    %cst_36 = arith.constant dense<0.000000e+00> : vector<32x128xf32>
    %62 = tpu.matmul %59, %61, %cst_36 {dimension_numbers = #tpu.dot_dimension_numbers<[1], [0], [0], [1], [0, 0, 1, 1], [], []>} : vector<32x128xbf16>, vector<128x128xbf16>, vector<32x128xf32> -> vector<32x128xf32>
    %63 = arith.truncf %39 : vector<32x128xf32> to vector<32x128xbf16>
    %c1_37 = arith.constant 1 : index
    %c1_38 = arith.constant 1 : index
    %c0_39 = arith.constant 0 : index
    %c0_40 = arith.constant 0 : index
    %64 = vector.load %arg2[%c1_37, %c1_38, %c0_39, %c0_40] : memref<6x3x128x128xbf16, #tpu.memory_space<vmem>>, vector<1x1x128x128xbf16>
    %65 = vector.shape_cast %64 : vector<1x1x128x128xbf16> to vector<128x128xbf16>
    %cst_41 = arith.constant dense<0.000000e+00> : vector<32x128xf32>
    %66 = tpu.matmul %63, %65, %cst_41 {dimension_numbers = #tpu.dot_dimension_numbers<[1], [0], [0], [1], [0, 0, 1, 1], [], []>} : vector<32x128xbf16>, vector<128x128xbf16>, vector<32x128xf32> -> vector<32x128xf32>
    %67 = arith.addf %62, %66 : vector<32x128xf32>
    %68 = arith.truncf %58 : vector<32x128xf32> to vector<32x128xbf16>
    %c1_42 = arith.constant 1 : index
    %c2_43 = arith.constant 2 : index
    %c0_44 = arith.constant 0 : index
    %c0_45 = arith.constant 0 : index
    %69 = vector.load %arg2[%c1_42, %c2_43, %c0_44, %c0_45] : memref<6x3x128x128xbf16, #tpu.memory_space<vmem>>, vector<1x1x128x128xbf16>
    %70 = vector.shape_cast %69 : vector<1x1x128x128xbf16> to vector<128x128xbf16>
    %cst_46 = arith.constant dense<0.000000e+00> : vector<32x128xf32>
    %71 = tpu.matmul %68, %70, %cst_46 {dimension_numbers = #tpu.dot_dimension_numbers<[1], [0], [0], [1], [0, 0, 1, 1], [], []>} : vector<32x128xbf16>, vector<128x128xbf16>, vector<32x128xf32> -> vector<32x128xf32>
    %72 = arith.addf %67, %71 : vector<32x128xf32>
    %c1_47 = arith.constant 1 : index
    %c0_48 = arith.constant 0 : index
    %c0_49 = arith.constant 0 : index
    %73 = vector.load %arg3[%c1_47, %c0_48, %c0_49] : memref<6x1x128xf32, #tpu.memory_space<vmem>>, vector<1x1x128xf32>
    %74 = vector.shape_cast %73 : vector<1x1x128xf32> to vector<1x128xf32>
    %75 = vector.broadcast %74 : vector<1x128xf32> to vector<32x128xf32>
    %76 = arith.addf %72, %75 : vector<32x128xf32>
    %cst_50 = arith.constant 0.000000e+00 : f32
    %77 = vector.broadcast %cst_50 : f32 to vector<32x128xf32>
    %78 = arith.maximumf %76, %77 : vector<32x128xf32>
    %79 = arith.truncf %78 : vector<32x128xf32> to vector<32x128xbf16>
    %c1_51 = arith.constant 1 : index
    %c0_52 = arith.constant 0 : index
    %c0_53 = arith.constant 0 : index
    %80 = vector.load %arg4[%c1_51, %c0_52, %c0_53] : memref<6x128x128xbf16, #tpu.memory_space<vmem>>, vector<1x128x128xbf16>
    %81 = vector.shape_cast %80 : vector<1x128x128xbf16> to vector<128x128xbf16>
    %cst_54 = arith.constant dense<0.000000e+00> : vector<32x128xf32>
    %82 = tpu.matmul %79, %81, %cst_54 {dimension_numbers = #tpu.dot_dimension_numbers<[1], [0], [0], [1], [0, 0, 1, 1], [], []>} : vector<32x128xbf16>, vector<128x128xbf16>, vector<32x128xf32> -> vector<32x128xf32>
    %83 = arith.addf %48, %82 : vector<32x128xf32>
    %c1_55 = arith.constant 1 : index
    %c0_56 = arith.constant 0 : index
    %c0_57 = arith.constant 0 : index
    %84 = vector.load %arg5[%c1_55, %c0_56, %c0_57] : memref<6x1x128xf32, #tpu.memory_space<vmem>>, vector<1x1x128xf32>
    %85 = vector.shape_cast %84 : vector<1x1x128xf32> to vector<1x128xf32>
    %86 = vector.broadcast %85 : vector<1x128xf32> to vector<32x128xf32>
    %87 = arith.addf %83, %86 : vector<32x128xf32>
    %c1_i32_58 = arith.constant 1 : i32
    %88 = tpu.dynamic_rotate %78 by %c1_i32_58 dim 0 : vector<32x128xf32>, i32 -> vector<32x128xf32>
    %cst_59 = arith.constant 0.000000e+00 : f32
    %89 = vector.shape_cast %6 : vector<32x1xi1> to vector<32x1xi1>
    %90 = vector.broadcast %89 : vector<32x1xi1> to vector<32x128xi1>
    %91 = vector.broadcast %cst_59 : f32 to vector<32x128xf32>
    %92 = arith.select %90, %91, %88 : vector<32x128xi1>, vector<32x128xf32>
    %c31_i32_60 = arith.constant 31 : i32
    %93 = tpu.dynamic_rotate %78 by %c31_i32_60 dim 0 : vector<32x128xf32>, i32 -> vector<32x128xf32>
    %cst_61 = arith.constant 0.000000e+00 : f32
    %94 = vector.shape_cast %8 : vector<32x1xi1> to vector<32x1xi1>
    %95 = vector.broadcast %94 : vector<32x1xi1> to vector<32x128xi1>
    %96 = vector.broadcast %cst_61 : f32 to vector<32x128xf32>
    %97 = arith.select %95, %96, %93 : vector<32x128xi1>, vector<32x128xf32>
    %98 = arith.truncf %92 : vector<32x128xf32> to vector<32x128xbf16>
    %c2_62 = arith.constant 2 : index
    %c0_63 = arith.constant 0 : index
    %c0_64 = arith.constant 0 : index
    %c0_65 = arith.constant 0 : index
    %99 = vector.load %arg2[%c2_62, %c0_63, %c0_64, %c0_65] : memref<6x3x128x128xbf16, #tpu.memory_space<vmem>>, vector<1x1x128x128xbf16>
    %100 = vector.shape_cast %99 : vector<1x1x128x128xbf16> to vector<128x128xbf16>
    %cst_66 = arith.constant dense<0.000000e+00> : vector<32x128xf32>
    %101 = tpu.matmul %98, %100, %cst_66 {dimension_numbers = #tpu.dot_dimension_numbers<[1], [0], [0], [1], [0, 0, 1, 1], [], []>} : vector<32x128xbf16>, vector<128x128xbf16>, vector<32x128xf32> -> vector<32x128xf32>
    %102 = arith.truncf %78 : vector<32x128xf32> to vector<32x128xbf16>
    %c2_67 = arith.constant 2 : index
    %c1_68 = arith.constant 1 : index
    %c0_69 = arith.constant 0 : index
    %c0_70 = arith.constant 0 : index
    %103 = vector.load %arg2[%c2_67, %c1_68, %c0_69, %c0_70] : memref<6x3x128x128xbf16, #tpu.memory_space<vmem>>, vector<1x1x128x128xbf16>
    %104 = vector.shape_cast %103 : vector<1x1x128x128xbf16> to vector<128x128xbf16>
    %cst_71 = arith.constant dense<0.000000e+00> : vector<32x128xf32>
    %105 = tpu.matmul %102, %104, %cst_71 {dimension_numbers = #tpu.dot_dimension_numbers<[1], [0], [0], [1], [0, 0, 1, 1], [], []>} : vector<32x128xbf16>, vector<128x128xbf16>, vector<32x128xf32> -> vector<32x128xf32>
    %106 = arith.addf %101, %105 : vector<32x128xf32>
    %107 = arith.truncf %97 : vector<32x128xf32> to vector<32x128xbf16>
    %c2_72 = arith.constant 2 : index
    %c2_73 = arith.constant 2 : index
    %c0_74 = arith.constant 0 : index
    %c0_75 = arith.constant 0 : index
    %108 = vector.load %arg2[%c2_72, %c2_73, %c0_74, %c0_75] : memref<6x3x128x128xbf16, #tpu.memory_space<vmem>>, vector<1x1x128x128xbf16>
    %109 = vector.shape_cast %108 : vector<1x1x128x128xbf16> to vector<128x128xbf16>
    %cst_76 = arith.constant dense<0.000000e+00> : vector<32x128xf32>
    %110 = tpu.matmul %107, %109, %cst_76 {dimension_numbers = #tpu.dot_dimension_numbers<[1], [0], [0], [1], [0, 0, 1, 1], [], []>} : vector<32x128xbf16>, vector<128x128xbf16>, vector<32x128xf32> -> vector<32x128xf32>
    %111 = arith.addf %106, %110 : vector<32x128xf32>
    %c2_77 = arith.constant 2 : index
    %c0_78 = arith.constant 0 : index
    %c0_79 = arith.constant 0 : index
    %112 = vector.load %arg3[%c2_77, %c0_78, %c0_79] : memref<6x1x128xf32, #tpu.memory_space<vmem>>, vector<1x1x128xf32>
    %113 = vector.shape_cast %112 : vector<1x1x128xf32> to vector<1x128xf32>
    %114 = vector.broadcast %113 : vector<1x128xf32> to vector<32x128xf32>
    %115 = arith.addf %111, %114 : vector<32x128xf32>
    %cst_80 = arith.constant 0.000000e+00 : f32
    %116 = vector.broadcast %cst_80 : f32 to vector<32x128xf32>
    %117 = arith.maximumf %115, %116 : vector<32x128xf32>
    %118 = arith.truncf %117 : vector<32x128xf32> to vector<32x128xbf16>
    %c2_81 = arith.constant 2 : index
    %c0_82 = arith.constant 0 : index
    %c0_83 = arith.constant 0 : index
    %119 = vector.load %arg4[%c2_81, %c0_82, %c0_83] : memref<6x128x128xbf16, #tpu.memory_space<vmem>>, vector<1x128x128xbf16>
    %120 = vector.shape_cast %119 : vector<1x128x128xbf16> to vector<128x128xbf16>
    %cst_84 = arith.constant dense<0.000000e+00> : vector<32x128xf32>
    %121 = tpu.matmul %118, %120, %cst_84 {dimension_numbers = #tpu.dot_dimension_numbers<[1], [0], [0], [1], [0, 0, 1, 1], [], []>} : vector<32x128xbf16>, vector<128x128xbf16>, vector<32x128xf32> -> vector<32x128xf32>
    %122 = arith.addf %87, %121 : vector<32x128xf32>
    %c2_85 = arith.constant 2 : index
    %c0_86 = arith.constant 0 : index
    %c0_87 = arith.constant 0 : index
    %123 = vector.load %arg5[%c2_85, %c0_86, %c0_87] : memref<6x1x128xf32, #tpu.memory_space<vmem>>, vector<1x1x128xf32>
    %124 = vector.shape_cast %123 : vector<1x1x128xf32> to vector<1x128xf32>
    %125 = vector.broadcast %124 : vector<1x128xf32> to vector<32x128xf32>
    %126 = arith.addf %122, %125 : vector<32x128xf32>
    %c1_i32_88 = arith.constant 1 : i32
    %127 = tpu.dynamic_rotate %117 by %c1_i32_88 dim 0 : vector<32x128xf32>, i32 -> vector<32x128xf32>
    %cst_89 = arith.constant 0.000000e+00 : f32
    %128 = vector.shape_cast %6 : vector<32x1xi1> to vector<32x1xi1>
    %129 = vector.broadcast %128 : vector<32x1xi1> to vector<32x128xi1>
    %130 = vector.broadcast %cst_89 : f32 to vector<32x128xf32>
    %131 = arith.select %129, %130, %127 : vector<32x128xi1>, vector<32x128xf32>
    %c31_i32_90 = arith.constant 31 : i32
    %132 = tpu.dynamic_rotate %117 by %c31_i32_90 dim 0 : vector<32x128xf32>, i32 -> vector<32x128xf32>
    %cst_91 = arith.constant 0.000000e+00 : f32
    %133 = vector.shape_cast %8 : vector<32x1xi1> to vector<32x1xi1>
    %134 = vector.broadcast %133 : vector<32x1xi1> to vector<32x128xi1>
    %135 = vector.broadcast %cst_91 : f32 to vector<32x128xf32>
    %136 = arith.select %134, %135, %132 : vector<32x128xi1>, vector<32x128xf32>
    %137 = arith.truncf %131 : vector<32x128xf32> to vector<32x128xbf16>
    %c3 = arith.constant 3 : index
    %c0_92 = arith.constant 0 : index
    %c0_93 = arith.constant 0 : index
    %c0_94 = arith.constant 0 : index
    %138 = vector.load %arg2[%c3, %c0_92, %c0_93, %c0_94] : memref<6x3x128x128xbf16, #tpu.memory_space<vmem>>, vector<1x1x128x128xbf16>
    %139 = vector.shape_cast %138 : vector<1x1x128x128xbf16> to vector<128x128xbf16>
    %cst_95 = arith.constant dense<0.000000e+00> : vector<32x128xf32>
    %140 = tpu.matmul %137, %139, %cst_95 {dimension_numbers = #tpu.dot_dimension_numbers<[1], [0], [0], [1], [0, 0, 1, 1], [], []>} : vector<32x128xbf16>, vector<128x128xbf16>, vector<32x128xf32> -> vector<32x128xf32>
    %141 = arith.truncf %117 : vector<32x128xf32> to vector<32x128xbf16>
    %c3_96 = arith.constant 3 : index
    %c1_97 = arith.constant 1 : index
    %c0_98 = arith.constant 0 : index
    %c0_99 = arith.constant 0 : index
    %142 = vector.load %arg2[%c3_96, %c1_97, %c0_98, %c0_99] : memref<6x3x128x128xbf16, #tpu.memory_space<vmem>>, vector<1x1x128x128xbf16>
    %143 = vector.shape_cast %142 : vector<1x1x128x128xbf16> to vector<128x128xbf16>
    %cst_100 = arith.constant dense<0.000000e+00> : vector<32x128xf32>
    %144 = tpu.matmul %141, %143, %cst_100 {dimension_numbers = #tpu.dot_dimension_numbers<[1], [0], [0], [1], [0, 0, 1, 1], [], []>} : vector<32x128xbf16>, vector<128x128xbf16>, vector<32x128xf32> -> vector<32x128xf32>
    %145 = arith.addf %140, %144 : vector<32x128xf32>
    %146 = arith.truncf %136 : vector<32x128xf32> to vector<32x128xbf16>
    %c3_101 = arith.constant 3 : index
    %c2_102 = arith.constant 2 : index
    %c0_103 = arith.constant 0 : index
    %c0_104 = arith.constant 0 : index
    %147 = vector.load %arg2[%c3_101, %c2_102, %c0_103, %c0_104] : memref<6x3x128x128xbf16, #tpu.memory_space<vmem>>, vector<1x1x128x128xbf16>
    %148 = vector.shape_cast %147 : vector<1x1x128x128xbf16> to vector<128x128xbf16>
    %cst_105 = arith.constant dense<0.000000e+00> : vector<32x128xf32>
    %149 = tpu.matmul %146, %148, %cst_105 {dimension_numbers = #tpu.dot_dimension_numbers<[1], [0], [0], [1], [0, 0, 1, 1], [], []>} : vector<32x128xbf16>, vector<128x128xbf16>, vector<32x128xf32> -> vector<32x128xf32>
    %150 = arith.addf %145, %149 : vector<32x128xf32>
    %c3_106 = arith.constant 3 : index
    %c0_107 = arith.constant 0 : index
    %c0_108 = arith.constant 0 : index
    %151 = vector.load %arg3[%c3_106, %c0_107, %c0_108] : memref<6x1x128xf32, #tpu.memory_space<vmem>>, vector<1x1x128xf32>
    %152 = vector.shape_cast %151 : vector<1x1x128xf32> to vector<1x128xf32>
    %153 = vector.broadcast %152 : vector<1x128xf32> to vector<32x128xf32>
    %154 = arith.addf %150, %153 : vector<32x128xf32>
    %cst_109 = arith.constant 0.000000e+00 : f32
    %155 = vector.broadcast %cst_109 : f32 to vector<32x128xf32>
    %156 = arith.maximumf %154, %155 : vector<32x128xf32>
    %157 = arith.truncf %156 : vector<32x128xf32> to vector<32x128xbf16>
    %c3_110 = arith.constant 3 : index
    %c0_111 = arith.constant 0 : index
    %c0_112 = arith.constant 0 : index
    %158 = vector.load %arg4[%c3_110, %c0_111, %c0_112] : memref<6x128x128xbf16, #tpu.memory_space<vmem>>, vector<1x128x128xbf16>
    %159 = vector.shape_cast %158 : vector<1x128x128xbf16> to vector<128x128xbf16>
    %cst_113 = arith.constant dense<0.000000e+00> : vector<32x128xf32>
    %160 = tpu.matmul %157, %159, %cst_113 {dimension_numbers = #tpu.dot_dimension_numbers<[1], [0], [0], [1], [0, 0, 1, 1], [], []>} : vector<32x128xbf16>, vector<128x128xbf16>, vector<32x128xf32> -> vector<32x128xf32>
    %161 = arith.addf %126, %160 : vector<32x128xf32>
    %c3_114 = arith.constant 3 : index
    %c0_115 = arith.constant 0 : index
    %c0_116 = arith.constant 0 : index
    %162 = vector.load %arg5[%c3_114, %c0_115, %c0_116] : memref<6x1x128xf32, #tpu.memory_space<vmem>>, vector<1x1x128xf32>
    %163 = vector.shape_cast %162 : vector<1x1x128xf32> to vector<1x128xf32>
    %164 = vector.broadcast %163 : vector<1x128xf32> to vector<32x128xf32>
    %165 = arith.addf %161, %164 : vector<32x128xf32>
    %c1_i32_117 = arith.constant 1 : i32
    %166 = tpu.dynamic_rotate %156 by %c1_i32_117 dim 0 : vector<32x128xf32>, i32 -> vector<32x128xf32>
    %cst_118 = arith.constant 0.000000e+00 : f32
    %167 = vector.shape_cast %6 : vector<32x1xi1> to vector<32x1xi1>
    %168 = vector.broadcast %167 : vector<32x1xi1> to vector<32x128xi1>
    %169 = vector.broadcast %cst_118 : f32 to vector<32x128xf32>
    %170 = arith.select %168, %169, %166 : vector<32x128xi1>, vector<32x128xf32>
    %c31_i32_119 = arith.constant 31 : i32
    %171 = tpu.dynamic_rotate %156 by %c31_i32_119 dim 0 : vector<32x128xf32>, i32 -> vector<32x128xf32>
    %cst_120 = arith.constant 0.000000e+00 : f32
    %172 = vector.shape_cast %8 : vector<32x1xi1> to vector<32x1xi1>
    %173 = vector.broadcast %172 : vector<32x1xi1> to vector<32x128xi1>
    %174 = vector.broadcast %cst_120 : f32 to vector<32x128xf32>
    %175 = arith.select %173, %174, %171 : vector<32x128xi1>, vector<32x128xf32>
    %176 = arith.truncf %170 : vector<32x128xf32> to vector<32x128xbf16>
    %c4 = arith.constant 4 : index
    %c0_121 = arith.constant 0 : index
    %c0_122 = arith.constant 0 : index
    %c0_123 = arith.constant 0 : index
    %177 = vector.load %arg2[%c4, %c0_121, %c0_122, %c0_123] : memref<6x3x128x128xbf16, #tpu.memory_space<vmem>>, vector<1x1x128x128xbf16>
    %178 = vector.shape_cast %177 : vector<1x1x128x128xbf16> to vector<128x128xbf16>
    %cst_124 = arith.constant dense<0.000000e+00> : vector<32x128xf32>
    %179 = tpu.matmul %176, %178, %cst_124 {dimension_numbers = #tpu.dot_dimension_numbers<[1], [0], [0], [1], [0, 0, 1, 1], [], []>} : vector<32x128xbf16>, vector<128x128xbf16>, vector<32x128xf32> -> vector<32x128xf32>
    %180 = arith.truncf %156 : vector<32x128xf32> to vector<32x128xbf16>
    %c4_125 = arith.constant 4 : index
    %c1_126 = arith.constant 1 : index
    %c0_127 = arith.constant 0 : index
    %c0_128 = arith.constant 0 : index
    %181 = vector.load %arg2[%c4_125, %c1_126, %c0_127, %c0_128] : memref<6x3x128x128xbf16, #tpu.memory_space<vmem>>, vector<1x1x128x128xbf16>
    %182 = vector.shape_cast %181 : vector<1x1x128x128xbf16> to vector<128x128xbf16>
    %cst_129 = arith.constant dense<0.000000e+00> : vector<32x128xf32>
    %183 = tpu.matmul %180, %182, %cst_129 {dimension_numbers = #tpu.dot_dimension_numbers<[1], [0], [0], [1], [0, 0, 1, 1], [], []>} : vector<32x128xbf16>, vector<128x128xbf16>, vector<32x128xf32> -> vector<32x128xf32>
    %184 = arith.addf %179, %183 : vector<32x128xf32>
    %185 = arith.truncf %175 : vector<32x128xf32> to vector<32x128xbf16>
    %c4_130 = arith.constant 4 : index
    %c2_131 = arith.constant 2 : index
    %c0_132 = arith.constant 0 : index
    %c0_133 = arith.constant 0 : index
    %186 = vector.load %arg2[%c4_130, %c2_131, %c0_132, %c0_133] : memref<6x3x128x128xbf16, #tpu.memory_space<vmem>>, vector<1x1x128x128xbf16>
    %187 = vector.shape_cast %186 : vector<1x1x128x128xbf16> to vector<128x128xbf16>
    %cst_134 = arith.constant dense<0.000000e+00> : vector<32x128xf32>
    %188 = tpu.matmul %185, %187, %cst_134 {dimension_numbers = #tpu.dot_dimension_numbers<[1], [0], [0], [1], [0, 0, 1, 1], [], []>} : vector<32x128xbf16>, vector<128x128xbf16>, vector<32x128xf32> -> vector<32x128xf32>
    %189 = arith.addf %184, %188 : vector<32x128xf32>
    %c4_135 = arith.constant 4 : index
    %c0_136 = arith.constant 0 : index
    %c0_137 = arith.constant 0 : index
    %190 = vector.load %arg3[%c4_135, %c0_136, %c0_137] : memref<6x1x128xf32, #tpu.memory_space<vmem>>, vector<1x1x128xf32>
    %191 = vector.shape_cast %190 : vector<1x1x128xf32> to vector<1x128xf32>
    %192 = vector.broadcast %191 : vector<1x128xf32> to vector<32x128xf32>
    %193 = arith.addf %189, %192 : vector<32x128xf32>
    %cst_138 = arith.constant 0.000000e+00 : f32
    %194 = vector.broadcast %cst_138 : f32 to vector<32x128xf32>
    %195 = arith.maximumf %193, %194 : vector<32x128xf32>
    %196 = arith.truncf %195 : vector<32x128xf32> to vector<32x128xbf16>
    %c4_139 = arith.constant 4 : index
    %c0_140 = arith.constant 0 : index
    %c0_141 = arith.constant 0 : index
    %197 = vector.load %arg4[%c4_139, %c0_140, %c0_141] : memref<6x128x128xbf16, #tpu.memory_space<vmem>>, vector<1x128x128xbf16>
    %198 = vector.shape_cast %197 : vector<1x128x128xbf16> to vector<128x128xbf16>
    %cst_142 = arith.constant dense<0.000000e+00> : vector<32x128xf32>
    %199 = tpu.matmul %196, %198, %cst_142 {dimension_numbers = #tpu.dot_dimension_numbers<[1], [0], [0], [1], [0, 0, 1, 1], [], []>} : vector<32x128xbf16>, vector<128x128xbf16>, vector<32x128xf32> -> vector<32x128xf32>
    %200 = arith.addf %165, %199 : vector<32x128xf32>
    %c4_143 = arith.constant 4 : index
    %c0_144 = arith.constant 0 : index
    %c0_145 = arith.constant 0 : index
    %201 = vector.load %arg5[%c4_143, %c0_144, %c0_145] : memref<6x1x128xf32, #tpu.memory_space<vmem>>, vector<1x1x128xf32>
    %202 = vector.shape_cast %201 : vector<1x1x128xf32> to vector<1x128xf32>
    %203 = vector.broadcast %202 : vector<1x128xf32> to vector<32x128xf32>
    %204 = arith.addf %200, %203 : vector<32x128xf32>
    %c1_i32_146 = arith.constant 1 : i32
    %205 = tpu.dynamic_rotate %195 by %c1_i32_146 dim 0 : vector<32x128xf32>, i32 -> vector<32x128xf32>
    %cst_147 = arith.constant 0.000000e+00 : f32
    %206 = vector.shape_cast %6 : vector<32x1xi1> to vector<32x1xi1>
    %207 = vector.broadcast %206 : vector<32x1xi1> to vector<32x128xi1>
    %208 = vector.broadcast %cst_147 : f32 to vector<32x128xf32>
    %209 = arith.select %207, %208, %205 : vector<32x128xi1>, vector<32x128xf32>
    %c31_i32_148 = arith.constant 31 : i32
    %210 = tpu.dynamic_rotate %195 by %c31_i32_148 dim 0 : vector<32x128xf32>, i32 -> vector<32x128xf32>
    %cst_149 = arith.constant 0.000000e+00 : f32
    %211 = vector.shape_cast %8 : vector<32x1xi1> to vector<32x1xi1>
    %212 = vector.broadcast %211 : vector<32x1xi1> to vector<32x128xi1>
    %213 = vector.broadcast %cst_149 : f32 to vector<32x128xf32>
    %214 = arith.select %212, %213, %210 : vector<32x128xi1>, vector<32x128xf32>
    %215 = arith.truncf %209 : vector<32x128xf32> to vector<32x128xbf16>
    %c5 = arith.constant 5 : index
    %c0_150 = arith.constant 0 : index
    %c0_151 = arith.constant 0 : index
    %c0_152 = arith.constant 0 : index
    %216 = vector.load %arg2[%c5, %c0_150, %c0_151, %c0_152] : memref<6x3x128x128xbf16, #tpu.memory_space<vmem>>, vector<1x1x128x128xbf16>
    %217 = vector.shape_cast %216 : vector<1x1x128x128xbf16> to vector<128x128xbf16>
    %cst_153 = arith.constant dense<0.000000e+00> : vector<32x128xf32>
    %218 = tpu.matmul %215, %217, %cst_153 {dimension_numbers = #tpu.dot_dimension_numbers<[1], [0], [0], [1], [0, 0, 1, 1], [], []>} : vector<32x128xbf16>, vector<128x128xbf16>, vector<32x128xf32> -> vector<32x128xf32>
    %219 = arith.truncf %195 : vector<32x128xf32> to vector<32x128xbf16>
    %c5_154 = arith.constant 5 : index
    %c1_155 = arith.constant 1 : index
    %c0_156 = arith.constant 0 : index
    %c0_157 = arith.constant 0 : index
    %220 = vector.load %arg2[%c5_154, %c1_155, %c0_156, %c0_157] : memref<6x3x128x128xbf16, #tpu.memory_space<vmem>>, vector<1x1x128x128xbf16>
    %221 = vector.shape_cast %220 : vector<1x1x128x128xbf16> to vector<128x128xbf16>
    %cst_158 = arith.constant dense<0.000000e+00> : vector<32x128xf32>
    %222 = tpu.matmul %219, %221, %cst_158 {dimension_numbers = #tpu.dot_dimension_numbers<[1], [0], [0], [1], [0, 0, 1, 1], [], []>} : vector<32x128xbf16>, vector<128x128xbf16>, vector<32x128xf32> -> vector<32x128xf32>
    %223 = arith.addf %218, %222 : vector<32x128xf32>
    %224 = arith.truncf %214 : vector<32x128xf32> to vector<32x128xbf16>
    %c5_159 = arith.constant 5 : index
    %c2_160 = arith.constant 2 : index
    %c0_161 = arith.constant 0 : index
    %c0_162 = arith.constant 0 : index
    %225 = vector.load %arg2[%c5_159, %c2_160, %c0_161, %c0_162] : memref<6x3x128x128xbf16, #tpu.memory_space<vmem>>, vector<1x1x128x128xbf16>
    %226 = vector.shape_cast %225 : vector<1x1x128x128xbf16> to vector<128x128xbf16>
    %cst_163 = arith.constant dense<0.000000e+00> : vector<32x128xf32>
    %227 = tpu.matmul %224, %226, %cst_163 {dimension_numbers = #tpu.dot_dimension_numbers<[1], [0], [0], [1], [0, 0, 1, 1], [], []>} : vector<32x128xbf16>, vector<128x128xbf16>, vector<32x128xf32> -> vector<32x128xf32>
    %228 = arith.addf %223, %227 : vector<32x128xf32>
    %c5_164 = arith.constant 5 : index
    %c0_165 = arith.constant 0 : index
    %c0_166 = arith.constant 0 : index
    %229 = vector.load %arg3[%c5_164, %c0_165, %c0_166] : memref<6x1x128xf32, #tpu.memory_space<vmem>>, vector<1x1x128xf32>
    %230 = vector.shape_cast %229 : vector<1x1x128xf32> to vector<1x128xf32>
    %231 = vector.broadcast %230 : vector<1x128xf32> to vector<32x128xf32>
    %232 = arith.addf %228, %231 : vector<32x128xf32>
    %cst_167 = arith.constant 0.000000e+00 : f32
    %233 = vector.broadcast %cst_167 : f32 to vector<32x128xf32>
    %234 = arith.maximumf %232, %233 : vector<32x128xf32>
    %235 = arith.truncf %234 : vector<32x128xf32> to vector<32x128xbf16>
    %c5_168 = arith.constant 5 : index
    %c0_169 = arith.constant 0 : index
    %c0_170 = arith.constant 0 : index
    %236 = vector.load %arg4[%c5_168, %c0_169, %c0_170] : memref<6x128x128xbf16, #tpu.memory_space<vmem>>, vector<1x128x128xbf16>
    %237 = vector.shape_cast %236 : vector<1x128x128xbf16> to vector<128x128xbf16>
    %cst_171 = arith.constant dense<0.000000e+00> : vector<32x128xf32>
    %238 = tpu.matmul %235, %237, %cst_171 {dimension_numbers = #tpu.dot_dimension_numbers<[1], [0], [0], [1], [0, 0, 1, 1], [], []>} : vector<32x128xbf16>, vector<128x128xbf16>, vector<32x128xf32> -> vector<32x128xf32>
    %239 = arith.addf %204, %238 : vector<32x128xf32>
    %c5_172 = arith.constant 5 : index
    %c0_173 = arith.constant 0 : index
    %c0_174 = arith.constant 0 : index
    %240 = vector.load %arg5[%c5_172, %c0_173, %c0_174] : memref<6x1x128xf32, #tpu.memory_space<vmem>>, vector<1x1x128xf32>
    %241 = vector.shape_cast %240 : vector<1x1x128xf32> to vector<1x128xf32>
    %242 = vector.broadcast %241 : vector<1x128xf32> to vector<32x128xf32>
    %243 = arith.addf %239, %242 : vector<32x128xf32>
    %244 = arith.truncf %234 : vector<32x128xf32> to vector<32x128xbf16>
    %c0_175 = arith.constant 0 : index
    %c0_176 = arith.constant 0 : index
    %245 = vector.load %arg6[%c0_175, %c0_176] : memref<128x128xbf16, #tpu.memory_space<vmem>>, vector<128x128xbf16>
    %cst_177 = arith.constant dense<0.000000e+00> : vector<32x128xf32>
    %246 = tpu.matmul %244, %245, %cst_177 {dimension_numbers = #tpu.dot_dimension_numbers<[1], [0], [0], [1], [0, 0, 1, 1], [], []>} : vector<32x128xbf16>, vector<128x128xbf16>, vector<32x128xf32> -> vector<32x128xf32>
    %c0_178 = arith.constant 0 : index
    %c0_179 = arith.constant 0 : index
    %247 = vector.load %arg7[%c0_178, %c0_179] : memref<1x128xf32, #tpu.memory_space<vmem>>, vector<1x128xf32>
    %248 = vector.broadcast %247 : vector<1x128xf32> to vector<32x128xf32>
    %249 = arith.addf %246, %248 : vector<32x128xf32>
    %250 = vector.shape_cast %249 : vector<32x128xf32> to vector<2x16x128xf32>
    %c0_180 = arith.constant 0 : index
    %c0_181 = arith.constant 0 : index
    %c0_182 = arith.constant 0 : index
    %251 = vector.load %arg10[%c0_180, %c0_181, %c0_182] : memref<2x16x128xf32, #tpu.memory_space<vmem>>, vector<2x16x128xf32>
    tpu.vector_store %arg10[%c0_180, %c0_181, %c0_182], %250 {strides = array<i32>} : memref<2x16x128xf32, #tpu.memory_space<vmem>>, vector<2x16x128xf32>,
    %252 = arith.truncf %249 : vector<32x128xf32> to vector<32x128xbf16>
    %c0_183 = arith.constant 0 : index
    %c0_184 = arith.constant 0 : index
    %253 = vector.load %arg8[%c0_183, %c0_184] : memref<128x128xbf16, #tpu.memory_space<vmem>>, vector<128x128xbf16>
    %cst_185 = arith.constant dense<0.000000e+00> : vector<32x128xf32>
    %254 = tpu.matmul %252, %253, %cst_185 {dimension_numbers = #tpu.dot_dimension_numbers<[1], [0], [0], [1], [0, 0, 1, 1], [], []>} : vector<32x128xbf16>, vector<128x128xbf16>, vector<32x128xf32> -> vector<32x128xf32>
    %255 = arith.addf %243, %254 : vector<32x128xf32>
    %c0_186 = arith.constant 0 : index
    %c0_187 = arith.constant 0 : index
    %256 = vector.load %arg9[%c0_186, %c0_187] : memref<1x128xf32, #tpu.memory_space<vmem>>, vector<1x128xf32>
    %257 = vector.broadcast %256 : vector<1x128xf32> to vector<32x128xf32>
    %258 = arith.addf %255, %257 : vector<32x128xf32>
    %259 = vector.shape_cast %258 : vector<32x128xf32> to vector<2x16x128xf32>
    %c0_188 = arith.constant 0 : index
    %c0_189 = arith.constant 0 : index
    %c0_190 = arith.constant 0 : index
    %260 = vector.load %arg11[%c0_188, %c0_189, %c0_190] : memref<2x16x128xf32, #tpu.memory_space<vmem>>, vector<2x16x128xf32>
    tpu.vector_store %arg11[%c0_188, %c0_189, %c0_190], %259 {strides = array<i32>} : memref<2x16x128xf32, #tpu.memory_space<vmem>>, vector<2x16x128xf32>,
    return
  }
  func.func @transform_0(%arg0: i32) -> (i32, i32, i32) {
    %c0_i32 = arith.constant 0 : i32
    %c0_i32_0 = arith.constant 0 : i32
    %c0_i32_1 = arith.constant 0 : i32
    return %arg0, %c0_i32, %c0_i32_0 : i32, i32, i32
  }
  func.func @transform_1(%arg0: i32) -> (i32, i32, i32, i32) {
    %c0_i32 = arith.constant 0 : i32
    %c0_i32_0 = arith.constant 0 : i32
    %c0_i32_1 = arith.constant 0 : i32
    %c0_i32_2 = arith.constant 0 : i32
    %c0_i32_3 = arith.constant 0 : i32
    return %c0_i32, %c0_i32_0, %c0_i32_1, %c0_i32_2 : i32, i32, i32, i32
  }
  func.func @transform_2(%arg0: i32) -> (i32, i32, i32) {
    %c0_i32 = arith.constant 0 : i32
    %c0_i32_0 = arith.constant 0 : i32
    %c0_i32_1 = arith.constant 0 : i32
    %c0_i32_2 = arith.constant 0 : i32
    return %c0_i32, %c0_i32_0, %c0_i32_1 : i32, i32, i32
  }
  func.func @transform_3(%arg0: i32) -> (i32, i32, i32) {
    %c0_i32 = arith.constant 0 : i32
    %c0_i32_0 = arith.constant 0 : i32
    %c0_i32_1 = arith.constant 0 : i32
    %c0_i32_2 = arith.constant 0 : i32
    return %c0_i32, %c0_i32_0, %c0_i32_1 : i32, i32, i32
  }
  func.func @transform_4(%arg0: i32) -> (i32, i32, i32) {
    %c0_i32 = arith.constant 0 : i32
    %c0_i32_0 = arith.constant 0 : i32
    %c0_i32_1 = arith.constant 0 : i32
    %c0_i32_2 = arith.constant 0 : i32
    return %c0_i32, %c0_i32_0, %c0_i32_1 : i32, i32, i32
  }
  func.func @transform_5(%arg0: i32) -> (i32, i32) {
    %c0_i32 = arith.constant 0 : i32
    %c0_i32_0 = arith.constant 0 : i32
    %c0_i32_1 = arith.constant 0 : i32
    return %c0_i32, %c0_i32_0 : i32, i32
  }
  func.func @transform_6(%arg0: i32) -> (i32, i32) {
    %c0_i32 = arith.constant 0 : i32
    %c0_i32_0 = arith.constant 0 : i32
    %c0_i32_1 = arith.constant 0 : i32
    return %c0_i32, %c0_i32_0 : i32, i32
  }
  func.func @transform_7(%arg0: i32) -> (i32, i32) {
    %c0_i32 = arith.constant 0 : i32
    %c0_i32_0 = arith.constant 0 : i32
    %c0_i32_1 = arith.constant 0 : i32
    return %c0_i32, %c0_i32_0 : i32, i32
  }
  func.func @transform_8(%arg0: i32) -> (i32, i32) {
    %c0_i32 = arith.constant 0 : i32
    %c0_i32_0 = arith.constant 0 : i32
    %c0_i32_1 = arith.constant 0 : i32
    return %c0_i32, %c0_i32_0 : i32, i32
  }
  func.func @transform_9(%arg0: i32) -> (i32, i32, i32) {
    %c0_i32 = arith.constant 0 : i32
    %c0_i32_0 = arith.constant 0 : i32
    %c0_i32_1 = arith.constant 0 : i32
    return %arg0, %c0_i32, %c0_i32_0 : i32, i32, i32
  }
  func.func @transform_10(%arg0: i32) -> (i32, i32, i32) {
    %c0_i32 = arith.constant 0 : i32
    %c0_i32_0 = arith.constant 0 : i32
    %c0_i32_1 = arith.constant 0 : i32
    return %arg0, %c0_i32, %c0_i32_0 : i32, i32, i32
  }
}

</mosaic_0001>

<bundles_post_ra>
// kernel: _cws_cnn_forward_impl.1
= control target key start
LH: loop header
LB: loop body
LE: loop exit
PB: predicated region body
PF: predicated region fallthrough
CT: control target
= control target key end

     0   :  { %16 = vsyncpa [#allocation3], 0  ;;  %s5485_s0 = inlined_call_operand.vmem [shape: bf16[2,16,128], index: 0, kind: input, shape index: {}]   ;;  %s5486_s1 = inlined_call_operand.hbm [shape: bf16[6,3,128,128], index: 1, kind: input, shape index: {}]   ;;  %s5487_s2 = inlined_call_operand.vmem [shape: f32[6,1,128], index: 2, kind: input, shape index: {}]   ;;  %s5488_s3 = inlined_call_operand.hbm [shape: bf16[6,128,128], index: 3, kind: input, shape index: {}]   ;;  %s5489_s4 = inlined_call_operand.vmem [shape: f32[6,1,128], index: 4, kind: input, shape index: {}]   ;;  %s5490_s5 = inlined_call_operand.vmem [shape: bf16[128,128], index: 5, kind: input, shape index: {}]   ;;  %s5491_s6 = inlined_call_operand.vmem [shape: f32[1,128], index: 6, kind: input, shape index: {}]   ;;  %s5492_s7 = inlined_call_operand.vmem [shape: bf16[128,128], index: 7, kind: input, shape index: {}]   ;;  %s5493_s8 = inlined_call_operand.vmem [shape: f32[1,128], index: 8, kind: input, shape index: {}]   ;;  %s5494_s9 = inlined_call_operand.hbm [shape: f32[2,16,128], index: 9, kind: output, shape index: {0}]   ;;  %s5495_s10 = inlined_call_operand.vmem [shape: f32[2,16,128], index: 10, kind: output, shape index: {1}]  }
   0x1   :  { %17 = vsyncpa [#allocation6], 0 }
   0x2   :  { %18 = vsyncpa [#allocation4], 0  ;;  %s4899_s13 = smov [#allocation2]  }
   0x3   :  { %s26_s14 = sshll.u32 %s4899_s13, 4  ;;  %s27_s14 = int_to_ptr.vmem [resolvable:$true] %s26_s14 }
   0x4   :  { %s4841_s15 = scalar_lea.vmem %s27_s14, 18432  ;;  %p4846_p1 = scmp.lt.s32.totalorder %s27_s14, %s27_s14 }
   0x5   :  { %p4842_p0 = scmp.ne.s32.totalorder %s27_s14, %s4841_s15  ;;  %p4847_p2 = scmp.lt.s32.totalorder %s4841_s15, %s4841_s15 }
   0x7   :  { %p4848_p3 = por %p4847_p2, %p4846_p1 }
   0x9   :  { %p4849_p4 = pnand %p4848_p3, %p4842_p0 }
   0xb   :  { %4852 = shalt.err (!%p4849_p4)
}
   0xc   :  { %s4900_s16 = smov 64   ;;  %s4901_s17 = smov 4  }
   0xd   :  { %32 = dma.hbm_to_vmem [thread:$0]  %s5486_s1, 18432, %s27_s14, [#allocation3], %s4900_s16, %s4900_s16, %s4901_s17  }
   0xe   :  { %s4902_s20 = smov [#allocation5]  }
   0xf   :  { %s40_s21 = sshll.u32 %s4902_s20, 4  ;;  %s41_s21 = int_to_ptr.vmem [resolvable:$true] %s40_s21 }
  0x10   :  { %s4861_s22 = scalar_lea.vmem %s41_s21, 6144  ;;  %p4866_p6 = scmp.lt.s32.totalorder %s41_s21, %s41_s21 }
  0x11   :  { %p4862_p5 = scmp.ne.s32.totalorder %s41_s21, %s4861_s22  ;;  %p4867_p7 = scmp.lt.s32.totalorder %s4861_s22, %s4861_s22 }
  0x13   :  { %p4868_p8 = por %p4867_p7, %p4866_p6 }
  0x15   :  { %p4869_p9 = pnand %p4868_p8, %p4862_p5 }
  0x17   :  { %4872 = shalt.err (!%p4869_p9)
}
  0x18   :  { %46 = dma.hbm_to_vmem [thread:$0]  %s5488_s3, 6144, %s41_s21, [#allocation6], %s4900_s16, %s4900_s16, %s4901_s17  }
  0x19   :  { %4893 = dma.done.wait [#allocation3], 18432  }
  0x1a   :  { %4894 = vsyncadd [#allocation3], 4294948864 }
  0x1b   :  { %4895 = dma.done.wait [#allocation6], 6144  }
  0x1c   :  { %4896 = vsyncadd [#allocation6], 4294961152  ;;  %v4621_v0 = vld [vmem:[#allocation2 + $0x78] sm:$0xff]   ;;  %v4623_v2 = vld [vmem:[#allocation2 + $0x70] sm:$0xff]   ;;  %v72_v8 = vlaneseq  ;;  %vm4903_vm3 = vmmov 1  }
  0x1d   :  { %v4622_v1 = vld [vmem:[#allocation2 + $0x38] sm:$0xff]   ;;  %4093 = vmatprep.subr.bf16.mxu0 %v4621_v0  ;;  %v4624_v3 = vld [vmem:[#allocation2 + $0x30] sm:$0xff]   ;;  %v4625_v4 = vld [vmem:[#allocation2 + $0x68] sm:$0xff]  }
  0x1e   :  { %4113 = vmatprep.subr.bf16.mxu1 %v4622_v1  ;;  %4094 = vmatpush3.bf16.msra.mxu0 %v4621_v0  ;;  %v4626_v5 = vld [vmem:[#allocation2 + $0x28] sm:$0xff]   ;;  %v4627_v6 = vld [vmem:[#allocation2 + $0x60] sm:$0xff]   ;;  %v4629_v9 = vld [vmem:[#allocation2 + $0x58] sm:$0xff]   ;;  %v4968_v11 = vshrl.u32 %v72_v8, 7 }
  0x1f   :  { %4114 = vmatpush3.bf16.msra.mxu1 %v4622_v1  ;;  %4095 = vmatprep.subr.bf16.mxu0 %v4623_v2  ;;  %v4628_v7 = vld [vmem:[#allocation2 + $0x20] sm:$0xff]   ;;  %v4630_v10 = vld [vmem:[#allocation2 + $0x18] sm:$0xff]   ;;  %v4631_v12 = vld [vmem:[#allocation2 + $0x50] sm:$0xff]  }
  0x20   :  { %4115 = vmatprep.subr.bf16.mxu1 %v4624_v3  ;;  %v64_v13 = vld [vmem:[%s5485_s0] sm:$0xff]   ;;  %v67_v14 = vld [vmem:[%s5485_s0 + $0x8] sm:$0xff]   ;;  %vm3831_vm0 = vcmp.ne.s32.totalorder %v4968_v11, 0  ;;  %v4632_v15 = vld [vmem:[#allocation2 + $0x10] sm:$0xff]   ;;  %vm83_vm1 = vcmp.lt.s32.totalorder %v4968_v11, 1  ;;  %v74_v19 = vadd.s32 8, %v4968_v11 }
  0x21   :  { %v68_v16 = vunpack.c.l.bf16 %v64_v13  ;;  %v69_v17 = vunpack.c.h.bf16 %v64_v13  ;;  %v71_v18 = vunpack.c.h.bf16 %v67_v14  ;;  %4109 = vmatprep.mubr.bf16.mxu0 %v64_v13  ;;  %v4633_v22 = vld [vmem:[#allocation2 + $0x48] sm:$0xff]   ;;  %vm100_vm2 = vcmp.lt.s32.totalorder %v4968_v11, 7  ;;  %vm4983_vm4 = vmpackc.low %vm4903_vm3, %vm3831_vm0  ;;  %v4635_v28 = vld [vmem:[#allocation2 + $0x40] sm:$0xff]  }
  0x22   :  { %4096 = vmatpush3.bf16.msra.mxu0 %v4623_v2  ;;  %v4634_v23 = vld [vmem:[#allocation2 + $0x8] sm:$0xff]   ;;  %v70_v26 = vunpack.c.l.bf16 %v67_v14  ;;  %vm3832_vm5 = vcmp.ne.s32.totalorder %v74_v19, 15  ;;  %v4636_v30 = vld [vmem:[#allocation2] sm:$0xff]   ;;  %v4639_v38 = vld [vmem:[#allocation2 + $0xb8] sm:$0xff]  }
  0x23   :  { %4116 = vmatpush3.bf16.msra.mxu1 %v4624_v3  ;;  %4097 = vmatprep.subr.bf16.mxu0 %v4625_v4  ;;  %v79_v20 = vrot.slane %v68_v16, 7  ;;  %v80_v21 = vrot.slane %v69_v17, 7  ;;  %v82_v24 = vrot.slane %v71_v18, 7  ;;  %v96_v31 = vrot.slane %v68_v16, 1  ;;  %vm4994_vm6 = vmpackc.low %vm3832_vm5, %vm4903_vm3  ;;  %v4640_v43 = vld [vmem:[#allocation2 + $0xb0] sm:$0xff]   ;;  %v4641_v46 = vld [vmem:[#allocation2 + $0xa8] sm:$0xff]  }
  0x24   :  { %4117 = vmatprep.subr.bf16.mxu1 %v4626_v5  ;;  %v97_v33 = vrot.slane %v69_v17, 1  ;;  %v81_v34 = vrot.slane %v70_v26, 7  ;;  %v99_v35 = vrot.slane %v71_v18, 1  ;;  %v98_v36 = vrot.slane %v70_v26, 1  ;;  %v4642_v47 = vld [vmem:[#allocation2 + $0xa0] sm:$0xff]   ;;  %v4643_v48 = vld [vmem:[#allocation2 + $0x98] sm:$0xff]  }
  0x25   :  { %v86_v27 = vsel %vm83_vm1, %v79_v20, %v80_v21  ;;  %v87_v29 = vsel %vm83_vm1, %v82_v24, %v79_v20  ;;  %v4644_v49 = vld [vmem:[#allocation2 + $0x90] sm:$0xff]   ;;  %v4645_v50 = vld [vmem:[#allocation2 + $0x88] sm:$0xff]   ;;  %v4646_v51 = vld [vmem:[#allocation2 + $0x80] sm:$0xff]  }
  0x26   :  { %4098 = vmatpush3.bf16.msra.mxu0 %v4625_v4  ;;  %v3521_v32 = vpack.c.bf16 %v86_v27, %v87_v29  ;;  %v84_v39 = vsel %vm83_vm1, %v81_v34, %v82_v24  ;;  %v85_v40 = vsel %vm83_vm1, %v80_v21, %v81_v34  ;;  %v102_v41 = vsel %vm100_vm2, %v97_v33, %v98_v36  ;;  %v4647_v55 = vld [vmem:[#allocation5 + $0x38] sm:$0xff]   ;;  %v4649_v57 = vld [vmem:[#allocation5 + $0x30] sm:$0xff]   ;;  %v4651_v59 = vld [vmem:[#allocation5 + $0x28] sm:$0xff]  }
  0x27   :  { %4118 = vmatpush3.bf16.msra.mxu1 %v4626_v5  ;;  %4099 = vmatprep.subr.bf16.mxu0 %v4627_v6  ;;  %v103_v42 = vsel %vm100_vm2, %v96_v31, %v97_v33  ;;  %v3525_v44 = vpack.c.bf16 %v84_v39, %v85_v40  ;;  %v104_v52 = vsel %vm100_vm2, %v99_v35, %v96_v31  ;;  %v4648_v56 = vld [vmem:[#allocation2 + $0x138] sm:$0xff]   ;;  %v4650_v58 = vld [vmem:[#allocation2 + $0x130] sm:$0xff]   ;;  %v4652_v60 = vld [vmem:[#allocation2 + $0x128] sm:$0xff]  }
  0x28   :  { %4119 = vmatprep.subr.bf16.mxu1 %v4628_v7  ;;  %4129 = vmatprep.mubr.msk.bf16.mxu1 %vm4983_vm4, %v3521_v32  ;;  %v3537_v45 = vpack.c.bf16 %v102_v41, %v103_v42  ;;  %v101_v53 = vsel %vm100_vm2, %v98_v36, %v99_v35  ;;  %v4653_v61 = vld [vmem:[#allocation5 + $0x20] sm:$0xff]   ;;  %v4655_v63 = vld [vmem:[#allocation5 + $0x18] sm:$0xff]   ;;  %v4657_v1 = vld [vmem:[#allocation5 + $0x10] sm:$0xff]  }
  0x29   :  { %v3541_v54 = vpack.c.bf16 %v104_v52, %v101_v53  ;;  %v4654_v62 = vld [vmem:[#allocation2 + $0x120] sm:$0xff]   ;;  %v4656_v0 = vld [vmem:[#allocation2 + $0x118] sm:$0xff]   ;;  %v4658_v2 = vld [vmem:[#allocation2 + $0x110] sm:$0xff]  }
  0x2a   :  { %4100 = vmatpush3.bf16.msra.mxu0 %v4627_v6  ;;  %v4659_v3 = vld [vmem:[#allocation5 + $0x8] sm:$0xff]   ;;  %v4661_v5 = vld [vmem:[#allocation5] sm:$0xff]   ;;  %v4664_v8 = vld [vmem:[#allocation2 + $0x178] sm:$0xff]  }
  0x2b   :  { %4120 = vmatpush3.bf16.msra.mxu1 %v4628_v7  ;;  %4101 = vmatprep.subr.bf16.mxu0 %v4629_v9  ;;  %v4660_v4 = vld [vmem:[#allocation2 + $0x108] sm:$0xff]   ;;  %v4662_v6 = vld [vmem:[#allocation2 + $0x100] sm:$0xff]   ;;  %v4663_v7 = vld [vmem:[#allocation2 + $0xf8] sm:$0xff]  }
  0x2c   :  { %4121 = vmatprep.subr.bf16.mxu1 %v4630_v10  ;;  %v3543_v21 = vld [vmem:[%s5487_s2] ss:$0 sm:$0xff]  ;;  %v4666_v53 = vld [vmem:[#allocation2 + $0x170] sm:$0xff]   ;;  %v4811_v25 = vld [vmem:[#allocation5 + $0x168] sm:$0xff]  }
  0x2d   :  { %v4810_v11 = vld [vmem:[%s5490_s5 + $0x30] sm:$0xff]   ;;  %v4812_v37 = vld [vmem:[%s5490_s5 + $0x28] sm:$0xff]  }
  0x2e   :  { %4102 = vmatpush3.bf16.msra.mxu0 %v4629_v9 }
  0x2f   :  { %4122 = vmatpush3.bf16.msra.mxu1 %v4630_v10  ;;  %4103 = vmatprep.subr.bf16.mxu0 %v4631_v12 }
  0x30   :  { %4123 = vmatprep.subr.bf16.mxu1 %v4632_v15 }
  0x32   :  { %4104 = vmatpush3.bf16.msra.mxu0 %v4631_v12 }
  0x33   :  { %4124 = vmatpush3.bf16.msra.mxu1 %v4632_v15  ;;  %4105 = vmatprep.subr.bf16.mxu0 %v4633_v22 }
  0x34   :  { %4125 = vmatprep.subr.bf16.mxu1 %v4634_v23 }
  0x36   :  { %4106 = vmatpush3.bf16.msra.mxu0 %v4633_v22 }
  0x37   :  { %4126 = vmatpush3.bf16.msra.mxu1 %v4634_v23  ;;  %4107 = vmatprep.subr.bf16.mxu0 %v4635_v28 }
  0x38   :  { %4127 = vmatprep.subr.bf16.mxu1 %v4636_v30 }
  0x3a   :  { %4108 = vmatpush3.bf16.msra.mxu0 %v4635_v28 }
  0x3b   :  { %4128 = vmatpush3.bf16.msra.mxu1 %v4636_v30  ;;  %4133 = vmatprep.subr.bf16.mxu0 %v4639_v38 }
  0x3c   :  { %4153 = vmatprep.subr.bf16.mxu1 %v4647_v55 }
  0x3d   :  { %4110 = vmatmul.mubr.bf16.vlgmr.msra.gmra.mxu0 %v67_v14 }
  0x3e   :  { %4130 = vmatmul.mubr.msk.bf16.vlgmr.msra.gmra.mxu1 %vm4983_vm4, %v3525_v44  ;;  %4134 = vmatpush3.bf16.msra.mxu0 %v4639_v38 }
  0x3f   :  { %4135 = vmatprep.subr.bf16.mxu0 %v4640_v43  ;;  %4149 = vmatprep.mubr.msk.bf16.mxu0 %vm4994_vm6, %v3537_v45 }
  0x40   :  { %4154 = vmatpush3.bf16.msra.mxu1 %v4647_v55 }
  0x41   :  { %4155 = vmatprep.subr.bf16.mxu1 %v4649_v57 }
  0x42   :  { %4136 = vmatpush3.bf16.msra.mxu0 %v4640_v43 }
  0x43   :  { %4137 = vmatprep.subr.bf16.mxu0 %v4641_v46 }
  0x44   :  { %4156 = vmatpush3.bf16.msra.mxu1 %v4649_v57  ;;  %v4667_v57 = vld [vmem:[#allocation2 + $0xe8] sm:$0xff]  }
  0x45   :  { %4157 = vmatprep.subr.bf16.mxu1 %v4651_v59 }
  0x46   :  { %4138 = vmatpush3.bf16.msra.mxu0 %v4641_v46 }
  0x47   :  { %4139 = vmatprep.subr.bf16.mxu0 %v4642_v47 }
  0x48   :  { %4158 = vmatpush3.bf16.msra.mxu1 %v4651_v59  ;;  %v4669_v59 = vld [vmem:[#allocation2 + $0xe0] sm:$0xff]  }
  0x49   :  { %4159 = vmatprep.subr.bf16.mxu1 %v4653_v61 }
  0x4a   :  { %4140 = vmatpush3.bf16.msra.mxu0 %v4642_v47 }
  0x4b   :  { %4141 = vmatprep.subr.bf16.mxu0 %v4643_v48 }
  0x4c   :  { %4160 = vmatpush3.bf16.msra.mxu1 %v4653_v61  ;;  %v4671_v61 = vld [vmem:[#allocation2 + $0xd8] sm:$0xff]  }
  0x4d   :  { %4161 = vmatprep.subr.bf16.mxu1 %v4655_v63 }
  0x4e   :  { %4142 = vmatpush3.bf16.msra.mxu0 %v4643_v48 }
  0x4f   :  { %4143 = vmatprep.subr.bf16.mxu0 %v4644_v49 }
  0x50   :  { %4162 = vmatpush3.bf16.msra.mxu1 %v4655_v63  ;;  %v4673_v63 = vld [vmem:[#allocation2 + $0xd0] sm:$0xff]  }
  0x51   :  { %4163 = vmatprep.subr.bf16.mxu1 %v4657_v1 }
  0x52   :  { %4144 = vmatpush3.bf16.msra.mxu0 %v4644_v49  ;;  %v4665_v49 = vld [vmem:[#allocation2 + $0xf0] sm:$0xff]  }
  0x53   :  { %4145 = vmatprep.subr.bf16.mxu0 %v4645_v50 }
  0x54   :  { %4164 = vmatpush3.bf16.msra.mxu1 %v4657_v1  ;;  %v4675_v1 = vld [vmem:[#allocation2 + $0xc8] sm:$0xff]  }
  0x55   :  { %4165 = vmatprep.subr.bf16.mxu1 %v4659_v3 }
  0x56   :  { %4146 = vmatpush3.bf16.msra.mxu0 %v4645_v50 }
  0x57   :  { %4147 = vmatprep.subr.bf16.mxu0 %v4646_v51 }
  0x58   :  { %4166 = vmatpush3.bf16.msra.mxu1 %v4659_v3  ;;  %v4677_v3 = vld [vmem:[#allocation2 + $0xc0] sm:$0xff]  }
  0x59   :  { %4167 = vmatprep.subr.bf16.mxu1 %v4661_v5 }
  0x5a   :  { %4148 = vmatpush3.bf16.msra.mxu0 %v4646_v51 }
  0x5b   :  { %4173 = vmatprep.subr.bf16.mxu0 %v4648_v56 }
  0x5c   :  { %4168 = vmatpush3.bf16.msra.mxu1 %v4661_v5 }
  0x5d   :  { %4150 = vmatmul.mubr.msk.bf16.vlgmr.msra.gmra.mxu0 %vm4994_vm6, %v3541_v54  ;;  %4193 = vmatprep.subr.bf16.mxu1 %v4663_v7 }
  0x5e   :  { %4174 = vmatpush3.bf16.msra.mxu0 %v4648_v56 }
  0x5f   :  { %4175 = vmatprep.subr.bf16.mxu0 %v4650_v58 }
  0x62   :  { %4176 = vmatpush3.bf16.msra.mxu0 %v4650_v58  ;;  %v4668_v58 = vld [vmem:[#allocation2 + $0x168] sm:$0xff]  }
  0x63   :  { %4177 = vmatprep.subr.bf16.mxu0 %v4652_v60 }
  0x66   :  { %4178 = vmatpush3.bf16.msra.mxu0 %v4652_v60  ;;  %v4670_v60 = vld [vmem:[#allocation2 + $0x160] sm:$0xff]  }
  0x67   :  { %4179 = vmatprep.subr.bf16.mxu0 %v4654_v62 }
  0x6a   :  { %4180 = vmatpush3.bf16.msra.mxu0 %v4654_v62  ;;  %v4672_v62 = vld [vmem:[#allocation2 + $0x158] sm:$0xff]  }
  0x6b   :  { %4181 = vmatprep.subr.bf16.mxu0 %v4656_v0 }
  0x6e   :  { %4182 = vmatpush3.bf16.msra.mxu0 %v4656_v0  ;;  %v4674_v0 = vld [vmem:[#allocation2 + $0x150] sm:$0xff]  }
  0x6f   :  { %4183 = vmatprep.subr.bf16.mxu0 %v4658_v2 }
  0x72   :  { %4184 = vmatpush3.bf16.msra.mxu0 %v4658_v2  ;;  %v4676_v2 = vld [vmem:[#allocation2 + $0x148] sm:$0xff]  }
  0x73   :  { %4185 = vmatprep.subr.bf16.mxu0 %v4660_v4 }
  0x76   :  { %4186 = vmatpush3.bf16.msra.mxu0 %v4660_v4  ;;  %v4678_v4 = vld [vmem:[#allocation2 + $0x140] sm:$0xff]  }
  0x77   :  { %4187 = vmatprep.subr.bf16.mxu0 %v4662_v6 }
  0x7a   :  { %4188 = vmatpush3.bf16.msra.mxu0 %v4662_v6 }
  0x7b   :  { %4213 = vmatprep.subr.bf16.mxu0 %v4664_v8 }
  0xfd   :  { %v4111_v9 = vpop.f32.mrf.mxu0 }
  0xfe   :  { %v4131_v12 = vpop.f32.mrf.mxu1 }
  0xff   :  { %v242_v10 = vpop.f32.mrf.mxu0  ;;  %v348_v16 = vadd.f32 %v4131_v12, %v4111_v9 }
 0x100   :  { %v339_v14 = vpop.f32.mrf.mxu1 }
 0x101   :  { %v4112_v13 = vpop.f32.mrf.mxu0  ;;  %v340_v19 = vadd.f32 %v339_v14, %v242_v10  ;;  %v4679_v14 = vld [vmem:[#allocation5 + $0x78] sm:$0xff]  }
 0x102   :  { %v4132_v17 = vpop.f32.mrf.mxu1 }
 0x103   :  { %v245_v15 = vpop.f32.mrf.mxu0  ;;  %v351_v23 = vadd.f32 %v4132_v17, %v4112_v13  ;;  %v4682_v17 = vld [vmem:[#allocation2 + $0x1f0] sm:$0xff]  }
 0x104   :  { %v342_v24 = vpop.f32.mrf.mxu1 }
 0x105   :  { %v343_v30 = vadd.f32 %v342_v24, %v245_v15  ;;  %v4680_v15 = vld [vmem:[#allocation2 + $0x1f8] sm:$0xff]   ;;  %v4689_v24 = vld [vmem:[#allocation5 + $0x50] sm:$0xff]  }
 0x11d   :  { %v4151_v18 = vpop.f32.mrf.mxu0 }
 0x11e   :  { %v472_v20 = vadd.f32 %v4151_v18, %v348_v16  ;;  %v4681_v16 = vld [vmem:[#allocation5 + $0x70] sm:$0xff]   ;;  %v4683_v18 = vld [vmem:[#allocation5 + $0x68] sm:$0xff]  }
 0x11f   :  { %v455_v22 = vpop.f32.mrf.mxu0 }
 0x120   :  { %v470_v26 = vadd.f32 %v455_v22, %v340_v19  ;;  %v483_v28 = vadd.f32 %v3543_v21, %v472_v20  ;;  %v4684_v19 = vld [vmem:[#allocation2 + $0x1e8] sm:$0xff]   ;;  %v4685_v20 = vld [vmem:[#allocation5 + $0x60] sm:$0xff]   ;;  %v4687_v22 = vld [vmem:[#allocation5 + $0x58] sm:$0xff]  }
 0x121   :  { %v4152_v27 = vpop.f32.mrf.mxu0 }
 0x122   :  { %v473_v29 = vadd.f32 %v4152_v27, %v351_v23  ;;  %v481_v31 = vadd.f32 %v3543_v21, %v470_v26  ;;  %v5019_v35 = vmax.f32 %v483_v28, 0.0  ;;  %v4688_v23 = vld [vmem:[#allocation2 + $0x1d8] sm:$0xff]   ;;  %v4690_v26 = vld [vmem:[#allocation2 + $0x1d0] sm:$0xff]   ;;  %v4691_v27 = vld [vmem:[#allocation5 + $0x48] sm:$0xff]  }
 0x123   :  { %v458_v32 = vpop.f32.mrf.mxu0  ;;  %v4692_v28 = vld [vmem:[#allocation2 + $0x1c8] sm:$0xff]  }
 0x124   :  { %v484_v33 = vadd.f32 %v3543_v21, %v473_v29  ;;  %v471_v34 = vadd.f32 %v458_v32, %v343_v30  ;;  %v5023_v38 = vmax.f32 %v481_v31, 0.0  ;;  %v625_v42 = vrot.slane %v5019_v35, 1  ;;  %v4693_v29 = vld [vmem:[#allocation5 + $0x40] sm:$0xff]   ;;  %v4695_v31 = vld [vmem:[#allocation2 + $0x1b8] sm:$0xff]  }
 0x125   :  { %v613_v6 = vrot.slane %v5019_v35, 7  ;;  %v4694_v30 = vld [vmem:[#allocation2 + $0x1c0] sm:$0xff]   ;;  %v4696_v32 = vld [vmem:[#allocation2 + $0x238] sm:$0xff]  }
 0x126   :  { %v5021_v36 = vmax.f32 %v484_v33, 0.0  ;;  %v482_v39 = vadd.f32 %v3543_v21, %v471_v34  ;;  %v611_v43 = vrot.slane %v5023_v38, 7  ;;  %v623_v47 = vrot.slane %v5023_v38, 1  ;;  %v4686_v21 = vld [vmem:[#allocation2 + $0x1e0] sm:$0xff]  }
 0x128   :  { %v614_v40 = vrot.slane %v5021_v36, 7  ;;  %v5026_v41 = vmax.f32 %v482_v39, 0.0  ;;  %v490_v48 = vpack.c.bf16 %v5021_v36, %v5019_v35  ;;  %v626_v5 = vrot.slane %v5021_v36, 1 }
 0x12a   :  { %v612_v44 = vrot.slane %v5026_v41, 7  ;;  %v624_v45 = vrot.slane %v5026_v41, 1  ;;  %v489_v46 = vpack.c.bf16 %v5026_v41, %v5023_v38  ;;  %v618_v51 = vsel %vm83_vm1, %v614_v40, %v611_v43 }
 0x12b   :  { %v615_v10 = vsel %vm83_vm1, %v613_v6, %v614_v40 }
 0x12c   :  { %4169 = vmatprep.mubr.bf16.mxu1 %v489_v46  ;;  %4189 = vmatprep.mubr.bf16.mxu0 %v489_v46  ;;  %v617_v50 = vsel %vm83_vm1, %v611_v43, %v612_v44  ;;  %v628_v52 = vsel %vm100_vm2, %v624_v45, %v625_v42  ;;  %v629_v55 = vsel %vm100_vm2, %v623_v47, %v624_v45 }
 0x12d   :  { %4170 = vmatmul.mubr.bf16.vlgmr.msra.gmra.mxu1 %v490_v48  ;;  %4190 = vmatmul.mubr.bf16.vlgmr.msra.gmra.mxu0 %v490_v48  ;;  %v3571_v54 = vpack.c.bf16 %v617_v50, %v618_v51  ;;  %v3587_v56 = vpack.c.bf16 %v628_v52, %v629_v55  ;;  %v616_v9 = vsel %vm83_vm1, %v612_v44, %v613_v6 }
 0x12e   :  { %4194 = vmatpush3.bf16.msra.mxu1 %v4663_v7  ;;  %4214 = vmatpush3.bf16.msra.mxu0 %v4664_v8  ;;  %v627_v7 = vsel %vm100_vm2, %v625_v42, %v626_v5  ;;  %v630_v8 = vsel %vm100_vm2, %v626_v5, %v623_v47  ;;  %v3575_v12 = vpack.c.bf16 %v615_v10, %v616_v9 }
 0x12f   :  { %4209 = vmatprep.mubr.msk.bf16.mxu1 %vm4983_vm4, %v3571_v54  ;;  %4195 = vmatprep.subr.bf16.mxu1 %v4665_v49  ;;  %v3591_v13 = vpack.c.bf16 %v630_v8, %v627_v7 }
 0x130   :  { %4229 = vmatprep.mubr.msk.bf16.mxu0 %vm4994_vm6, %v3587_v56  ;;  %4215 = vmatprep.subr.bf16.mxu0 %v4666_v53 }
 0x132   :  { %4196 = vmatpush3.bf16.msra.mxu1 %v4665_v49  ;;  %4216 = vmatpush3.bf16.msra.mxu0 %v4666_v53  ;;  %v3594_v49 = vld [vmem:[%s5487_s2 + $0x1] ss:$0 sm:$0xff] }
 0x133   :  { %4197 = vmatprep.subr.bf16.mxu1 %v4667_v57  ;;  %4217 = vmatprep.subr.bf16.mxu0 %v4668_v58 }
 0x136   :  { %4198 = vmatpush3.bf16.msra.mxu1 %v4667_v57  ;;  %4218 = vmatpush3.bf16.msra.mxu0 %v4668_v58 }
 0x137   :  { %4199 = vmatprep.subr.bf16.mxu1 %v4669_v59  ;;  %4219 = vmatprep.subr.bf16.mxu0 %v4670_v60 }
 0x13a   :  { %4200 = vmatpush3.bf16.msra.mxu1 %v4669_v59  ;;  %4220 = vmatpush3.bf16.msra.mxu0 %v4670_v60 }
 0x13b   :  { %4201 = vmatprep.subr.bf16.mxu1 %v4671_v61  ;;  %4221 = vmatprep.subr.bf16.mxu0 %v4672_v62 }
 0x13e   :  { %4202 = vmatpush3.bf16.msra.mxu1 %v4671_v61  ;;  %4222 = vmatpush3.bf16.msra.mxu0 %v4672_v62 }
 0x13f   :  { %4203 = vmatprep.subr.bf16.mxu1 %v4673_v63  ;;  %4223 = vmatprep.subr.bf16.mxu0 %v4674_v0 }
 0x142   :  { %4204 = vmatpush3.bf16.msra.mxu1 %v4673_v63  ;;  %4224 = vmatpush3.bf16.msra.mxu0 %v4674_v0 }
 0x143   :  { %4205 = vmatprep.subr.bf16.mxu1 %v4675_v1  ;;  %4225 = vmatprep.subr.bf16.mxu0 %v4676_v2 }
 0x146   :  { %4206 = vmatpush3.bf16.msra.mxu1 %v4675_v1  ;;  %4226 = vmatpush3.bf16.msra.mxu0 %v4676_v2 }
 0x147   :  { %4207 = vmatprep.subr.bf16.mxu1 %v4677_v3  ;;  %4227 = vmatprep.subr.bf16.mxu0 %v4678_v4 }
 0x14a   :  { %4208 = vmatpush3.bf16.msra.mxu1 %v4677_v3  ;;  %4228 = vmatpush3.bf16.msra.mxu0 %v4678_v4 }
 0x14b   :  { %4233 = vmatprep.subr.bf16.mxu1 %v4679_v14  ;;  %4253 = vmatprep.subr.bf16.mxu0 %v4680_v15 }
 0x14d   :  { %4210 = vmatmul.mubr.msk.bf16.vlgmr.msra.gmra.mxu1 %vm4983_vm4, %v3575_v12  ;;  %4230 = vmatmul.mubr.msk.bf16.vlgmr.msra.gmra.mxu0 %vm4994_vm6, %v3591_v13  ;;  %v4697_v12 = vld [vmem:[#allocation2 + $0x1b0] sm:$0xff]  }
 0x14e   :  { %4234 = vmatpush3.bf16.msra.mxu1 %v4679_v14  ;;  %4254 = vmatpush3.bf16.msra.mxu0 %v4680_v15 }
 0x14f   :  { %4235 = vmatprep.subr.bf16.mxu1 %v4681_v16  ;;  %4255 = vmatprep.subr.bf16.mxu0 %v4682_v17 }
 0x152   :  { %4236 = vmatpush3.bf16.msra.mxu1 %v4681_v16  ;;  %4256 = vmatpush3.bf16.msra.mxu0 %v4682_v17  ;;  %v4698_v16 = vld [vmem:[#allocation2 + $0x230] sm:$0xff]  }
 0x153   :  { %4237 = vmatprep.subr.bf16.mxu1 %v4683_v18  ;;  %4257 = vmatprep.subr.bf16.mxu0 %v4684_v19 }
 0x156   :  { %4238 = vmatpush3.bf16.msra.mxu1 %v4683_v18  ;;  %4258 = vmatpush3.bf16.msra.mxu0 %v4684_v19 }
 0x157   :  { %4239 = vmatprep.subr.bf16.mxu1 %v4685_v20  ;;  %4259 = vmatprep.subr.bf16.mxu0 %v4686_v21 }
 0x15a   :  { %4240 = vmatpush3.bf16.msra.mxu1 %v4685_v20  ;;  %4260 = vmatpush3.bf16.msra.mxu0 %v4686_v21  ;;  %v4699_v20 = vld [vmem:[#allocation2 + $0x1a8] sm:$0xff]  }
 0x15b   :  { %4241 = vmatprep.subr.bf16.mxu1 %v4687_v22  ;;  %4261 = vmatprep.subr.bf16.mxu0 %v4688_v23  ;;  %v4700_v21 = vld [vmem:[#allocation2 + $0x228] sm:$0xff]  }
 0x15e   :  { %4242 = vmatpush3.bf16.msra.mxu1 %v4687_v22  ;;  %4262 = vmatpush3.bf16.msra.mxu0 %v4688_v23  ;;  %v4701_v22 = vld [vmem:[#allocation2 + $0x1a0] sm:$0xff]  }
 0x15f   :  { %4243 = vmatprep.subr.bf16.mxu1 %v4689_v24  ;;  %4263 = vmatprep.subr.bf16.mxu0 %v4690_v26  ;;  %v4702_v23 = vld [vmem:[#allocation2 + $0x220] sm:$0xff]  }
 0x162   :  { %4244 = vmatpush3.bf16.msra.mxu1 %v4689_v24  ;;  %4264 = vmatpush3.bf16.msra.mxu0 %v4690_v26  ;;  %v4703_v24 = vld [vmem:[#allocation2 + $0x198] sm:$0xff]  }
 0x163   :  { %4245 = vmatprep.subr.bf16.mxu1 %v4691_v27  ;;  %4265 = vmatprep.subr.bf16.mxu0 %v4692_v28  ;;  %v4704_v26 = vld [vmem:[#allocation2 + $0x218] sm:$0xff]  }
 0x166   :  { %4246 = vmatpush3.bf16.msra.mxu1 %v4691_v27  ;;  %4266 = vmatpush3.bf16.msra.mxu0 %v4692_v28  ;;  %v4705_v27 = vld [vmem:[#allocation2 + $0x190] sm:$0xff]  }
 0x167   :  { %4247 = vmatprep.subr.bf16.mxu1 %v4693_v29  ;;  %4267 = vmatprep.subr.bf16.mxu0 %v4694_v30  ;;  %v4706_v28 = vld [vmem:[#allocation2 + $0x210] sm:$0xff]  }
 0x16a   :  { %4248 = vmatpush3.bf16.msra.mxu1 %v4693_v29  ;;  %4268 = vmatpush3.bf16.msra.mxu0 %v4694_v30  ;;  %v4707_v29 = vld [vmem:[#allocation2 + $0x188] sm:$0xff]  }
 0x16b   :  { %4273 = vmatprep.subr.bf16.mxu1 %v4695_v31  ;;  %4293 = vmatprep.subr.bf16.mxu0 %v4696_v32  ;;  %v4708_v30 = vld [vmem:[#allocation2 + $0x208] sm:$0xff]  }
 0x1ed   :  { %v5075_v33 = vpop.f32.mrf.mxu1  ;;  %v4191_v34 = vpop.f32.mrf.mxu0 }
 0x1ef   :  { %v5077_v35 = vpop.f32.mrf.mxu1  ;;  %v753_v36 = vpop.f32.mrf.mxu0 }
 0x1f1   :  { %v5079_v38 = vpop.f32.mrf.mxu1  ;;  %v4192_v39 = vpop.f32.mrf.mxu0 }
 0x1f3   :  { %v5081_v40 = vpop.f32.mrf.mxu1  ;;  %v756_v41 = vpop.f32.mrf.mxu0 }
 0x20d   :  { %v4211_v42 = vpop.f32.mrf.mxu1  ;;  %v4231_v43 = vpop.f32.mrf.mxu0 }
 0x20e   :  { %v859_v44 = vadd.f32 %v4211_v42, %v4191_v34 }
 0x20f   :  { %v850_v45 = vpop.f32.mrf.mxu1  ;;  %v966_v46 = vpop.f32.mrf.mxu0 }
 0x210   :  { %v983_v47 = vadd.f32 %v4231_v43, %v859_v44  ;;  %v851_v48 = vadd.f32 %v850_v45, %v753_v36 }
 0x211   :  { %v4212_v50 = vpop.f32.mrf.mxu1  ;;  %v4232_v53 = vpop.f32.mrf.mxu0 }
 0x212   :  { %v981_v51 = vadd.f32 %v966_v46, %v851_v48  ;;  %v862_v52 = vadd.f32 %v4212_v50, %v4192_v39  ;;  %v995_v55 = vadd.f32 %v3594_v49, %v983_v47  ;;  %v4711_v46 = vld [vmem:[#allocation5 + $0xb8] sm:$0xff]   ;;  %v4713_v48 = vld [vmem:[#allocation5 + $0xb0] sm:$0xff]   ;;  %v4715_v50 = vld [vmem:[#allocation5 + $0xa8] sm:$0xff]  }
 0x213   :  { %v853_v54 = vpop.f32.mrf.mxu1  ;;  %v969_v60 = vpop.f32.mrf.mxu0  ;;  %v4712_v47 = vld [vmem:[#allocation2 + $0x2b8] sm:$0xff]  }
 0x214   :  { %v984_v56 = vadd.f32 %v4232_v53, %v862_v52  ;;  %v854_v57 = vadd.f32 %v853_v54, %v756_v41  ;;  %v993_v58 = vadd.f32 %v3594_v49, %v981_v51  ;;  %v5086_v62 = vmax.f32 %v995_v55, 0.0  ;;  %v4716_v51 = vld [vmem:[#allocation2 + $0x2a8] sm:$0xff]   ;;  %v4717_v52 = vld [vmem:[#allocation5 + $0xa0] sm:$0xff]   ;;  %v4719_v54 = vld [vmem:[#allocation5 + $0x98] sm:$0xff]  }
 0x215   :  { %v4718_v53 = vld [vmem:[#allocation2 + $0x2a0] sm:$0xff]   ;;  %v4720_v55 = vld [vmem:[#allocation2 + $0x298] sm:$0xff]  }
 0x216   :  { %v996_v59 = vadd.f32 %v3594_v49, %v984_v56  ;;  %v982_v61 = vadd.f32 %v969_v60, %v854_v57  ;;  %v5090_v0 = vmax.f32 %v993_v58, 0.0  ;;  %v1147_v4 = vrot.slane %v5086_v62, 1  ;;  %v4721_v56 = vld [vmem:[#allocation5 + $0x90] sm:$0xff]   ;;  %v4723_v58 = vld [vmem:[#allocation5 + $0x88] sm:$0xff]   ;;  %v4725_v60 = vld [vmem:[#allocation5 + $0x80] sm:$0xff]  }
 0x217   :  { %v1135_v36 = vrot.slane %v5086_v62, 7  ;;  %v4722_v57 = vld [vmem:[#allocation2 + $0x290] sm:$0xff]  }
 0x218   :  { %v5088_v63 = vmax.f32 %v996_v59, 0.0  ;;  %v994_v1 = vadd.f32 %v3594_v49, %v982_v61  ;;  %v1133_v5 = vrot.slane %v5090_v0, 7  ;;  %v1145_v9 = vrot.slane %v5090_v0, 1  ;;  %v4714_v49 = vld [vmem:[#allocation2 + $0x2b0] sm:$0xff]   ;;  %v4724_v59 = vld [vmem:[#allocation2 + $0x288] sm:$0xff]   ;;  %v4726_v61 = vld [vmem:[#allocation2 + $0x280] sm:$0xff]  }
 0x21a   :  { %v1136_v2 = vrot.slane %v5088_v63, 7  ;;  %v5093_v3 = vmax.f32 %v994_v1, 0.0  ;;  %v1002_v10 = vpack.c.bf16 %v5088_v63, %v5086_v62  ;;  %v1148_v34 = vrot.slane %v5088_v63, 1  ;;  %v5142_v62 = vld [vmem:[#allocation2 + $0x278] sm:$0xff]  }
 0x21b   :  { %v5144_v63 = vld [vmem:[#allocation2 + $0x2f8] sm:$0xff]  }
 0x21c   :  { %v1134_v6 = vrot.slane %v5093_v3, 7  ;;  %v1146_v7 = vrot.slane %v5093_v3, 1  ;;  %v1001_v8 = vpack.c.bf16 %v5093_v3, %v5090_v0  ;;  %v1140_v14 = vsel %vm83_vm1, %v1136_v2, %v1133_v5  ;;  %v3544_v0 = vld [vmem:[%s5489_s4] ss:$0 sm:$0xff] }
 0x21d   :  { %v1149_v39 = vsel %vm100_vm2, %v1147_v4, %v1148_v34  ;;  %v1152_v41 = vsel %vm100_vm2, %v1148_v34, %v1145_v9  ;;  %v1137_v43 = vsel %vm83_vm1, %v1135_v36, %v1136_v2  ;;  %v605_v1 = vadd.f32 %v5075_v33, %v3544_v0 }
 0x21e   :  { %4249 = vmatprep.mubr.bf16.mxu1 %v1001_v8  ;;  %4269 = vmatprep.mubr.bf16.mxu0 %v1001_v8  ;;  %v1139_v13 = vsel %vm83_vm1, %v1133_v5, %v1134_v6  ;;  %v1150_v15 = vsel %vm100_vm2, %v1146_v7, %v1147_v4  ;;  %v1151_v18 = vsel %vm100_vm2, %v1145_v9, %v1146_v7 }
 0x21f   :  { %4250 = vmatmul.mubr.bf16.vlgmr.msra.gmra.mxu1 %v1002_v10  ;;  %4270 = vmatmul.mubr.bf16.vlgmr.msra.gmra.mxu0 %v1002_v10  ;;  %v3623_v17 = vpack.c.bf16 %v1139_v13, %v1140_v14  ;;  %v3639_v19 = vpack.c.bf16 %v1150_v15, %v1151_v18  ;;  %v1138_v42 = vsel %vm83_vm1, %v1134_v6, %v1135_v36 }
 0x220   :  { %4274 = vmatpush3.bf16.msra.mxu1 %v4695_v31  ;;  %4294 = vmatpush3.bf16.msra.mxu0 %v4696_v32  ;;  %v4709_v31 = vld [vmem:[#allocation2 + $0x180] sm:$0xff]   ;;  %v3627_v44 = vpack.c.bf16 %v1137_v43, %v1138_v42  ;;  %v3643_v45 = vpack.c.bf16 %v1152_v41, %v1149_v39  ;;  %v597_v3 = vadd.f32 %v3544_v0, %v5077_v35 }
 0x221   :  { %4289 = vmatprep.mubr.msk.bf16.mxu1 %vm4983_vm4, %v3623_v17  ;;  %4275 = vmatprep.subr.bf16.mxu1 %v4697_v12  ;;  %v4710_v32 = vld [vmem:[#allocation2 + $0x200] sm:$0xff]   ;;  %v608_v6 = vadd.f32 %v5079_v38, %v3544_v0  ;;  %v600_v9 = vadd.f32 %v3544_v0, %v5081_v40  ;;  %v4732_v0 = vld [vmem:[#allocation2 + $0x2e8] sm:$0xff]  }
 0x222   :  { %4309 = vmatprep.mubr.msk.bf16.mxu0 %vm4994_vm6, %v3639_v19  ;;  %4295 = vmatprep.subr.bf16.mxu0 %v4698_v16  ;;  %v3646_v40 = vld [vmem:[%s5487_s2 + $0x2] ss:$0 sm:$0xff] }
 0x224   :  { %4276 = vmatpush3.bf16.msra.mxu1 %v4697_v12  ;;  %4296 = vmatpush3.bf16.msra.mxu0 %v4698_v16 }
 0x225   :  { %4277 = vmatprep.subr.bf16.mxu1 %v4699_v20  ;;  %4297 = vmatprep.subr.bf16.mxu0 %v4700_v21 }
 0x228   :  { %4278 = vmatpush3.bf16.msra.mxu1 %v4699_v20  ;;  %4298 = vmatpush3.bf16.msra.mxu0 %v4700_v21 }
 0x229   :  { %4279 = vmatprep.subr.bf16.mxu1 %v4701_v22  ;;  %4299 = vmatprep.subr.bf16.mxu0 %v4702_v23 }
 0x22c   :  { %4280 = vmatpush3.bf16.msra.mxu1 %v4701_v22  ;;  %4300 = vmatpush3.bf16.msra.mxu0 %v4702_v23 }
 0x22d   :  { %4281 = vmatprep.subr.bf16.mxu1 %v4703_v24  ;;  %4301 = vmatprep.subr.bf16.mxu0 %v4704_v26 }
 0x230   :  { %4282 = vmatpush3.bf16.msra.mxu1 %v4703_v24  ;;  %4302 = vmatpush3.bf16.msra.mxu0 %v4704_v26 }
 0x231   :  { %4283 = vmatprep.subr.bf16.mxu1 %v4705_v27  ;;  %4303 = vmatprep.subr.bf16.mxu0 %v4706_v28 }
 0x234   :  { %4284 = vmatpush3.bf16.msra.mxu1 %v4705_v27  ;;  %4304 = vmatpush3.bf16.msra.mxu0 %v4706_v28 }
 0x235   :  { %4285 = vmatprep.subr.bf16.mxu1 %v4707_v29  ;;  %4305 = vmatprep.subr.bf16.mxu0 %v4708_v30 }
 0x238   :  { %4286 = vmatpush3.bf16.msra.mxu1 %v4707_v29  ;;  %4306 = vmatpush3.bf16.msra.mxu0 %v4708_v30 }
 0x239   :  { %4287 = vmatprep.subr.bf16.mxu1 %v4709_v31  ;;  %4307 = vmatprep.subr.bf16.mxu0 %v4710_v32 }
 0x23c   :  { %4288 = vmatpush3.bf16.msra.mxu1 %v4709_v31  ;;  %4308 = vmatpush3.bf16.msra.mxu0 %v4710_v32 }
 0x23d   :  { %4313 = vmatprep.subr.bf16.mxu1 %v4711_v46  ;;  %4333 = vmatprep.subr.bf16.mxu0 %v4712_v47 }
 0x23f   :  { %4290 = vmatmul.mubr.msk.bf16.vlgmr.msra.gmra.mxu1 %vm4983_vm4, %v3627_v44  ;;  %4310 = vmatmul.mubr.msk.bf16.vlgmr.msra.gmra.mxu0 %vm4994_vm6, %v3643_v45 }
 0x240   :  { %4314 = vmatpush3.bf16.msra.mxu1 %v4711_v46  ;;  %4334 = vmatpush3.bf16.msra.mxu0 %v4712_v47 }
 0x241   :  { %4315 = vmatprep.subr.bf16.mxu1 %v4713_v48  ;;  %4335 = vmatprep.subr.bf16.mxu0 %v4714_v49 }
 0x244   :  { %4316 = vmatpush3.bf16.msra.mxu1 %v4713_v48  ;;  %4336 = vmatpush3.bf16.msra.mxu0 %v4714_v49 }
 0x245   :  { %4317 = vmatprep.subr.bf16.mxu1 %v4715_v50  ;;  %4337 = vmatprep.subr.bf16.mxu0 %v4716_v51 }
 0x248   :  { %4318 = vmatpush3.bf16.msra.mxu1 %v4715_v50  ;;  %4338 = vmatpush3.bf16.msra.mxu0 %v4716_v51 }
 0x249   :  { %4319 = vmatprep.subr.bf16.mxu1 %v4717_v52  ;;  %4339 = vmatprep.subr.bf16.mxu0 %v4718_v53 }
 0x24c   :  { %4320 = vmatpush3.bf16.msra.mxu1 %v4717_v52  ;;  %4340 = vmatpush3.bf16.msra.mxu0 %v4718_v53  ;;  %v4729_v53 = vld [vmem:[#allocation2 + $0x270] sm:$0xff]  }
 0x24d   :  { %4321 = vmatprep.subr.bf16.mxu1 %v4719_v54  ;;  %4341 = vmatprep.subr.bf16.mxu0 %v4720_v55 }
 0x250   :  { %4322 = vmatpush3.bf16.msra.mxu1 %v4719_v54  ;;  %4342 = vmatpush3.bf16.msra.mxu0 %v4720_v55 }
 0x251   :  { %4323 = vmatprep.subr.bf16.mxu1 %v4721_v56  ;;  %4343 = vmatprep.subr.bf16.mxu0 %v4722_v57 }
 0x254   :  { %4324 = vmatpush3.bf16.msra.mxu1 %v4721_v56  ;;  %4344 = vmatpush3.bf16.msra.mxu0 %v4722_v57  ;;  %v4730_v57 = vld [vmem:[#allocation2 + $0x2f0] sm:$0xff]  }
 0x255   :  { %4325 = vmatprep.subr.bf16.mxu1 %v4723_v58  ;;  %4345 = vmatprep.subr.bf16.mxu0 %v4724_v59 }
 0x258   :  { %4326 = vmatpush3.bf16.msra.mxu1 %v4723_v58  ;;  %4346 = vmatpush3.bf16.msra.mxu0 %v4724_v59 }
 0x259   :  { %4327 = vmatprep.subr.bf16.mxu1 %v4725_v60  ;;  %4347 = vmatprep.subr.bf16.mxu0 %v4726_v61 }
 0x25c   :  { %4328 = vmatpush3.bf16.msra.mxu1 %v4725_v60  ;;  %4348 = vmatpush3.bf16.msra.mxu0 %v4726_v61  ;;  %v4731_v61 = vld [vmem:[#allocation2 + $0x268] sm:$0xff]  }
 0x25d   :  { %4353 = vmatprep.subr.bf16.mxu1 %v5142_v62  ;;  %4373 = vmatprep.subr.bf16.mxu0 %v5144_v63 }
 0x2df   :  { %v4251_v2 = vpop.f32.mrf.mxu1  ;;  %v4271_v14 = vpop.f32.mrf.mxu0 }
 0x2e0   :  { %v5153_v4 = vadd.f32 %v4251_v2, %v605_v1  ;;  %v4733_v1 = vld [vmem:[#allocation2 + $0x260] sm:$0xff]  }
 0x2e1   :  { %v1102_v5 = vpop.f32.mrf.mxu1  ;;  %v1275_v33 = vpop.f32.mrf.mxu0  ;;  %v4734_v2 = vld [vmem:[#allocation2 + $0x2e0] sm:$0xff]  }
 0x2e2   :  { %v5156_v7 = vadd.f32 %v1102_v5, %v597_v3  ;;  %v4737_v3 = vld [vmem:[#allocation2 + $0x250] sm:$0xff]  }
 0x2e3   :  { %v4252_v8 = vpop.f32.mrf.mxu1  ;;  %v4272_v15 = vpop.f32.mrf.mxu0  ;;  %v4738_v5 = vld [vmem:[#allocation2 + $0x2d0] sm:$0xff]  }
 0x2e4   :  { %v5159_v10 = vadd.f32 %v4252_v8, %v608_v6  ;;  %v4739_v6 = vld [vmem:[#allocation2 + $0x248] sm:$0xff]  }
 0x2e5   :  { %v1105_v12 = vpop.f32.mrf.mxu1  ;;  %v1278_v16 = vpop.f32.mrf.mxu0  ;;  %v4740_v8 = vld [vmem:[#allocation2 + $0x2c8] sm:$0xff]  }
 0x2e6   :  { %v5161_v13 = vadd.f32 %v1105_v12, %v600_v9  ;;  %v4741_v9 = vld [vmem:[#allocation2 + $0x240] sm:$0xff]  }
 0x2e7   :  { %v4742_v12 = vld [vmem:[#allocation2 + $0x2c0] sm:$0xff]  }
 0x2ff   :  { %v4291_v35 = vpop.f32.mrf.mxu1  ;;  %v4311_v17 = vpop.f32.mrf.mxu0 }
 0x300   :  { %v1381_v18 = vadd.f32 %v4291_v35, %v4271_v14 }
 0x301   :  { %v1372_v19 = vpop.f32.mrf.mxu1  ;;  %v1488_v20 = vpop.f32.mrf.mxu0 }
 0x302   :  { %v1505_v38 = vadd.f32 %v4311_v17, %v1381_v18  ;;  %v1373_v21 = vadd.f32 %v1372_v19, %v1275_v33 }
 0x303   :  { %v4292_v22 = vpop.f32.mrf.mxu1  ;;  %v4312_v26 = vpop.f32.mrf.mxu0 }
 0x304   :  { %v1503_v23 = vadd.f32 %v1488_v20, %v1373_v21  ;;  %v1384_v24 = vadd.f32 %v4292_v22, %v4272_v15  ;;  %v1517_v28 = vadd.f32 %v3646_v40, %v1505_v38  ;;  %v4743_v20 = vld [vmem:[#allocation5 + $0xf8] sm:$0xff]   ;;  %v4745_v21 = vld [vmem:[#allocation5 + $0xf0] sm:$0xff]   ;;  %v4747_v22 = vld [vmem:[#allocation5 + $0xe8] sm:$0xff]  }
 0x305   :  { %v1375_v27 = vpop.f32.mrf.mxu1  ;;  %v1491_v34 = vpop.f32.mrf.mxu0  ;;  %v4744_v38 = vld [vmem:[#allocation2 + $0x378] sm:$0xff]  }
 0x306   :  { %v1506_v29 = vadd.f32 %v4312_v26, %v1384_v24  ;;  %v1376_v30 = vadd.f32 %v1375_v27, %v1278_v16  ;;  %v1515_v31 = vadd.f32 %v3646_v40, %v1503_v23  ;;  %v5166_v39 = vmax.f32 %v1517_v28, 0.0  ;;  %v4748_v23 = vld [vmem:[#allocation2 + $0x368] sm:$0xff]   ;;  %v4749_v24 = vld [vmem:[#allocation5 + $0xe0] sm:$0xff]   ;;  %v4751_v27 = vld [vmem:[#allocation5 + $0xd8] sm:$0xff]  }
 0x307   :  { %v4750_v26 = vld [vmem:[#allocation2 + $0x360] sm:$0xff]   ;;  %v4752_v28 = vld [vmem:[#allocation2 + $0x358] sm:$0xff]  }
 0x308   :  { %v1518_v32 = vadd.f32 %v3646_v40, %v1506_v29  ;;  %v1504_v36 = vadd.f32 %v1491_v34, %v1376_v30  ;;  %v5170_v42 = vmax.f32 %v1515_v31, 0.0  ;;  %v1669_v46 = vrot.slane %v5166_v39, 1  ;;  %v4753_v29 = vld [vmem:[#allocation5 + $0xd0] sm:$0xff]   ;;  %v4755_v31 = vld [vmem:[#allocation5 + $0xc8] sm:$0xff]   ;;  %v4757_v34 = vld [vmem:[#allocation5 + $0xc0] sm:$0xff]  }
 0x309   :  { %v1657_v33 = vrot.slane %v5166_v39, 7  ;;  %v4754_v30 = vld [vmem:[#allocation2 + $0x350] sm:$0xff]  }
 0x30a   :  { %v5168_v41 = vmax.f32 %v1518_v32, 0.0  ;;  %v1516_v43 = vadd.f32 %v3646_v40, %v1504_v36  ;;  %v1655_v47 = vrot.slane %v5170_v42, 7  ;;  %v1667_v51 = vrot.slane %v5170_v42, 1  ;;  %v4746_v40 = vld [vmem:[#allocation2 + $0x370] sm:$0xff]   ;;  %v4756_v32 = vld [vmem:[#allocation2 + $0x348] sm:$0xff]   ;;  %v4758_v36 = vld [vmem:[#allocation2 + $0x340] sm:$0xff]  }
 0x30c   :  { %v1658_v44 = vrot.slane %v5168_v41, 7  ;;  %v5173_v45 = vmax.f32 %v1516_v43, 0.0  ;;  %v1524_v52 = vpack.c.bf16 %v5168_v41, %v5166_v39  ;;  %v1670_v14 = vrot.slane %v5168_v41, 1  ;;  %v5224_v39 = vld [vmem:[#allocation2 + $0x338] sm:$0xff]  }
 0x30d   :  { %v5226_v41 = vld [vmem:[#allocation2 + $0x3b8] sm:$0xff]  }
 0x30e   :  { %v1656_v48 = vrot.slane %v5173_v45, 7  ;;  %v1668_v49 = vrot.slane %v5173_v45, 1  ;;  %v1523_v50 = vpack.c.bf16 %v5173_v45, %v5170_v42  ;;  %v1662_v55 = vsel %vm83_vm1, %v1658_v44, %v1655_v47  ;;  %v3604_v42 = vld [vmem:[%s5489_s4 + $0x1] ss:$0 sm:$0xff] }
 0x30f   :  { %v1671_v15 = vsel %vm100_vm2, %v1669_v46, %v1670_v14  ;;  %v1674_v16 = vsel %vm100_vm2, %v1670_v14, %v1667_v51  ;;  %v1659_v17 = vsel %vm83_vm1, %v1657_v33, %v1658_v44  ;;  %v1131_v43 = vadd.f32 %v3604_v42, %v5153_v4 }
 0x310   :  { %4329 = vmatprep.mubr.bf16.mxu1 %v1523_v50  ;;  %4349 = vmatprep.mubr.bf16.mxu0 %v1523_v50  ;;  %v1661_v54 = vsel %vm83_vm1, %v1655_v47, %v1656_v48  ;;  %v1672_v56 = vsel %vm100_vm2, %v1668_v49, %v1669_v46  ;;  %v1673_v59 = vsel %vm100_vm2, %v1667_v51, %v1668_v49 }
 0x311   :  { %4330 = vmatmul.mubr.bf16.vlgmr.msra.gmra.mxu1 %v1524_v52  ;;  %4350 = vmatmul.mubr.bf16.vlgmr.msra.gmra.mxu0 %v1524_v52  ;;  %v3675_v58 = vpack.c.bf16 %v1661_v54, %v1662_v55  ;;  %v3691_v60 = vpack.c.bf16 %v1672_v56, %v1673_v59  ;;  %v1660_v35 = vsel %vm83_vm1, %v1656_v48, %v1657_v33 }
 0x312   :  { %4354 = vmatpush3.bf16.msra.mxu1 %v5142_v62  ;;  %4374 = vmatpush3.bf16.msra.mxu0 %v5144_v63  ;;  %v4735_v62 = vld [vmem:[#allocation2 + $0x258] sm:$0xff]   ;;  %v3679_v18 = vpack.c.bf16 %v1659_v17, %v1660_v35  ;;  %v3695_v19 = vpack.c.bf16 %v1674_v16, %v1671_v15  ;;  %v1129_v46 = vadd.f32 %v3604_v42, %v5156_v7 }
 0x313   :  { %4369 = vmatprep.mubr.msk.bf16.mxu1 %vm4983_vm4, %v3675_v58  ;;  %4355 = vmatprep.subr.bf16.mxu1 %v4729_v53  ;;  %v4736_v63 = vld [vmem:[#allocation2 + $0x2d8] sm:$0xff]   ;;  %v1132_v49 = vadd.f32 %v3604_v42, %v5159_v10  ;;  %v1130_v52 = vadd.f32 %v3604_v42, %v5161_v13  ;;  %v3698_v10 = vld [vmem:[%s5487_s2 + $0x3] ss:$0 sm:$0xff]  ;;  %v4764_v42 = vld [vmem:[#allocation2 + $0x3a8] sm:$0xff]  }
 0x314   :  { %4389 = vmatprep.mubr.msk.bf16.mxu0 %vm4994_vm6, %v3691_v60  ;;  %4375 = vmatprep.subr.bf16.mxu0 %v4730_v57 }
 0x316   :  { %4356 = vmatpush3.bf16.msra.mxu1 %v4729_v53  ;;  %4376 = vmatpush3.bf16.msra.mxu0 %v4730_v57 }
 0x317   :  { %4357 = vmatprep.subr.bf16.mxu1 %v4731_v61  ;;  %4377 = vmatprep.subr.bf16.mxu0 %v4732_v0 }
 0x31a   :  { %4358 = vmatpush3.bf16.msra.mxu1 %v4731_v61  ;;  %4378 = vmatpush3.bf16.msra.mxu0 %v4732_v0 }
 0x31b   :  { %4359 = vmatprep.subr.bf16.mxu1 %v4733_v1  ;;  %4379 = vmatprep.subr.bf16.mxu0 %v4734_v2 }
 0x31e   :  { %4360 = vmatpush3.bf16.msra.mxu1 %v4733_v1  ;;  %4380 = vmatpush3.bf16.msra.mxu0 %v4734_v2 }
 0x31f   :  { %4361 = vmatprep.subr.bf16.mxu1 %v4735_v62  ;;  %4381 = vmatprep.subr.bf16.mxu0 %v4736_v63 }
 0x322   :  { %4362 = vmatpush3.bf16.msra.mxu1 %v4735_v62  ;;  %4382 = vmatpush3.bf16.msra.mxu0 %v4736_v63 }
 0x323   :  { %4363 = vmatprep.subr.bf16.mxu1 %v4737_v3  ;;  %4383 = vmatprep.subr.bf16.mxu0 %v4738_v5 }
 0x326   :  { %4364 = vmatpush3.bf16.msra.mxu1 %v4737_v3  ;;  %4384 = vmatpush3.bf16.msra.mxu0 %v4738_v5 }
 0x327   :  { %4365 = vmatprep.subr.bf16.mxu1 %v4739_v6  ;;  %4385 = vmatprep.subr.bf16.mxu0 %v4740_v8 }
 0x32a   :  { %4366 = vmatpush3.bf16.msra.mxu1 %v4739_v6  ;;  %4386 = vmatpush3.bf16.msra.mxu0 %v4740_v8 }
 0x32b   :  { %4367 = vmatprep.subr.bf16.mxu1 %v4741_v9  ;;  %4387 = vmatprep.subr.bf16.mxu0 %v4742_v12 }
 0x32e   :  { %4368 = vmatpush3.bf16.msra.mxu1 %v4741_v9  ;;  %4388 = vmatpush3.bf16.msra.mxu0 %v4742_v12 }
 0x32f   :  { %4393 = vmatprep.subr.bf16.mxu1 %v4743_v20  ;;  %4413 = vmatprep.subr.bf16.mxu0 %v4744_v38 }
 0x331   :  { %4370 = vmatmul.mubr.msk.bf16.vlgmr.msra.gmra.mxu1 %vm4983_vm4, %v3679_v18  ;;  %4390 = vmatmul.mubr.msk.bf16.vlgmr.msra.gmra.mxu0 %vm4994_vm6, %v3695_v19 }
 0x332   :  { %4394 = vmatpush3.bf16.msra.mxu1 %v4743_v20  ;;  %4414 = vmatpush3.bf16.msra.mxu0 %v4744_v38 }
 0x333   :  { %4395 = vmatprep.subr.bf16.mxu1 %v4745_v21  ;;  %4415 = vmatprep.subr.bf16.mxu0 %v4746_v40 }
 0x336   :  { %4396 = vmatpush3.bf16.msra.mxu1 %v4745_v21  ;;  %4416 = vmatpush3.bf16.msra.mxu0 %v4746_v40 }
 0x337   :  { %4397 = vmatprep.subr.bf16.mxu1 %v4747_v22  ;;  %4417 = vmatprep.subr.bf16.mxu0 %v4748_v23 }
 0x33a   :  { %4398 = vmatpush3.bf16.msra.mxu1 %v4747_v22  ;;  %4418 = vmatpush3.bf16.msra.mxu0 %v4748_v23 }
 0x33b   :  { %4399 = vmatprep.subr.bf16.mxu1 %v4749_v24  ;;  %4419 = vmatprep.subr.bf16.mxu0 %v4750_v26 }
 0x33e   :  { %4400 = vmatpush3.bf16.msra.mxu1 %v4749_v24  ;;  %4420 = vmatpush3.bf16.msra.mxu0 %v4750_v26  ;;  %v4761_v26 = vld [vmem:[#allocation2 + $0x330] sm:$0xff]  }
 0x33f   :  { %4401 = vmatprep.subr.bf16.mxu1 %v4751_v27  ;;  %4421 = vmatprep.subr.bf16.mxu0 %v4752_v28 }
 0x342   :  { %4402 = vmatpush3.bf16.msra.mxu1 %v4751_v27  ;;  %4422 = vmatpush3.bf16.msra.mxu0 %v4752_v28 }
 0x343   :  { %4403 = vmatprep.subr.bf16.mxu1 %v4753_v29  ;;  %4423 = vmatprep.subr.bf16.mxu0 %v4754_v30 }
 0x346   :  { %4404 = vmatpush3.bf16.msra.mxu1 %v4753_v29  ;;  %4424 = vmatpush3.bf16.msra.mxu0 %v4754_v30  ;;  %v4762_v30 = vld [vmem:[#allocation2 + $0x3b0] sm:$0xff]  }
 0x347   :  { %4405 = vmatprep.subr.bf16.mxu1 %v4755_v31  ;;  %4425 = vmatprep.subr.bf16.mxu0 %v4756_v32 }
 0x34a   :  { %4406 = vmatpush3.bf16.msra.mxu1 %v4755_v31  ;;  %4426 = vmatpush3.bf16.msra.mxu0 %v4756_v32 }
 0x34b   :  { %4407 = vmatprep.subr.bf16.mxu1 %v4757_v34  ;;  %4427 = vmatprep.subr.bf16.mxu0 %v4758_v36 }
 0x34e   :  { %4408 = vmatpush3.bf16.msra.mxu1 %v4757_v34  ;;  %4428 = vmatpush3.bf16.msra.mxu0 %v4758_v36  ;;  %v4763_v36 = vld [vmem:[#allocation2 + $0x328] sm:$0xff]  }
 0x34f   :  { %4433 = vmatprep.subr.bf16.mxu1 %v5224_v39  ;;  %4453 = vmatprep.subr.bf16.mxu0 %v5226_v41 }
 0x3d1   :  { %v4331_v44 = vpop.f32.mrf.mxu1  ;;  %v4351_v55 = vpop.f32.mrf.mxu0 }
 0x3d2   :  { %v5234_v45 = vadd.f32 %v4331_v44, %v1131_v43  ;;  %v4765_v43 = vld [vmem:[#allocation2 + $0x320] sm:$0xff]  }
 0x3d3   :  { %v1624_v47 = vpop.f32.mrf.mxu1  ;;  %v1797_v4 = vpop.f32.mrf.mxu0  ;;  %v4766_v44 = vld [vmem:[#allocation2 + $0x3a0] sm:$0xff]  }
 0x3d4   :  { %v5237_v48 = vadd.f32 %v1624_v47, %v1129_v46  ;;  %v4769_v46 = vld [vmem:[#allocation2 + $0x310] sm:$0xff]  }
 0x3d5   :  { %v4332_v50 = vpop.f32.mrf.mxu1  ;;  %v4352_v56 = vpop.f32.mrf.mxu0  ;;  %v4770_v47 = vld [vmem:[#allocation2 + $0x390] sm:$0xff]  }
 0x3d6   :  { %v5240_v51 = vadd.f32 %v4332_v50, %v1132_v49  ;;  %v4771_v49 = vld [vmem:[#allocation2 + $0x308] sm:$0xff]  }
 0x3d7   :  { %v1627_v53 = vpop.f32.mrf.mxu1  ;;  %v1800_v57 = vpop.f32.mrf.mxu0  ;;  %v4772_v50 = vld [vmem:[#allocation2 + $0x388] sm:$0xff]  }
 0x3d8   :  { %v5243_v54 = vadd.f32 %v1627_v53, %v1130_v52  ;;  %v4773_v52 = vld [vmem:[#allocation2 + $0x300] sm:$0xff]  }
 0x3d9   :  { %v4774_v53 = vld [vmem:[#allocation2 + $0x380] sm:$0xff]  }
 0x3f1   :  { %v4371_v58 = vpop.f32.mrf.mxu1  ;;  %v4391_v59 = vpop.f32.mrf.mxu0 }
 0x3f2   :  { %v1903_v7 = vadd.f32 %v4371_v58, %v4351_v55 }
 0x3f3   :  { %v1894_v60 = vpop.f32.mrf.mxu1  ;;  %v2010_v61 = vpop.f32.mrf.mxu0 }
 0x3f4   :  { %v2027_v0 = vadd.f32 %v4391_v59, %v1903_v7  ;;  %v1895_v1 = vadd.f32 %v1894_v60, %v1797_v4 }
 0x3f5   :  { %v4372_v2 = vpop.f32.mrf.mxu1  ;;  %v4392_v63 = vpop.f32.mrf.mxu0 }
 0x3f6   :  { %v2025_v13 = vadd.f32 %v2010_v61, %v1895_v1  ;;  %v1906_v62 = vadd.f32 %v4372_v2, %v4352_v56  ;;  %v2039_v5 = vadd.f32 %v3698_v10, %v2027_v0  ;;  %v4775_v61 = vld [vmem:[#allocation5 + $0x138] sm:$0xff]   ;;  %v4777_v1 = vld [vmem:[#allocation5 + $0x130] sm:$0xff]   ;;  %v4779_v2 = vld [vmem:[#allocation5 + $0x128] sm:$0xff]  }
 0x3f7   :  { %v1897_v3 = vpop.f32.mrf.mxu1  ;;  %v2013_v14 = vpop.f32.mrf.mxu0  ;;  %v4776_v0 = vld [vmem:[#allocation2 + $0x438] sm:$0xff]  }
 0x3f8   :  { %v2028_v6 = vadd.f32 %v4392_v63, %v1906_v62  ;;  %v1898_v8 = vadd.f32 %v1897_v3, %v1800_v57  ;;  %v2037_v9 = vadd.f32 %v3698_v10, %v2025_v13  ;;  %v5248_v15 = vmax.f32 %v2039_v5, 0.0  ;;  %v4780_v13 = vld [vmem:[#allocation2 + $0x428] sm:$0xff]   ;;  %v4781_v62 = vld [vmem:[#allocation5 + $0x120] sm:$0xff]   ;;  %v4783_v3 = vld [vmem:[#allocation5 + $0x118] sm:$0xff]  }
 0x3f9   :  { %v4782_v63 = vld [vmem:[#allocation2 + $0x420] sm:$0xff]   ;;  %v4784_v5 = vld [vmem:[#allocation2 + $0x418] sm:$0xff]  }
 0x3fa   :  { %v2040_v12 = vadd.f32 %v3698_v10, %v2028_v6  ;;  %v2026_v33 = vadd.f32 %v2013_v14, %v1898_v8  ;;  %v5252_v35 = vmax.f32 %v2037_v9, 0.0  ;;  %v2191_v20 = vrot.slane %v5248_v15, 1  ;;  %v4785_v6 = vld [vmem:[#allocation5 + $0x110] sm:$0xff]   ;;  %v4787_v9 = vld [vmem:[#allocation5 + $0x108] sm:$0xff]   ;;  %v4789_v14 = vld [vmem:[#allocation5 + $0x100] sm:$0xff]  }
 0x3fb   :  { %v2179_v4 = vrot.slane %v5248_v15, 7  ;;  %v4786_v8 = vld [vmem:[#allocation2 + $0x410] sm:$0xff]  }
 0x3fc   :  { %v5250_v16 = vmax.f32 %v2040_v12, 0.0  ;;  %v2038_v17 = vadd.f32 %v3698_v10, %v2026_v33  ;;  %v2177_v38 = vrot.slane %v5252_v35, 7  ;;  %v2189_v23 = vrot.slane %v5252_v35, 1  ;;  %v4778_v10 = vld [vmem:[#allocation2 + $0x430] sm:$0xff]   ;;  %v4788_v12 = vld [vmem:[#allocation2 + $0x408] sm:$0xff]   ;;  %v4790_v33 = vld [vmem:[#allocation2 + $0x400] sm:$0xff]  }
 0x3fe   :  { %v2180_v18 = vrot.slane %v5250_v16, 7  ;;  %v5255_v19 = vmax.f32 %v2038_v17, 0.0  ;;  %v2046_v24 = vpack.c.bf16 %v5250_v16, %v5248_v15  ;;  %v2192_v55 = vrot.slane %v5250_v16, 1  ;;  %v5306_v15 = vld [vmem:[#allocation2 + $0x3f8] sm:$0xff]  }
 0x3ff   :  { %v5308_v16 = vld [vmem:[#allocation2 + $0x478] sm:$0xff]  }
 0x400   :  { %v2178_v21 = vrot.slane %v5255_v19, 7  ;;  %v2190_v40 = vrot.slane %v5255_v19, 1  ;;  %v2045_v22 = vpack.c.bf16 %v5255_v19, %v5252_v35  ;;  %v2184_v28 = vsel %vm83_vm1, %v2180_v18, %v2177_v38  ;;  %v3656_v35 = vld [vmem:[%s5489_s4 + $0x2] ss:$0 sm:$0xff] }
 0x401   :  { %v2193_v56 = vsel %vm100_vm2, %v2191_v20, %v2192_v55  ;;  %v2196_v57 = vsel %vm100_vm2, %v2192_v55, %v2189_v23  ;;  %v2181_v59 = vsel %vm83_vm1, %v2179_v4, %v2180_v18  ;;  %v1653_v17 = vadd.f32 %v3656_v35, %v5234_v45 }
 0x402   :  { %4409 = vmatprep.mubr.bf16.mxu1 %v2045_v22  ;;  %4429 = vmatprep.mubr.bf16.mxu0 %v2045_v22  ;;  %v2183_v27 = vsel %vm83_vm1, %v2177_v38, %v2178_v21  ;;  %v2194_v29 = vsel %vm100_vm2, %v2190_v40, %v2191_v20  ;;  %v2195_v32 = vsel %vm100_vm2, %v2189_v23, %v2190_v40 }
 0x403   :  { %4410 = vmatmul.mubr.bf16.vlgmr.msra.gmra.mxu1 %v2046_v24  ;;  %4430 = vmatmul.mubr.bf16.vlgmr.msra.gmra.mxu0 %v2046_v24  ;;  %v3727_v31 = vpack.c.bf16 %v2183_v27, %v2184_v28  ;;  %v3743_v34 = vpack.c.bf16 %v2194_v29, %v2195_v32  ;;  %v2182_v58 = vsel %vm83_vm1, %v2178_v21, %v2179_v4 }
 0x404   :  { %4434 = vmatpush3.bf16.msra.mxu1 %v5224_v39  ;;  %4454 = vmatpush3.bf16.msra.mxu0 %v5226_v41  ;;  %v4767_v39 = vld [vmem:[#allocation2 + $0x318] sm:$0xff]   ;;  %v3731_v7 = vpack.c.bf16 %v2181_v59, %v2182_v58  ;;  %v3747_v60 = vpack.c.bf16 %v2196_v57, %v2193_v56  ;;  %v1651_v20 = vadd.f32 %v3656_v35, %v5237_v48 }
 0x405   :  { %4449 = vmatprep.mubr.msk.bf16.mxu1 %vm4983_vm4, %v3727_v31  ;;  %4435 = vmatprep.subr.bf16.mxu1 %v4761_v26  ;;  %v4768_v41 = vld [vmem:[#allocation2 + $0x398] sm:$0xff]   ;;  %v1654_v40 = vadd.f32 %v3656_v35, %v5240_v51  ;;  %v1652_v24 = vadd.f32 %v3656_v35, %v5243_v54  ;;  %v3750_v51 = vld [vmem:[%s5487_s2 + $0x4] ss:$0 sm:$0xff]  ;;  %v4796_v35 = vld [vmem:[#allocation2 + $0x468] sm:$0xff]  }
 0x406   :  { %4469 = vmatprep.mubr.msk.bf16.mxu0 %vm4994_vm6, %v3743_v34  ;;  %4455 = vmatprep.subr.bf16.mxu0 %v4762_v30 }
 0x408   :  { %4436 = vmatpush3.bf16.msra.mxu1 %v4761_v26  ;;  %4456 = vmatpush3.bf16.msra.mxu0 %v4762_v30 }
 0x409   :  { %4437 = vmatprep.subr.bf16.mxu1 %v4763_v36  ;;  %4457 = vmatprep.subr.bf16.mxu0 %v4764_v42 }
 0x40c   :  { %4438 = vmatpush3.bf16.msra.mxu1 %v4763_v36  ;;  %4458 = vmatpush3.bf16.msra.mxu0 %v4764_v42 }
 0x40d   :  { %4439 = vmatprep.subr.bf16.mxu1 %v4765_v43  ;;  %4459 = vmatprep.subr.bf16.mxu0 %v4766_v44 }
 0x410   :  { %4440 = vmatpush3.bf16.msra.mxu1 %v4765_v43  ;;  %4460 = vmatpush3.bf16.msra.mxu0 %v4766_v44 }
 0x411   :  { %4441 = vmatprep.subr.bf16.mxu1 %v4767_v39  ;;  %4461 = vmatprep.subr.bf16.mxu0 %v4768_v41 }
 0x414   :  { %4442 = vmatpush3.bf16.msra.mxu1 %v4767_v39  ;;  %4462 = vmatpush3.bf16.msra.mxu0 %v4768_v41 }
 0x415   :  { %4443 = vmatprep.subr.bf16.mxu1 %v4769_v46  ;;  %4463 = vmatprep.subr.bf16.mxu0 %v4770_v47 }
 0x418   :  { %4444 = vmatpush3.bf16.msra.mxu1 %v4769_v46  ;;  %4464 = vmatpush3.bf16.msra.mxu0 %v4770_v47 }
 0x419   :  { %4445 = vmatprep.subr.bf16.mxu1 %v4771_v49  ;;  %4465 = vmatprep.subr.bf16.mxu0 %v4772_v50 }
 0x41c   :  { %4446 = vmatpush3.bf16.msra.mxu1 %v4771_v49  ;;  %4466 = vmatpush3.bf16.msra.mxu0 %v4772_v50 }
 0x41d   :  { %4447 = vmatprep.subr.bf16.mxu1 %v4773_v52  ;;  %4467 = vmatprep.subr.bf16.mxu0 %v4774_v53 }
 0x420   :  { %4448 = vmatpush3.bf16.msra.mxu1 %v4773_v52  ;;  %4468 = vmatpush3.bf16.msra.mxu0 %v4774_v53 }
 0x421   :  { %4473 = vmatprep.subr.bf16.mxu1 %v4775_v61  ;;  %4493 = vmatprep.subr.bf16.mxu0 %v4776_v0 }
 0x423   :  { %4450 = vmatmul.mubr.msk.bf16.vlgmr.msra.gmra.mxu1 %vm4983_vm4, %v3731_v7  ;;  %4470 = vmatmul.mubr.msk.bf16.vlgmr.msra.gmra.mxu0 %vm4994_vm6, %v3747_v60 }
 0x424   :  { %4474 = vmatpush3.bf16.msra.mxu1 %v4775_v61  ;;  %4494 = vmatpush3.bf16.msra.mxu0 %v4776_v0 }
 0x425   :  { %4475 = vmatprep.subr.bf16.mxu1 %v4777_v1  ;;  %4495 = vmatprep.subr.bf16.mxu0 %v4778_v10 }
 0x428   :  { %4476 = vmatpush3.bf16.msra.mxu1 %v4777_v1  ;;  %4496 = vmatpush3.bf16.msra.mxu0 %v4778_v10 }
 0x429   :  { %4477 = vmatprep.subr.bf16.mxu1 %v4779_v2  ;;  %4497 = vmatprep.subr.bf16.mxu0 %v4780_v13 }
 0x42c   :  { %4478 = vmatpush3.bf16.msra.mxu1 %v4779_v2  ;;  %4498 = vmatpush3.bf16.msra.mxu0 %v4780_v13 }
 0x42d   :  { %4479 = vmatprep.subr.bf16.mxu1 %v4781_v62  ;;  %4499 = vmatprep.subr.bf16.mxu0 %v4782_v63 }
 0x430   :  { %4480 = vmatpush3.bf16.msra.mxu1 %v4781_v62  ;;  %4500 = vmatpush3.bf16.msra.mxu0 %v4782_v63  ;;  %v4793_v63 = vld [vmem:[#allocation2 + $0x3f0] sm:$0xff]  }
 0x431   :  { %4481 = vmatprep.subr.bf16.mxu1 %v4783_v3  ;;  %4501 = vmatprep.subr.bf16.mxu0 %v4784_v5 }
 0x434   :  { %4482 = vmatpush3.bf16.msra.mxu1 %v4783_v3  ;;  %4502 = vmatpush3.bf16.msra.mxu0 %v4784_v5 }
 0x435   :  { %4483 = vmatprep.subr.bf16.mxu1 %v4785_v6  ;;  %4503 = vmatprep.subr.bf16.mxu0 %v4786_v8 }
 0x438   :  { %4484 = vmatpush3.bf16.msra.mxu1 %v4785_v6  ;;  %4504 = vmatpush3.bf16.msra.mxu0 %v4786_v8  ;;  %v4794_v8 = vld [vmem:[#allocation2 + $0x470] sm:$0xff]  }
 0x439   :  { %4485 = vmatprep.subr.bf16.mxu1 %v4787_v9  ;;  %4505 = vmatprep.subr.bf16.mxu0 %v4788_v12 }
 0x43c   :  { %4486 = vmatpush3.bf16.msra.mxu1 %v4787_v9  ;;  %4506 = vmatpush3.bf16.msra.mxu0 %v4788_v12 }
 0x43d   :  { %4487 = vmatprep.subr.bf16.mxu1 %v4789_v14  ;;  %4507 = vmatprep.subr.bf16.mxu0 %v4790_v33 }
 0x440   :  { %4488 = vmatpush3.bf16.msra.mxu1 %v4789_v14  ;;  %4508 = vmatpush3.bf16.msra.mxu0 %v4790_v33  ;;  %v4795_v33 = vld [vmem:[#allocation2 + $0x3e8] sm:$0xff]  }
 0x441   :  { %4513 = vmatprep.subr.bf16.mxu1 %v5306_v15  ;;  %4533 = vmatprep.subr.bf16.mxu0 %v5308_v16 }
 0x4c3   :  { %v4411_v18 = vpop.f32.mrf.mxu1  ;;  %v4431_v28 = vpop.f32.mrf.mxu0 }
 0x4c4   :  { %v5316_v19 = vadd.f32 %v4411_v18, %v1653_v17  ;;  %v4797_v17 = vld [vmem:[#allocation2 + $0x3e0] sm:$0xff]  }
 0x4c5   :  { %v2146_v38 = vpop.f32.mrf.mxu1  ;;  %v2319_v45 = vpop.f32.mrf.mxu0  ;;  %v4798_v18 = vld [vmem:[#allocation2 + $0x460] sm:$0xff]  }
 0x4c6   :  { %v5319_v21 = vadd.f32 %v2146_v38, %v1651_v20  ;;  %v4801_v20 = vld [vmem:[#allocation2 + $0x3d0] sm:$0xff]  }
 0x4c7   :  { %v4412_v22 = vpop.f32.mrf.mxu1  ;;  %v4432_v29 = vpop.f32.mrf.mxu0  ;;  %v4802_v38 = vld [vmem:[#allocation2 + $0x450] sm:$0xff]  }
 0x4c8   :  { %v5322_v23 = vadd.f32 %v4412_v22, %v1654_v40  ;;  %v4803_v40 = vld [vmem:[#allocation2 + $0x3c8] sm:$0xff]  }
 0x4c9   :  { %v2149_v26 = vpop.f32.mrf.mxu1  ;;  %v2322_v30 = vpop.f32.mrf.mxu0  ;;  %v4804_v22 = vld [vmem:[#allocation2 + $0x448] sm:$0xff]  }
 0x4ca   :  { %v5325_v27 = vadd.f32 %v2149_v26, %v1652_v24  ;;  %v4805_v24 = vld [vmem:[#allocation2 + $0x3c0] sm:$0xff]  }
 0x4cb   :  { %v4806_v26 = vld [vmem:[#allocation2 + $0x440] sm:$0xff]  }
 0x4e3   :  { %v4451_v31 = vpop.f32.mrf.mxu1  ;;  %v4471_v32 = vpop.f32.mrf.mxu0 }
 0x4e4   :  { %v2425_v48 = vadd.f32 %v4451_v31, %v4431_v28 }
 0x4e5   :  { %v2416_v34 = vpop.f32.mrf.mxu1  ;;  %v2532_v36 = vpop.f32.mrf.mxu0 }
 0x4e6   :  { %v2549_v42 = vadd.f32 %v4471_v32, %v2425_v48  ;;  %v2417_v43 = vadd.f32 %v2416_v34, %v2319_v45 }
 0x4e7   :  { %v4452_v44 = vpop.f32.mrf.mxu1  ;;  %v4472_v41 = vpop.f32.mrf.mxu0 }
 0x4e8   :  { %v2547_v54 = vadd.f32 %v2532_v36, %v2417_v43  ;;  %v2428_v39 = vadd.f32 %v4452_v44, %v4432_v29  ;;  %v2561_v47 = vadd.f32 %v3750_v51, %v2549_v42  ;;  %v4807_v36 = vld [vmem:[#allocation5 + $0x178] sm:$0xff]   ;;  %v4809_v43 = vld [vmem:[#allocation5 + $0x170] sm:$0xff]   ;;  %v4814_v44 = vld [vmem:[%s5490_s5 + $0x20] sm:$0xff]  }
 0x4e9   :  { %v2419_v46 = vpop.f32.mrf.mxu1  ;;  %v2535_v55 = vpop.f32.mrf.mxu0  ;;  %v4808_v42 = vld [vmem:[%s5490_s5 + $0x38] sm:$0xff]  }
 0x4ea   :  { %v2550_v49 = vadd.f32 %v4472_v41, %v2428_v39  ;;  %v2420_v50 = vadd.f32 %v2419_v46, %v2322_v30  ;;  %v2559_v52 = vadd.f32 %v3750_v51, %v2547_v54  ;;  %v5330_v56 = vmax.f32 %v2561_v47, 0.0  ;;  %v4815_v54 = vld [vmem:[#allocation5 + $0x158] sm:$0xff]   ;;  %v4817_v41 = vld [vmem:[#allocation5 + $0x150] sm:$0xff]   ;;  %v4819_v47 = vld [vmem:[#allocation5 + $0x148] sm:$0xff]  }
 0x4eb   :  { %v4816_v39 = vld [vmem:[%s5490_s5 + $0x18] sm:$0xff]   ;;  %v4818_v46 = vld [vmem:[%s5490_s5 + $0x10] sm:$0xff]  }
 0x4ec   :  { %v2562_v53 = vadd.f32 %v3750_v51, %v2550_v49  ;;  %v2548_v4 = vadd.f32 %v2535_v55, %v2420_v50  ;;  %v5334_v58 = vmax.f32 %v2559_v52, 0.0  ;;  %v2713_v61 = vrot.slane %v5330_v56, 1  ;;  %v4820_v49 = vld [vmem:[%s5490_s5 + $0x8] sm:$0xff]   ;;  %v4821_v50 = vld [vmem:[#allocation5 + $0x140] sm:$0xff]  }
 0x4ed   :  { %v2701_v45 = vrot.slane %v5330_v56, 7  ;;  %v4822_v52 = vld [vmem:[%s5490_s5] sm:$0xff]  }
 0x4ee   :  { %v5332_v57 = vmax.f32 %v2562_v53, 0.0  ;;  %v2560_v59 = vadd.f32 %v3750_v51, %v2548_v4  ;;  %v2699_v0 = vrot.slane %v5334_v58, 7  ;;  %v2711_v13 = vrot.slane %v5334_v58, 1  ;;  %v4813_v51 = vld [vmem:[#allocation5 + $0x160] sm:$0xff]   ;;  %v4823_v53 = vld [vmem:[%s5492_s7 + $0x38] sm:$0xff]  }
 0x4ef   :  { %v3708_v55 = vld [vmem:[%s5489_s4 + $0x3] ss:$0 sm:$0xff] }
 0x4f0   :  { %v2702_v7 = vrot.slane %v5332_v57, 7  ;;  %v5337_v60 = vmax.f32 %v2560_v59, 0.0  ;;  %v2568_v62 = vpack.c.bf16 %v5332_v57, %v5330_v56  ;;  %v2714_v28 = vrot.slane %v5332_v57, 1 }
 0x4f1   :  { %v2175_v4 = vadd.f32 %v3708_v55, %v5316_v19 }
 0x4f2   :  { %v2700_v1 = vrot.slane %v5337_v60, 7  ;;  %v2712_v10 = vrot.slane %v5337_v60, 1  ;;  %v2567_v2 = vpack.c.bf16 %v5337_v60, %v5334_v58  ;;  %v2706_v5 = vsel %vm83_vm1, %v2702_v7, %v2699_v0 }
 0x4f3   :  { %v2715_v29 = vsel %vm100_vm2, %v2713_v61, %v2714_v28  ;;  %v2718_v30 = vsel %vm100_vm2, %v2714_v28, %v2711_v13  ;;  %v2703_v32 = vsel %vm83_vm1, %v2701_v45, %v2702_v7  ;;  %v2173_v58 = vadd.f32 %v3708_v55, %v5319_v21 }
 0x4f4   :  { %4489 = vmatprep.mubr.bf16.mxu1 %v2567_v2  ;;  %4509 = vmatprep.mubr.bf16.mxu0 %v2567_v2  ;;  %v2705_v3 = vsel %vm83_vm1, %v2699_v0, %v2700_v1  ;;  %v2716_v6 = vsel %vm100_vm2, %v2712_v10, %v2713_v61  ;;  %v2717_v12 = vsel %vm100_vm2, %v2711_v13, %v2712_v10 }
 0x4f5   :  { %4490 = vmatmul.mubr.bf16.vlgmr.msra.gmra.mxu1 %v2568_v62  ;;  %4510 = vmatmul.mubr.bf16.vlgmr.msra.gmra.mxu0 %v2568_v62  ;;  %v3779_v9 = vpack.c.bf16 %v2705_v3, %v2706_v5  ;;  %v3795_v14 = vpack.c.bf16 %v2716_v6, %v2717_v12  ;;  %v2704_v31 = vsel %vm83_vm1, %v2700_v1, %v2701_v45 }
 0x4f6   :  { %4514 = vmatpush3.bf16.msra.mxu1 %v5306_v15  ;;  %4534 = vmatpush3.bf16.msra.mxu0 %v5308_v16  ;;  %v4799_v15 = vld [vmem:[#allocation2 + $0x3d8] sm:$0xff]   ;;  %v3783_v48 = vpack.c.bf16 %v2703_v32, %v2704_v31  ;;  %v3799_v34 = vpack.c.bf16 %v2718_v30, %v2715_v29  ;;  %v2176_v60 = vadd.f32 %v3708_v55, %v5322_v23  ;;  %v4824_v32 = vld [vmem:[%s5492_s7 + $0x30] sm:$0xff]  }
 0x4f7   :  { %4529 = vmatprep.mubr.msk.bf16.mxu1 %vm4983_vm4, %v3779_v9  ;;  %4515 = vmatprep.subr.bf16.mxu1 %v4793_v63  ;;  %v4800_v16 = vld [vmem:[#allocation2 + $0x458] sm:$0xff]   ;;  %v2174_v1 = vadd.f32 %v3708_v55, %v5325_v27  ;;  %v3802_v27 = vld [vmem:[%s5487_s2 + $0x5] ss:$0 sm:$0xff] }
 0x4f8   :  { %4549 = vmatprep.mubr.msk.bf16.mxu0 %vm4994_vm6, %v3795_v14  ;;  %4535 = vmatprep.subr.bf16.mxu0 %v4794_v8 }
 0x4fa   :  { %4516 = vmatpush3.bf16.msra.mxu1 %v4793_v63  ;;  %4536 = vmatpush3.bf16.msra.mxu0 %v4794_v8 }
 0x4fb   :  { %4517 = vmatprep.subr.bf16.mxu1 %v4795_v33  ;;  %4537 = vmatprep.subr.bf16.mxu0 %v4796_v35 }
 0x4fe   :  { %4518 = vmatpush3.bf16.msra.mxu1 %v4795_v33  ;;  %4538 = vmatpush3.bf16.msra.mxu0 %v4796_v35 }
 0x4ff   :  { %4519 = vmatprep.subr.bf16.mxu1 %v4797_v17  ;;  %4539 = vmatprep.subr.bf16.mxu0 %v4798_v18 }
 0x502   :  { %4520 = vmatpush3.bf16.msra.mxu1 %v4797_v17  ;;  %4540 = vmatpush3.bf16.msra.mxu0 %v4798_v18 }
 0x503   :  { %4521 = vmatprep.subr.bf16.mxu1 %v4799_v15  ;;  %4541 = vmatprep.subr.bf16.mxu0 %v4800_v16 }
 0x506   :  { %4522 = vmatpush3.bf16.msra.mxu1 %v4799_v15  ;;  %4542 = vmatpush3.bf16.msra.mxu0 %v4800_v16 }
 0x507   :  { %4523 = vmatprep.subr.bf16.mxu1 %v4801_v20  ;;  %4543 = vmatprep.subr.bf16.mxu0 %v4802_v38 }
 0x50a   :  { %4524 = vmatpush3.bf16.msra.mxu1 %v4801_v20  ;;  %4544 = vmatpush3.bf16.msra.mxu0 %v4802_v38 }
 0x50b   :  { %4525 = vmatprep.subr.bf16.mxu1 %v4803_v40  ;;  %4545 = vmatprep.subr.bf16.mxu0 %v4804_v22 }
 0x50e   :  { %4526 = vmatpush3.bf16.msra.mxu1 %v4803_v40  ;;  %4546 = vmatpush3.bf16.msra.mxu0 %v4804_v22 }
 0x50f   :  { %4527 = vmatprep.subr.bf16.mxu1 %v4805_v24  ;;  %4547 = vmatprep.subr.bf16.mxu0 %v4806_v26 }
 0x512   :  { %4528 = vmatpush3.bf16.msra.mxu1 %v4805_v24  ;;  %4548 = vmatpush3.bf16.msra.mxu0 %v4806_v26 }
 0x513   :  { %4553 = vmatprep.subr.bf16.mxu1 %v4807_v36  ;;  %4573 = vmatprep.subr.bf16.mxu0 %v4808_v42 }
 0x515   :  { %4530 = vmatmul.mubr.msk.bf16.vlgmr.msra.gmra.mxu1 %vm4983_vm4, %v3783_v48  ;;  %4550 = vmatmul.mubr.msk.bf16.vlgmr.msra.gmra.mxu0 %vm4994_vm6, %v3799_v34  ;;  %v4825_v48 = vld [vmem:[%s5492_s7 + $0x28] sm:$0xff]   ;;  %v4826_v34 = vld [vmem:[%s5492_s7 + $0x20] sm:$0xff]  }
 0x516   :  { %4554 = vmatpush3.bf16.msra.mxu1 %v4807_v36  ;;  %4574 = vmatpush3.bf16.msra.mxu0 %v4808_v42  ;;  %v4827_v36 = vld [vmem:[%s5492_s7 + $0x18] sm:$0xff]   ;;  %v4828_v42 = vld [vmem:[%s5492_s7 + $0x10] sm:$0xff]  }
 0x517   :  { %4555 = vmatprep.subr.bf16.mxu1 %v4809_v43  ;;  %4575 = vmatprep.subr.bf16.mxu0 %v4810_v11 }
 0x51a   :  { %4556 = vmatpush3.bf16.msra.mxu1 %v4809_v43  ;;  %4576 = vmatpush3.bf16.msra.mxu0 %v4810_v11  ;;  %v4829_v43 = vld [vmem:[%s5492_s7 + $0x8] sm:$0xff]   ;;  %v4830_v11 = vld [vmem:[%s5492_s7] sm:$0xff]   ;;  %s4904_s7 = smov [#allocation7]  }
 0x51b   :  { %4557 = vmatprep.subr.bf16.mxu1 %v4811_v25  ;;  %4577 = vmatprep.subr.bf16.mxu0 %v4812_v37  ;;  %s3484_s12 = sshll.u32 %s4904_s7, 4  ;;  %s3485_s12 = int_to_ptr.vmem [resolvable:$true] %s3484_s12 }
 0x51c   :  { %p4878_p11 = scmp.lt.s32.totalorder %s3485_s12, %s3485_s12 }
 0x51e   :  { %4558 = vmatpush3.bf16.msra.mxu1 %v4811_v25  ;;  %4578 = vmatpush3.bf16.msra.mxu0 %v4812_v37  ;;  %v3813_v25 = vld [vmem:[%s5491_s6] ss:$0 sm:$0xff]  ;;  %s4873_s6 = scalar_lea.vmem %s3485_s12, 512 }
 0x51f   :  { %4559 = vmatprep.subr.bf16.mxu1 %v4813_v51  ;;  %4579 = vmatprep.subr.bf16.mxu0 %v4814_v44  ;;  %p4874_p10 = scmp.ne.s32.totalorder %s3485_s12, %s4873_s6  ;;  %p4879_p12 = scmp.lt.s32.totalorder %s4873_s6, %s4873_s6 }
 0x521   :  { %p4880_p13 = por %p4879_p12, %p4878_p11 }
 0x522   :  { %4560 = vmatpush3.bf16.msra.mxu1 %v4813_v51  ;;  %4580 = vmatpush3.bf16.msra.mxu0 %v4814_v44 }
 0x523   :  { %4561 = vmatprep.subr.bf16.mxu1 %v4815_v54  ;;  %4581 = vmatprep.subr.bf16.mxu0 %v4816_v39  ;;  %p4881_p0 = pnand %p4880_p13, %p4874_p10 }
 0x526   :  { %4562 = vmatpush3.bf16.msra.mxu1 %v4815_v54  ;;  %4582 = vmatpush3.bf16.msra.mxu0 %v4816_v39 }
 0x527   :  { %4563 = vmatprep.subr.bf16.mxu1 %v4817_v41  ;;  %4583 = vmatprep.subr.bf16.mxu0 %v4818_v46 }
 0x52a   :  { %4564 = vmatpush3.bf16.msra.mxu1 %v4817_v41  ;;  %4584 = vmatpush3.bf16.msra.mxu0 %v4818_v46 }
 0x52b   :  { %4565 = vmatprep.subr.bf16.mxu1 %v4819_v47  ;;  %4585 = vmatprep.subr.bf16.mxu0 %v4820_v49 }
 0x52e   :  { %4566 = vmatpush3.bf16.msra.mxu1 %v4819_v47  ;;  %4586 = vmatpush3.bf16.msra.mxu0 %v4820_v49 }
 0x52f   :  { %4567 = vmatprep.subr.bf16.mxu1 %v4821_v50  ;;  %4587 = vmatprep.subr.bf16.mxu0 %v4822_v52 }
 0x532   :  { %4568 = vmatpush3.bf16.msra.mxu1 %v4821_v50  ;;  %4588 = vmatpush3.bf16.msra.mxu0 %v4822_v52 }
 0x533   :  { %4593 = vmatprep.subr.bf16.mxu1 %v4823_v53 }
 0x5b5   :  { %v4491_v56 = vpop.f32.mrf.mxu1  ;;  %v4511_v13 = vpop.f32.mrf.mxu0 }
 0x5b6   :  { %v5419_v57 = vadd.f32 %v4491_v56, %v2175_v4 }
 0x5b7   :  { %v2668_v59 = vpop.f32.mrf.mxu1  ;;  %v2841_v19 = vpop.f32.mrf.mxu0 }
 0x5b8   :  { %v5422_v7 = vadd.f32 %v2668_v59, %v2173_v58 }
 0x5b9   :  { %v4492_v61 = vpop.f32.mrf.mxu1  ;;  %v4512_v62 = vpop.f32.mrf.mxu0 }
 0x5ba   :  { %v5425_v0 = vadd.f32 %v4492_v61, %v2176_v60 }
 0x5bb   :  { %v2671_v10 = vpop.f32.mrf.mxu1  ;;  %v2844_v63 = vpop.f32.mrf.mxu0 }
 0x5bc   :  { %v5428_v2 = vadd.f32 %v2671_v10, %v2174_v1 }
 0x5d5   :  { %v4531_v3 = vpop.f32.mrf.mxu1  ;;  %v4551_v5 = vpop.f32.mrf.mxu0 }
 0x5d6   :  { %v2947_v21 = vadd.f32 %v4531_v3, %v4511_v13 }
 0x5d7   :  { %v2938_v6 = vpop.f32.mrf.mxu1  ;;  %v3054_v8 = vpop.f32.mrf.mxu0 }
 0x5d8   :  { %v2939_v9 = vadd.f32 %v2938_v6, %v2841_v19  ;;  %v3071_v35 = vadd.f32 %v4551_v5, %v2947_v21 }
 0x5d9   :  { %v4532_v12 = vpop.f32.mrf.mxu1  ;;  %v4552_v23 = vpop.f32.mrf.mxu0 }
 0x5da   :  { %v3069_v14 = vadd.f32 %v3054_v8, %v2939_v9  ;;  %v2950_v33 = vadd.f32 %v4532_v12, %v4512_v62  ;;  %v3083_v22 = vadd.f32 %v3802_v27, %v3071_v35 }
 0x5db   :  { %v2941_v17 = vpop.f32.mrf.mxu1  ;;  %v3057_v16 = vpop.f32.mrf.mxu0 }
 0x5dc   :  { %v3072_v18 = vadd.f32 %v4552_v23, %v2950_v33  ;;  %v2942_v15 = vadd.f32 %v2941_v17, %v2844_v63  ;;  %v3081_v20 = vadd.f32 %v3802_v27, %v3069_v14  ;;  %v3087_v29 = vmax.f32 %v3083_v22, 0.0 }
 0x5de   :  { %v3084_v38 = vadd.f32 %v3802_v27, %v3072_v18  ;;  %v3070_v40 = vadd.f32 %v3057_v16, %v2942_v15  ;;  %v3085_v28 = vmax.f32 %v3081_v20, 0.0 }
 0x5e0   :  { %v3082_v24 = vadd.f32 %v3802_v27, %v3070_v40  ;;  %v3088_v26 = vmax.f32 %v3084_v38, 0.0 }
 0x5e2   :  { %v3086_v45 = vmax.f32 %v3082_v24, 0.0  ;;  %v3090_v31 = vpack.c.bf16 %v3088_v26, %v3087_v29 }
 0x5e4   :  { %v3089_v30 = vpack.c.bf16 %v3086_v45, %v3085_v28 }
 0x5e6   :  { %4569 = vmatprep.mubr.bf16.mxu1 %v3089_v30  ;;  %4589 = vmatprep.mubr.bf16.mxu0 %v3089_v30 }
 0x5e7   :  { %4570 = vmatmul.mubr.bf16.vlgmr.msra.gmra.mxu1 %v3090_v31  ;;  %4590 = vmatmul.mubr.bf16.vlgmr.msra.gmra.mxu0 %v3090_v31 }
 0x5e8   :  { %4594 = vmatpush3.bf16.msra.mxu1 %v4823_v53 }
 0x5e9   :  { %4595 = vmatprep.subr.bf16.mxu1 %v4824_v32 }
 0x5ec   :  { %4596 = vmatpush3.bf16.msra.mxu1 %v4824_v32 }
 0x5ed   :  { %4597 = vmatprep.subr.bf16.mxu1 %v4825_v48 }
 0x5f0   :  { %4598 = vmatpush3.bf16.msra.mxu1 %v4825_v48 }
 0x5f1   :  { %4599 = vmatprep.subr.bf16.mxu1 %v4826_v34 }
 0x5f4   :  { %4600 = vmatpush3.bf16.msra.mxu1 %v4826_v34 }
 0x5f5   :  { %4601 = vmatprep.subr.bf16.mxu1 %v4827_v36 }
 0x5f8   :  { %4602 = vmatpush3.bf16.msra.mxu1 %v4827_v36 }
 0x5f9   :  { %4603 = vmatprep.subr.bf16.mxu1 %v4828_v42 }
 0x5fc   :  { %4604 = vmatpush3.bf16.msra.mxu1 %v4828_v42 }
 0x5fd   :  { %4605 = vmatprep.subr.bf16.mxu1 %v4829_v43 }
 0x600   :  { %4606 = vmatpush3.bf16.msra.mxu1 %v4829_v43 }
 0x601   :  { %4607 = vmatprep.subr.bf16.mxu1 %v4830_v11 }
 0x604   :  { %4608 = vmatpush3.bf16.msra.mxu1 %v4830_v11 }
 0x6a7   :  { %v4591_v37 = vpop.f32.mrf.mxu0 }
 0x6a8   :  { %v3335_v51 = vadd.f32 %v4591_v37, %v3813_v25 }
 0x6a9   :  { %v3326_v44 = vpop.f32.mrf.mxu0 }
 0x6aa   :  { %3343 = vst [vmem:[#allocation7 + $0x10] sm:$0xff] %v3335_v51  ;;  %v3327_v54 = vadd.f32 %v3813_v25, %v3326_v44 }
 0x6ab   :  { %v4592_v39 = vpop.f32.mrf.mxu0 }
 0x6ac   :  { %3341 = vst [vmem:[#allocation7] sm:$0xff] %v3327_v54  ;;  %v3338_v41 = vadd.f32 %v4592_v39, %v3813_v25 }
 0x6ad   :  { %v3329_v46 = vpop.f32.mrf.mxu0 }
 0x6ae   :  { %3344 = vst [vmem:[#allocation7 + $0x18] sm:$0xff] %v3338_v41  ;;  %v3330_v47 = vadd.f32 %v3813_v25, %v3329_v46  ;;  %v3346_v50 = vpack.c.bf16 %v3338_v41, %v3335_v51 }
 0x6b0   :  { %3342 = vst [vmem:[#allocation7 + $0x8] sm:$0xff] %v3330_v47  ;;  %v3345_v49 = vpack.c.bf16 %v3330_v47, %v3327_v54 }
 0x6b2   :  { %4609 = vmatprep.mubr.bf16.mxu1 %v3345_v49 }
 0x6b3   :  { %4610 = vmatmul.mubr.bf16.vlgmr.msra.gmra.mxu1 %v3346_v50 }
 0x6b4   :  { %4884 = shalt.err (!%p4881_p0)
}
 0x6b5   :  { %s4905_s13 = smov 128   ;;  %s4906_s14 = smov 8   ;;  %v4571_v52 = vpop.f32.mrf.mxu1  ;;  %v3760_v53 = vld [vmem:[%s5489_s4 + $0x4] ss:$0 sm:$0xff]  ;;  %v3812_v60 = vld [vmem:[%s5489_s4 + $0x5] ss:$0 sm:$0xff] }
 0x6b6   :  { %3490 = dma.vmem_to_hbm [thread:$0]  %s3485_s12, 512, %s5494_s9, [#allocation4], %s4905_s13, %s4905_s13, %s4906_s14   ;;  %v2697_v4 = vadd.f32 %v3760_v53, %v5419_v57  ;;  %v2695_v59 = vadd.f32 %v3760_v53, %v5422_v7  ;;  %v2698_v1 = vadd.f32 %v3760_v53, %v5425_v0  ;;  %v2696_v19 = vadd.f32 %v3760_v53, %v5428_v2 }
 0x6b7   :  { %v3190_v55 = vpop.f32.mrf.mxu1  ;;  %v3830_v57 = vld [vmem:[%s5493_s8] ss:$0 sm:$0xff] }
 0x6b8   :  { %v3207_v58 = vadd.f32 %v4571_v52, %v2697_v4  ;;  %v3205_v61 = vadd.f32 %v3190_v55, %v2695_v59 }
 0x6b9   :  { %v4572_v56 = vpop.f32.mrf.mxu1 }
 0x6ba   :  { %v3208_v13 = vadd.f32 %v4572_v56, %v2698_v1  ;;  %v3219_v62 = vadd.f32 %v3812_v60, %v3207_v58  ;;  %v3217_v7 = vadd.f32 %v3812_v60, %v3205_v61 }
 0x6bb   :  { %v3193_v10 = vpop.f32.mrf.mxu1 }
 0x6bc   :  { %v3206_v3 = vadd.f32 %v3193_v10, %v2696_v19  ;;  %v3220_v9 = vadd.f32 %v3812_v60, %v3208_v13 }
 0x6be   :  { %v3218_v23 = vadd.f32 %v3812_v60, %v3206_v3 }
 0x773   :  { %v4611_v63 = vpop.f32.mrf.mxu1 }
 0x774   :  { %v3462_v5 = vadd.f32 %v4611_v63, %v3219_v62 }
 0x775   :  { %v3445_v21 = vpop.f32.mrf.mxu1 }
 0x776   :  { %v3473_v6 = vadd.f32 %v3830_v57, %v3462_v5  ;;  %v3460_v8 = vadd.f32 %v3445_v21, %v3217_v7 }
 0x777   :  { %v4612_v12 = vpop.f32.mrf.mxu1 }
 0x778   :  { %3477 = vst [vmem:[%s5495_s10 + $0x10] sm:$0xff] %v3473_v6  ;;  %v3471_v0 = vadd.f32 %v3830_v57, %v3460_v8  ;;  %v3463_v2 = vadd.f32 %v4612_v12, %v3220_v9 }
 0x779   :  { %v3448_v14 = vpop.f32.mrf.mxu1 }
 0x77a   :  { %3475 = vst [vmem:[%s5495_s10] sm:$0xff] %v3471_v0  ;;  %v3474_v33 = vadd.f32 %v3830_v57, %v3463_v2  ;;  %v3461_v35 = vadd.f32 %v3448_v14, %v3218_v23 }
 0x77c   :  { %3478 = vst [vmem:[%s5495_s10 + $0x18] sm:$0xff] %v3474_v33  ;;  %v3472_v17 = vadd.f32 %v3830_v57, %v3461_v35 }
 0x77e   :  { %3476 = vst [vmem:[%s5495_s10 + $0x8] sm:$0xff] %v3472_v17 }
 0x77f   :  { %4897 = dma.done.wait [#allocation4], 512  }
 0x780   :  { %4898 = vsyncadd [#allocation4], 4294966784 }
 0x781   :  { %3498 = vsyncpa [#allocation3], 1 }
 0x782   :  { %3499 = vsyncpa [#allocation6], 1 }
 0x783   :  { %3500 = vsyncpa [#allocation4], 1 }

// kernel: _cws_cnn_forward_impl.1
= control target key start
LH: loop header
LB: loop body
LE: loop exit
PB: predicated region body
PF: predicated region fallthrough
CT: control target
= control target key end

     0   :  { %16 = vsyncpa [#allocation3], 0  ;;  %s5485_s0 = inlined_call_operand.vmem [shape: bf16[2,16,128], index: 0, kind: input, shape index: {}]   ;;  %s5486_s1 = inlined_call_operand.hbm [shape: bf16[6,3,128,128], index: 1, kind: input, shape index: {}]   ;;  %s5487_s2 = inlined_call_operand.vmem [shape: f32[6,1,128], index: 2, kind: input, shape index: {}]   ;;  %s5488_s3 = inlined_call_operand.hbm [shape: bf16[6,128,128], index: 3, kind: input, shape index: {}]   ;;  %s5489_s4 = inlined_call_operand.vmem [shape: f32[6,1,128], index: 4, kind: input, shape index: {}]   ;;  %s5490_s5 = inlined_call_operand.vmem [shape: bf16[128,128], index: 5, kind: input, shape index: {}]   ;;  %s5491_s6 = inlined_call_operand.vmem [shape: f32[1,128], index: 6, kind: input, shape index: {}]   ;;  %s5492_s7 = inlined_call_operand.vmem [shape: bf16[128,128], index: 7, kind: input, shape index: {}]   ;;  %s5493_s8 = inlined_call_operand.vmem [shape: f32[1,128], index: 8, kind: input, shape index: {}]   ;;  %s5494_s9 = inlined_call_operand.hbm [shape: f32[2,16,128], index: 9, kind: output, shape index: {0}]   ;;  %s5495_s10 = inlined_call_operand.vmem [shape: f32[2,16,128], index: 10, kind: output, shape index: {1}]  }
   0x1   :  { %17 = vsyncpa [#allocation6], 0 }
   0x2   :  { %18 = vsyncpa [#allocation4], 0  ;;  %s4899_s13 = smov [#allocation2]  }
   0x3   :  { %s26_s14 = sshll.u32 %s4899_s13, 4  ;;  %s27_s14 = int_to_ptr.vmem [resolvable:$true] %s26_s14 }
   0x4   :  { %s4841_s15 = scalar_lea.vmem %s27_s14, 18432  ;;  %p4846_p1 = scmp.lt.s32.totalorder %s27_s14, %s27_s14 }
   0x5   :  { %p4842_p0 = scmp.ne.s32.totalorder %s27_s14, %s4841_s15  ;;  %p4847_p2 = scmp.lt.s32.totalorder %s4841_s15, %s4841_s15 }
   0x7   :  { %p4848_p3 = por %p4847_p2, %p4846_p1 }
   0x9   :  { %p4849_p4 = pnand %p4848_p3, %p4842_p0 }
   0xb   :  { %4852 = shalt.err (!%p4849_p4)
}
   0xc   :  { %s4900_s16 = smov 64   ;;  %s4901_s17 = smov 4  }
   0xd   :  { %32 = dma.hbm_to_vmem [thread:$0]  %s5486_s1, 18432, %s27_s14, [#allocation3], %s4900_s16, %s4900_s16, %s4901_s17  }
   0xe   :  { %s4902_s20 = smov [#allocation5]  }
   0xf   :  { %s40_s21 = sshll.u32 %s4902_s20, 4  ;;  %s41_s21 = int_to_ptr.vmem [resolvable:$true] %s40_s21 }
  0x10   :  { %s4861_s22 = scalar_lea.vmem %s41_s21, 6144  ;;  %p4866_p6 = scmp.lt.s32.totalorder %s41_s21, %s41_s21 }
  0x11   :  { %p4862_p5 = scmp.ne.s32.totalorder %s41_s21, %s4861_s22  ;;  %p4867_p7 = scmp.lt.s32.totalorder %s4861_s22, %s4861_s22 }
  0x13   :  { %p4868_p8 = por %p4867_p7, %p4866_p6 }
  0x15   :  { %p4869_p9 = pnand %p4868_p8, %p4862_p5 }
  0x17   :  { %4872 = shalt.err (!%p4869_p9)
}
  0x18   :  { %46 = dma.hbm_to_vmem [thread:$0]  %s5488_s3, 6144, %s41_s21, [#allocation6], %s4900_s16, %s4900_s16, %s4901_s17  }
  0x19   :  { %4893 = dma.done.wait [#allocation3], 18432  }
  0x1a   :  { %4894 = vsyncadd [#allocation3], 4294948864 }
  0x1b   :  { %4895 = dma.done.wait [#allocation6], 6144  }
  0x1c   :  { %4896 = vsyncadd [#allocation6], 4294961152  ;;  %v4621_v0 = vld [vmem:[#allocation2 + $0x78] sm:$0xff]   ;;  %v4623_v2 = vld [vmem:[#allocation2 + $0x70] sm:$0xff]   ;;  %v72_v8 = vlaneseq  ;;  %vm4903_vm3 = vmmov 1  }
  0x1d   :  { %v4622_v1 = vld [vmem:[#allocation2 + $0x38] sm:$0xff]   ;;  %4093 = vmatprep.subr.bf16.mxu0 %v4621_v0  ;;  %v4624_v3 = vld [vmem:[#allocation2 + $0x30] sm:$0xff]   ;;  %v4625_v4 = vld [vmem:[#allocation2 + $0x68] sm:$0xff]  }
  0x1e   :  { %4113 = vmatprep.subr.bf16.mxu1 %v4622_v1  ;;  %4094 = vmatpush3.bf16.msra.mxu0 %v4621_v0  ;;  %v4626_v5 = vld [vmem:[#allocation2 + $0x28] sm:$0xff]   ;;  %v4627_v6 = vld [vmem:[#allocation2 + $0x60] sm:$0xff]   ;;  %v4629_v9 = vld [vmem:[#allocation2 + $0x58] sm:$0xff]   ;;  %v4968_v11 = vshrl.u32 %v72_v8, 7 }
  0x1f   :  { %4114 = vmatpush3.bf16.msra.mxu1 %v4622_v1  ;;  %4095 = vmatprep.subr.bf16.mxu0 %v4623_v2  ;;  %v4628_v7 = vld [vmem:[#allocation2 + $0x20] sm:$0xff]   ;;  %v4630_v10 = vld [vmem:[#allocation2 + $0x18] sm:$0xff]   ;;  %v4631_v12 = vld [vmem:[#allocation2 + $0x50] sm:$0xff]  }
  0x20   :  { %4115 = vmatprep.subr.bf16.mxu1 %v4624_v3  ;;  %v64_v13 = vld [vmem:[%s5485_s0] sm:$0xff]   ;;  %v67_v14 = vld [vmem:[%s5485_s0 + $0x8] sm:$0xff]   ;;  %vm3831_vm0 = vcmp.ne.s32.totalorder %v4968_v11, 0  ;;  %v4632_v15 = vld [vmem:[#allocation2 + $0x10] sm:$0xff]   ;;  %vm83_vm1 = vcmp.lt.s32.totalorder %v4968_v11, 1  ;;  %v74_v19 = vadd.s32 8, %v4968_v11 }
  0x21   :  { %v68_v16 = vunpack.c.l.bf16 %v64_v13  ;;  %v69_v17 = vunpack.c.h.bf16 %v64_v13  ;;  %v71_v18 = vunpack.c.h.bf16 %v67_v14  ;;  %4109 = vmatprep.mubr.bf16.mxu0 %v64_v13  ;;  %v4633_v22 = vld [vmem:[#allocation2 + $0x48] sm:$0xff]   ;;  %vm100_vm2 = vcmp.lt.s32.totalorder %v4968_v11, 7  ;;  %vm4983_vm4 = vmpackc.low %vm4903_vm3, %vm3831_vm0  ;;  %v4635_v28 = vld [vmem:[#allocation2 + $0x40] sm:$0xff]  }
  0x22   :  { %4096 = vmatpush3.bf16.msra.mxu0 %v4623_v2  ;;  %v4634_v23 = vld [vmem:[#allocation2 + $0x8] sm:$0xff]   ;;  %v70_v26 = vunpack.c.l.bf16 %v67_v14  ;;  %vm3832_vm5 = vcmp.ne.s32.totalorder %v74_v19, 15  ;;  %v4636_v30 = vld [vmem:[#allocation2] sm:$0xff]   ;;  %v4639_v38 = vld [vmem:[#allocation2 + $0xb8] sm:$0xff]  }
  0x23   :  { %4116 = vmatpush3.bf16.msra.mxu1 %v4624_v3  ;;  %4097 = vmatprep.subr.bf16.mxu0 %v4625_v4  ;;  %v79_v20 = vrot.slane %v68_v16, 7  ;;  %v80_v21 = vrot.slane %v69_v17, 7  ;;  %v82_v24 = vrot.slane %v71_v18, 7  ;;  %v96_v31 = vrot.slane %v68_v16, 1  ;;  %vm4994_vm6 = vmpackc.low %vm3832_vm5, %vm4903_vm3  ;;  %v4640_v43 = vld [vmem:[#allocation2 + $0xb0] sm:$0xff]   ;;  %v4641_v46 = vld [vmem:[#allocation2 + $0xa8] sm:$0xff]  }
  0x24   :  { %4117 = vmatprep.subr.bf16.mxu1 %v4626_v5  ;;  %v97_v33 = vrot.slane %v69_v17, 1  ;;  %v81_v34 = vrot.slane %v70_v26, 7  ;;  %v99_v35 = vrot.slane %v71_v18, 1  ;;  %v98_v36 = vrot.slane %v70_v26, 1  ;;  %v4642_v47 = vld [vmem:[#allocation2 + $0xa0] sm:$0xff]   ;;  %v4643_v48 = vld [vmem:[#allocation2 + $0x98] sm:$0xff]  }
  0x25   :  { %v86_v27 = vsel %vm83_vm1, %v79_v20, %v80_v21  ;;  %v87_v29 = vsel %vm83_vm1, %v82_v24, %v79_v20  ;;  %v4644_v49 = vld [vmem:[#allocation2 + $0x90] sm:$0xff]   ;;  %v4645_v50 = vld [vmem:[#allocation2 + $0x88] sm:$0xff]   ;;  %v4646_v51 = vld [vmem:[#allocation2 + $0x80] sm:$0xff]  }
  0x26   :  { %4098 = vmatpush3.bf16.msra.mxu0 %v4625_v4  ;;  %v3521_v32 = vpack.c.bf16 %v86_v27, %v87_v29  ;;  %v84_v39 = vsel %vm83_vm1, %v81_v34, %v82_v24  ;;  %v85_v40 = vsel %vm83_vm1, %v80_v21, %v81_v34  ;;  %v102_v41 = vsel %vm100_vm2, %v97_v33, %v98_v36  ;;  %v4647_v55 = vld [vmem:[#allocation5 + $0x38] sm:$0xff]   ;;  %v4649_v57 = vld [vmem:[#allocation5 + $0x30] sm:$0xff]   ;;  %v4651_v59 = vld [vmem:[#allocation5 + $0x28] sm:$0xff]  }
  0x27   :  { %4118 = vmatpush3.bf16.msra.mxu1 %v4626_v5  ;;  %4099 = vmatprep.subr.bf16.mxu0 %v4627_v6  ;;  %v103_v42 = vsel %vm100_vm2, %v96_v31, %v97_v33  ;;  %v3525_v44 = vpack.c.bf16 %v84_v39, %v85_v40  ;;  %v104_v52 = vsel %vm100_vm2, %v99_v35, %v96_v31  ;;  %v4648_v56 = vld [vmem:[#allocation2 + $0x138] sm:$0xff]   ;;  %v4650_v58 = vld [vmem:[#allocation2 + $0x130] sm:$0xff]   ;;  %v4652_v60 = vld [vmem:[#allocation2 + $0x128] sm:$0xff]  }
  0x28   :  { %4119 = vmatprep.subr.bf16.mxu1 %v4628_v7  ;;  %4129 = vmatprep.mubr.msk.bf16.mxu1 %vm4983_vm4, %v3521_v32  ;;  %v3537_v45 = vpack.c.bf16 %v102_v41, %v103_v42  ;;  %v101_v53 = vsel %vm100_vm2, %v98_v36, %v99_v35  ;;  %v4653_v61 = vld [vmem:[#allocation5 + $0x20] sm:$0xff]   ;;  %v4655_v63 = vld [vmem:[#allocation5 + $0x18] sm:$0xff]   ;;  %v4657_v1 = vld [vmem:[#allocation5 + $0x10] sm:$0xff]  }
  0x29   :  { %v3541_v54 = vpack.c.bf16 %v104_v52, %v101_v53  ;;  %v4654_v62 = vld [vmem:[#allocation2 + $0x120] sm:$0xff]   ;;  %v4656_v0 = vld [vmem:[#allocation2 + $0x118] sm:$0xff]   ;;  %v4658_v2 = vld [vmem:[#allocation2 + $0x110] sm:$0xff]  }
  0x2a   :  { %4100 = vmatpush3.bf16.msra.mxu0 %v4627_v6  ;;  %v4659_v3 = vld [vmem:[#allocation5 + $0x8] sm:$0xff]   ;;  %v4661_v5 = vld [vmem:[#allocation5] sm:$0xff]   ;;  %v4664_v8 = vld [vmem:[#allocation2 + $0x178] sm:$0xff]  }
  0x2b   :  { %4120 = vmatpush3.bf16.msra.mxu1 %v4628_v7  ;;  %4101 = vmatprep.subr.bf16.mxu0 %v4629_v9  ;;  %v4660_v4 = vld [vmem:[#allocation2 + $0x108] sm:$0xff]   ;;  %v4662_v6 = vld [vmem:[#allocation2 + $0x100] sm:$0xff]   ;;  %v4663_v7 = vld [vmem:[#allocation2 + $0xf8] sm:$0xff]  }
  0x2c   :  { %4121 = vmatprep.subr.bf16.mxu1 %v4630_v10  ;;  %v3543_v21 = vld [vmem:[%s5487_s2] ss:$0 sm:$0xff]  ;;  %v4666_v53 = vld [vmem:[#allocation2 + $0x170] sm:$0xff]   ;;  %v4811_v25 = vld [vmem:[#allocation5 + $0x168] sm:$0xff]  }
  0x2d   :  { %v4810_v11 = vld [vmem:[%s5490_s5 + $0x30] sm:$0xff]   ;;  %v4812_v37 = vld [vmem:[%s5490_s5 + $0x28] sm:$0xff]  }
  0x2e   :  { %4102 = vmatpush3.bf16.msra.mxu0 %v4629_v9 }
  0x2f   :  { %4122 = vmatpush3.bf16.msra.mxu1 %v4630_v10  ;;  %4103 = vmatprep.subr.bf16.mxu0 %v4631_v12 }
  0x30   :  { %4123 = vmatprep.subr.bf16.mxu1 %v4632_v15 }
  0x32   :  { %4104 = vmatpush3.bf16.msra.mxu0 %v4631_v12 }
  0x33   :  { %4124 = vmatpush3.bf16.msra.mxu1 %v4632_v15  ;;  %4105 = vmatprep.subr.bf16.mxu0 %v4633_v22 }
  0x34   :  { %4125 = vmatprep.subr.bf16.mxu1 %v4634_v23 }
  0x36   :  { %4106 = vmatpush3.bf16.msra.mxu0 %v4633_v22 }
  0x37   :  { %4126 = vmatpush3.bf16.msra.mxu1 %v4634_v23  ;;  %4107 = vmatprep.subr.bf16.mxu0 %v4635_v28 }
  0x38   :  { %4127 = vmatprep.subr.bf16.mxu1 %v4636_v30 }
  0x3a   :  { %4108 = vmatpush3.bf16.msra.mxu0 %v4635_v28 }
  0x3b   :  { %4128 = vmatpush3.bf16.msra.mxu1 %v4636_v30  ;;  %4133 = vmatprep.subr.bf16.mxu0 %v4639_v38 }
  0x3c   :  { %4153 = vmatprep.subr.bf16.mxu1 %v4647_v55 }
  0x3d   :  { %4110 = vmatmul.mubr.bf16.vlgmr.msra.gmra.mxu0 %v67_v14 }
  0x3e   :  { %4130 = vmatmul.mubr.msk.bf16.vlgmr.msra.gmra.mxu1 %vm4983_vm4, %v3525_v44  ;;  %4134 = vmatpush3.bf16.msra.mxu0 %v4639_v38 }
  0x3f   :  { %4135 = vmatprep.subr.bf16.mxu0 %v4640_v43  ;;  %4149 = vmatprep.mubr.msk.bf16.mxu0 %vm4994_vm6, %v3537_v45 }
  0x40   :  { %4154 = vmatpush3.bf16.msra.mxu1 %v4647_v55 }
  0x41   :  { %4155 = vmatprep.subr.bf16.mxu1 %v4649_v57 }
  0x42   :  { %4136 = vmatpush3.bf16.msra.mxu0 %v4640_v43 }
  0x43   :  { %4137 = vmatprep.subr.bf16.mxu0 %v4641_v46 }
  0x44   :  { %4156 = vmatpush3.bf16.msra.mxu1 %v4649_v57  ;;  %v4667_v57 = vld [vmem:[#allocation2 + $0xe8] sm:$0xff]  }
  0x45   :  { %4157 = vmatprep.subr.bf16.mxu1 %v4651_v59 }
  0x46   :  { %4138 = vmatpush3.bf16.msra.mxu0 %v4641_v46 }
  0x47   :  { %4139 = vmatprep.subr.bf16.mxu0 %v4642_v47 }
  0x48   :  { %4158 = vmatpush3.bf16.msra.mxu1 %v4651_v59  ;;  %v4669_v59 = vld [vmem:[#allocation2 + $0xe0] sm:$0xff]  }
  0x49   :  { %4159 = vmatprep.subr.bf16.mxu1 %v4653_v61 }
  0x4a   :  { %4140 = vmatpush3.bf16.msra.mxu0 %v4642_v47 }
  0x4b   :  { %4141 = vmatprep.subr.bf16.mxu0 %v4643_v48 }
  0x4c   :  { %4160 = vmatpush3.bf16.msra.mxu1 %v4653_v61  ;;  %v4671_v61 = vld [vmem:[#allocation2 + $0xd8] sm:$0xff]  }
  0x4d   :  { %4161 = vmatprep.subr.bf16.mxu1 %v4655_v63 }
  0x4e   :  { %4142 = vmatpush3.bf16.msra.mxu0 %v4643_v48 }
  0x4f   :  { %4143 = vmatprep.subr.bf16.mxu0 %v4644_v49 }
  0x50   :  { %4162 = vmatpush3.bf16.msra.mxu1 %v4655_v63  ;;  %v4673_v63 = vld [vmem:[#allocation2 + $0xd0] sm:$0xff]  }
  0x51   :  { %4163 = vmatprep.subr.bf16.mxu1 %v4657_v1 }
  0x52   :  { %4144 = vmatpush3.bf16.msra.mxu0 %v4644_v49  ;;  %v4665_v49 = vld [vmem:[#allocation2 + $0xf0] sm:$0xff]  }
  0x53   :  { %4145 = vmatprep.subr.bf16.mxu0 %v4645_v50 }
  0x54   :  { %4164 = vmatpush3.bf16.msra.mxu1 %v4657_v1  ;;  %v4675_v1 = vld [vmem:[#allocation2 + $0xc8] sm:$0xff]  }
  0x55   :  { %4165 = vmatprep.subr.bf16.mxu1 %v4659_v3 }
  0x56   :  { %4146 = vmatpush3.bf16.msra.mxu0 %v4645_v50 }
  0x57   :  { %4147 = vmatprep.subr.bf16.mxu0 %v4646_v51 }
  0x58   :  { %4166 = vmatpush3.bf16.msra.mxu1 %v4659_v3  ;;  %v4677_v3 = vld [vmem:[#allocation2 + $0xc0] sm:$0xff]  }
  0x59   :  { %4167 = vmatprep.subr.bf16.mxu1 %v4661_v5 }
  0x5a   :  { %4148 = vmatpush3.bf16.msra.mxu0 %v4646_v51 }
  0x5b   :  { %4173 = vmatprep.subr.bf16.mxu0 %v4648_v56 }
  0x5c   :  { %4168 = vmatpush3.bf16.msra.mxu1 %v4661_v5 }
  0x5d   :  { %4150 = vmatmul.mubr.msk.bf16.vlgmr.msra.gmra.mxu0 %vm4994_vm6, %v3541_v54  ;;  %4193 = vmatprep.subr.bf16.mxu1 %v4663_v7 }
  0x5e   :  { %4174 = vmatpush3.bf16.msra.mxu0 %v4648_v56 }
  0x5f   :  { %4175 = vmatprep.subr.bf16.mxu0 %v4650_v58 }
  0x62   :  { %4176 = vmatpush3.bf16.msra.mxu0 %v4650_v58  ;;  %v4668_v58 = vld [vmem:[#allocation2 + $0x168] sm:$0xff]  }
  0x63   :  { %4177 = vmatprep.subr.bf16.mxu0 %v4652_v60 }
  0x66   :  { %4178 = vmatpush3.bf16.msra.mxu0 %v4652_v60  ;;  %v4670_v60 = vld [vmem:[#allocation2 + $0x160] sm:$0xff]  }
  0x67   :  { %4179 = vmatprep.subr.bf16.mxu0 %v4654_v62 }
  0x6a   :  { %4180 = vmatpush3.bf16.msra.mxu0 %v4654_v62  ;;  %v4672_v62 = vld [vmem:[#allocation2 + $0x158] sm:$0xff]  }
  0x6b   :  { %4181 = vmatprep.subr.bf16.mxu0 %v4656_v0 }
  0x6e   :  { %4182 = vmatpush3.bf16.msra.mxu0 %v4656_v0  ;;  %v4674_v0 = vld [vmem:[#allocation2 + $0x150] sm:$0xff]  }
  0x6f   :  { %4183 = vmatprep.subr.bf16.mxu0 %v4658_v2 }
  0x72   :  { %4184 = vmatpush3.bf16.msra.mxu0 %v4658_v2  ;;  %v4676_v2 = vld [vmem:[#allocation2 + $0x148] sm:$0xff]  }
  0x73   :  { %4185 = vmatprep.subr.bf16.mxu0 %v4660_v4 }
  0x76   :  { %4186 = vmatpush3.bf16.msra.mxu0 %v4660_v4  ;;  %v4678_v4 = vld [vmem:[#allocation2 + $0x140] sm:$0xff]  }
  0x77   :  { %4187 = vmatprep.subr.bf16.mxu0 %v4662_v6 }
  0x7a   :  { %4188 = vmatpush3.bf16.msra.mxu0 %v4662_v6 }
  0x7b   :  { %4213 = vmatprep.subr.bf16.mxu0 %v4664_v8 }
  0xfd   :  { %v4111_v9 = vpop.f32.mrf.mxu0 }
  0xfe   :  { %v4131_v12 = vpop.f32.mrf.mxu1 }
  0xff   :  { %v242_v10 = vpop.f32.mrf.mxu0  ;;  %v348_v16 = vadd.f32 %v4131_v12, %v4111_v9 }
 0x100   :  { %v339_v14 = vpop.f32.mrf.mxu1 }
 0x101   :  { %v4112_v13 = vpop.f32.mrf.mxu0  ;;  %v340_v19 = vadd.f32 %v339_v14, %v242_v10  ;;  %v4679_v14 = vld [vmem:[#allocation5 + $0x78] sm:$0xff]  }
 0x102   :  { %v4132_v17 = vpop.f32.mrf.mxu1 }
 0x103   :  { %v245_v15 = vpop.f32.mrf.mxu0  ;;  %v351_v23 = vadd.f32 %v4132_v17, %v4112_v13  ;;  %v4682_v17 = vld [vmem:[#allocation2 + $0x1f0] sm:$0xff]  }
 0x104   :  { %v342_v24 = vpop.f32.mrf.mxu1 }
 0x105   :  { %v343_v30 = vadd.f32 %v342_v24, %v245_v15  ;;  %v4680_v15 = vld [vmem:[#allocation2 + $0x1f8] sm:$0xff]   ;;  %v4689_v24 = vld [vmem:[#allocation5 + $0x50] sm:$0xff]  }
 0x11d   :  { %v4151_v18 = vpop.f32.mrf.mxu0 }
 0x11e   :  { %v472_v20 = vadd.f32 %v4151_v18, %v348_v16  ;;  %v4681_v16 = vld [vmem:[#allocation5 + $0x70] sm:$0xff]   ;;  %v4683_v18 = vld [vmem:[#allocation5 + $0x68] sm:$0xff]  }
 0x11f   :  { %v455_v22 = vpop.f32.mrf.mxu0 }
 0x120   :  { %v470_v26 = vadd.f32 %v455_v22, %v340_v19  ;;  %v483_v28 = vadd.f32 %v3543_v21, %v472_v20  ;;  %v4684_v19 = vld [vmem:[#allocation2 + $0x1e8] sm:$0xff]   ;;  %v4685_v20 = vld [vmem:[#allocation5 + $0x60] sm:$0xff]   ;;  %v4687_v22 = vld [vmem:[#allocation5 + $0x58] sm:$0xff]  }
 0x121   :  { %v4152_v27 = vpop.f32.mrf.mxu0 }
 0x122   :  { %v473_v29 = vadd.f32 %v4152_v27, %v351_v23  ;;  %v481_v31 = vadd.f32 %v3543_v21, %v470_v26  ;;  %v5019_v35 = vmax.f32 %v483_v28, 0.0  ;;  %v4688_v23 = vld [vmem:[#allocation2 + $0x1d8] sm:$0xff]   ;;  %v4690_v26 = vld [vmem:[#allocation2 + $0x1d0] sm:$0xff]   ;;  %v4691_v27 = vld [vmem:[#allocation5 + $0x48] sm:$0xff]  }
 0x123   :  { %v458_v32 = vpop.f32.mrf.mxu0  ;;  %v4692_v28 = vld [vmem:[#allocation2 + $0x1c8] sm:$0xff]  }
 0x124   :  { %v484_v33 = vadd.f32 %v3543_v21, %v473_v29  ;;  %v471_v34 = vadd.f32 %v458_v32, %v343_v30  ;;  %v5023_v38 = vmax.f32 %v481_v31, 0.0  ;;  %v625_v42 = vrot.slane %v5019_v35, 1  ;;  %v4693_v29 = vld [vmem:[#allocation5 + $0x40] sm:$0xff]   ;;  %v4695_v31 = vld [vmem:[#allocation2 + $0x1b8] sm:$0xff]  }
 0x125   :  { %v613_v6 = vrot.slane %v5019_v35, 7  ;;  %v4694_v30 = vld [vmem:[#allocation2 + $0x1c0] sm:$0xff]   ;;  %v4696_v32 = vld [vmem:[#allocation2 + $0x238] sm:$0xff]  }
 0x126   :  { %v5021_v36 = vmax.f32 %v484_v33, 0.0  ;;  %v482_v39 = vadd.f32 %v3543_v21, %v471_v34  ;;  %v611_v43 = vrot.slane %v5023_v38, 7  ;;  %v623_v47 = vrot.slane %v5023_v38, 1  ;;  %v4686_v21 = vld [vmem:[#allocation2 + $0x1e0] sm:$0xff]  }
 0x128   :  { %v614_v40 = vrot.slane %v5021_v36, 7  ;;  %v5026_v41 = vmax.f32 %v482_v39, 0.0  ;;  %v490_v48 = vpack.c.bf16 %v5021_v36, %v5019_v35  ;;  %v626_v5 = vrot.slane %v5021_v36, 1 }
 0x12a   :  { %v612_v44 = vrot.slane %v5026_v41, 7  ;;  %v624_v45 = vrot.slane %v5026_v41, 1  ;;  %v489_v46 = vpack.c.bf16 %v5026_v41, %v5023_v38  ;;  %v618_v51 = vsel %vm83_vm1, %v614_v40, %v611_v43 }
 0x12b   :  { %v615_v10 = vsel %vm83_vm1, %v613_v6, %v614_v40 }
 0x12c   :  { %4169 = vmatprep.mubr.bf16.mxu1 %v489_v46  ;;  %4189 = vmatprep.mubr.bf16.mxu0 %v489_v46  ;;  %v617_v50 = vsel %vm83_vm1, %v611_v43, %v612_v44  ;;  %v628_v52 = vsel %vm100_vm2, %v624_v45, %v625_v42  ;;  %v629_v55 = vsel %vm100_vm2, %v623_v47, %v624_v45 }
 0x12d   :  { %4170 = vmatmul.mubr.bf16.vlgmr.msra.gmra.mxu1 %v490_v48  ;;  %4190 = vmatmul.mubr.bf16.vlgmr.msra.gmra.mxu0 %v490_v48  ;;  %v3571_v54 = vpack.c.bf16 %v617_v50, %v618_v51  ;;  %v3587_v56 = vpack.c.bf16 %v628_v52, %v629_v55  ;;  %v616_v9 = vsel %vm83_vm1, %v612_v44, %v613_v6 }
 0x12e   :  { %4194 = vmatpush3.bf16.msra.mxu1 %v4663_v7  ;;  %4214 = vmatpush3.bf16.msra.mxu0 %v4664_v8  ;;  %v627_v7 = vsel %vm100_vm2, %v625_v42, %v626_v5  ;;  %v630_v8 = vsel %vm100_vm2, %v626_v5, %v623_v47  ;;  %v3575_v12 = vpack.c.bf16 %v615_v10, %v616_v9 }
 0x12f   :  { %4209 = vmatprep.mubr.msk.bf16.mxu1 %vm4983_vm4, %v3571_v54  ;;  %4195 = vmatprep.subr.bf16.mxu1 %v4665_v49  ;;  %v3591_v13 = vpack.c.bf16 %v630_v8, %v627_v7 }
 0x130   :  { %4229 = vmatprep.mubr.msk.bf16.mxu0 %vm4994_vm6, %v3587_v56  ;;  %4215 = vmatprep.subr.bf16.mxu0 %v4666_v53 }
 0x132   :  { %4196 = vmatpush3.bf16.msra.mxu1 %v4665_v49  ;;  %4216 = vmatpush3.bf16.msra.mxu0 %v4666_v53  ;;  %v3594_v49 = vld [vmem:[%s5487_s2 + $0x1] ss:$0 sm:$0xff] }
 0x133   :  { %4197 = vmatprep.subr.bf16.mxu1 %v4667_v57  ;;  %4217 = vmatprep.subr.bf16.mxu0 %v4668_v58 }
 0x136   :  { %4198 = vmatpush3.bf16.msra.mxu1 %v4667_v57  ;;  %4218 = vmatpush3.bf16.msra.mxu0 %v4668_v58 }
 0x137   :  { %4199 = vmatprep.subr.bf16.mxu1 %v4669_v59  ;;  %4219 = vmatprep.subr.bf16.mxu0 %v4670_v60 }
 0x13a   :  { %4200 = vmatpush3.bf16.msra.mxu1 %v4669_v59  ;;  %4220 = vmatpush3.bf16.msra.mxu0 %v4670_v60 }
 0x13b   :  { %4201 = vmatprep.subr.bf16.mxu1 %v4671_v61  ;;  %4221 = vmatprep.subr.bf16.mxu0 %v4672_v62 }
 0x13e   :  { %4202 = vmatpush3.bf16.msra.mxu1 %v4671_v61  ;;  %4222 = vmatpush3.bf16.msra.mxu0 %v4672_v62 }
 0x13f   :  { %4203 = vmatprep.subr.bf16.mxu1 %v4673_v63  ;;  %4223 = vmatprep.subr.bf16.mxu0 %v4674_v0 }
 0x142   :  { %4204 = vmatpush3.bf16.msra.mxu1 %v4673_v63  ;;  %4224 = vmatpush3.bf16.msra.mxu0 %v4674_v0 }
 0x143   :  { %4205 = vmatprep.subr.bf16.mxu1 %v4675_v1  ;;  %4225 = vmatprep.subr.bf16.mxu0 %v4676_v2 }
 0x146   :  { %4206 = vmatpush3.bf16.msra.mxu1 %v4675_v1  ;;  %4226 = vmatpush3.bf16.msra.mxu0 %v4676_v2 }
 0x147   :  { %4207 = vmatprep.subr.bf16.mxu1 %v4677_v3  ;;  %4227 = vmatprep.subr.bf16.mxu0 %v4678_v4 }
 0x14a   :  { %4208 = vmatpush3.bf16.msra.mxu1 %v4677_v3  ;;  %4228 = vmatpush3.bf16.msra.mxu0 %v4678_v4 }
 0x14b   :  { %4233 = vmatprep.subr.bf16.mxu1 %v4679_v14  ;;  %4253 = vmatprep.subr.bf16.mxu0 %v4680_v15 }
 0x14d   :  { %4210 = vmatmul.mubr.msk.bf16.vlgmr.msra.gmra.mxu1 %vm4983_vm4, %v3575_v12  ;;  %4230 = vmatmul.mubr.msk.bf16.vlgmr.msra.gmra.mxu0 %vm4994_vm6, %v3591_v13  ;;  %v4697_v12 = vld [vmem:[#allocation2 + $0x1b0] sm:$0xff]  }
 0x14e   :  { %4234 = vmatpush3.bf16.msra.mxu1 %v4679_v14  ;;  %4254 = vmatpush3.bf16.msra.mxu0 %v4680_v15 }
 0x14f   :  { %4235 = vmatprep.subr.bf16.mxu1 %v4681_v16  ;;  %4255 = vmatprep.subr.bf16.mxu0 %v4682_v17 }
 0x152   :  { %4236 = vmatpush3.bf16.msra.mxu1 %v4681_v16  ;;  %4256 = vmatpush3.bf16.msra.mxu0 %v4682_v17  ;;  %v4698_v16 = vld [vmem:[#allocation2 + $0x230] sm:$0xff]  }
 0x153   :  { %4237 = vmatprep.subr.bf16.mxu1 %v4683_v18  ;;  %4257 = vmatprep.subr.bf16.mxu0 %v4684_v19 }
 0x156   :  { %4238 = vmatpush3.bf16.msra.mxu1 %v4683_v18  ;;  %4258 = vmatpush3.bf16.msra.mxu0 %v4684_v19 }
 0x157   :  { %4239 = vmatprep.subr.bf16.mxu1 %v4685_v20  ;;  %4259 = vmatprep.subr.bf16.mxu0 %v4686_v21 }
 0x15a   :  { %4240 = vmatpush3.bf16.msra.mxu1 %v4685_v20  ;;  %4260 = vmatpush3.bf16.msra.mxu0 %v4686_v21  ;;  %v4699_v20 = vld [vmem:[#allocation2 + $0x1a8] sm:$0xff]  }
 0x15b   :  { %4241 = vmatprep.subr.bf16.mxu1 %v4687_v22  ;;  %4261 = vmatprep.subr.bf16.mxu0 %v4688_v23  ;;  %v4700_v21 = vld [vmem:[#allocation2 + $0x228] sm:$0xff]  }
 0x15e   :  { %4242 = vmatpush3.bf16.msra.mxu1 %v4687_v22  ;;  %4262 = vmatpush3.bf16.msra.mxu0 %v4688_v23  ;;  %v4701_v22 = vld [vmem:[#allocation2 + $0x1a0] sm:$0xff]  }
 0x15f   :  { %4243 = vmatprep.subr.bf16.mxu1 %v4689_v24  ;;  %4263 = vmatprep.subr.bf16.mxu0 %v4690_v26  ;;  %v4702_v23 = vld [vmem:[#allocation2 + $0x220] sm:$0xff]  }
 0x162   :  { %4244 = vmatpush3.bf16.msra.mxu1 %v4689_v24  ;;  %4264 = vmatpush3.bf16.msra.mxu0 %v4690_v26  ;;  %v4703_v24 = vld [vmem:[#allocation2 + $0x198] sm:$0xff]  }
 0x163   :  { %4245 = vmatprep.subr.bf16.mxu1 %v4691_v27  ;;  %4265 = vmatprep.subr.bf16.mxu0 %v4692_v28  ;;  %v4704_v26 = vld [vmem:[#allocation2 + $0x218] sm:$0xff]  }
 0x166   :  { %4246 = vmatpush3.bf16.msra.mxu1 %v4691_v27  ;;  %4266 = vmatpush3.bf16.msra.mxu0 %v4692_v28  ;;  %v4705_v27 = vld [vmem:[#allocation2 + $0x190] sm:$0xff]  }
 0x167   :  { %4247 = vmatprep.subr.bf16.mxu1 %v4693_v29  ;;  %4267 = vmatprep.subr.bf16.mxu0 %v4694_v30  ;;  %v4706_v28 = vld [vmem:[#allocation2 + $0x210] sm:$0xff]  }
 0x16a   :  { %4248 = vmatpush3.bf16.msra.mxu1 %v4693_v29  ;;  %4268 = vmatpush3.bf16.msra.mxu0 %v4694_v30  ;;  %v4707_v29 = vld [vmem:[#allocation2 + $0x188] sm:$0xff]  }
 0x16b   :  { %4273 = vmatprep.subr.bf16.mxu1 %v4695_v31  ;;  %4293 = vmatprep.subr.bf16.mxu0 %v4696_v32  ;;  %v4708_v30 = vld [vmem:[#allocation2 + $0x208] sm:$0xff]  }
 0x1ed   :  { %v5075_v33 = vpop.f32.mrf.mxu1  ;;  %v4191_v34 = vpop.f32.mrf.mxu0 }
 0x1ef   :  { %v5077_v35 = vpop.f32.mrf.mxu1  ;;  %v753_v36 = vpop.f32.mrf.mxu0 }
 0x1f1   :  { %v5079_v38 = vpop.f32.mrf.mxu1  ;;  %v4192_v39 = vpop.f32.mrf.mxu0 }
 0x1f3   :  { %v5081_v40 = vpop.f32.mrf.mxu1  ;;  %v756_v41 = vpop.f32.mrf.mxu0 }
 0x20d   :  { %v4211_v42 = vpop.f32.mrf.mxu1  ;;  %v4231_v43 = vpop.f32.mrf.mxu0 }
 0x20e   :  { %v859_v44 = vadd.f32 %v4211_v42, %v4191_v34 }
 0x20f   :  { %v850_v45 = vpop.f32.mrf.mxu1  ;;  %v966_v46 = vpop.f32.mrf.mxu0 }
 0x210   :  { %v983_v47 = vadd.f32 %v4231_v43, %v859_v44  ;;  %v851_v48 = vadd.f32 %v850_v45, %v753_v36 }
 0x211   :  { %v4212_v50 = vpop.f32.mrf.mxu1  ;;  %v4232_v53 = vpop.f32.mrf.mxu0 }
 0x212   :  { %v981_v51 = vadd.f32 %v966_v46, %v851_v48  ;;  %v862_v52 = vadd.f32 %v4212_v50, %v4192_v39  ;;  %v995_v55 = vadd.f32 %v3594_v49, %v983_v47  ;;  %v4711_v46 = vld [vmem:[#allocation5 + $0xb8] sm:$0xff]   ;;  %v4713_v48 = vld [vmem:[#allocation5 + $0xb0] sm:$0xff]   ;;  %v4715_v50 = vld [vmem:[#allocation5 + $0xa8] sm:$0xff]  }
 0x213   :  { %v853_v54 = vpop.f32.mrf.mxu1  ;;  %v969_v60 = vpop.f32.mrf.mxu0  ;;  %v4712_v47 = vld [vmem:[#allocation2 + $0x2b8] sm:$0xff]  }
 0x214   :  { %v984_v56 = vadd.f32 %v4232_v53, %v862_v52  ;;  %v854_v57 = vadd.f32 %v853_v54, %v756_v41  ;;  %v993_v58 = vadd.f32 %v3594_v49, %v981_v51  ;;  %v5086_v62 = vmax.f32 %v995_v55, 0.0  ;;  %v4716_v51 = vld [vmem:[#allocation2 + $0x2a8] sm:$0xff]   ;;  %v4717_v52 = vld [vmem:[#allocation5 + $0xa0] sm:$0xff]   ;;  %v4719_v54 = vld [vmem:[#allocation5 + $0x98] sm:$0xff]  }
 0x215   :  { %v4718_v53 = vld [vmem:[#allocation2 + $0x2a0] sm:$0xff]   ;;  %v4720_v55 = vld [vmem:[#allocation2 + $0x298] sm:$0xff]  }
 0x216   :  { %v996_v59 = vadd.f32 %v3594_v49, %v984_v56  ;;  %v982_v61 = vadd.f32 %v969_v60, %v854_v57  ;;  %v5090_v0 = vmax.f32 %v993_v58, 0.0  ;;  %v1147_v4 = vrot.slane %v5086_v62, 1  ;;  %v4721_v56 = vld [vmem:[#allocation5 + $0x90] sm:$0xff]   ;;  %v4723_v58 = vld [vmem:[#allocation5 + $0x88] sm:$0xff]   ;;  %v4725_v60 = vld [vmem:[#allocation5 + $0x80] sm:$0xff]  }
 0x217   :  { %v1135_v36 = vrot.slane %v5086_v62, 7  ;;  %v4722_v57 = vld [vmem:[#allocation2 + $0x290] sm:$0xff]  }
 0x218   :  { %v5088_v63 = vmax.f32 %v996_v59, 0.0  ;;  %v994_v1 = vadd.f32 %v3594_v49, %v982_v61  ;;  %v1133_v5 = vrot.slane %v5090_v0, 7  ;;  %v1145_v9 = vrot.slane %v5090_v0, 1  ;;  %v4714_v49 = vld [vmem:[#allocation2 + $0x2b0] sm:$0xff]   ;;  %v4724_v59 = vld [vmem:[#allocation2 + $0x288] sm:$0xff]   ;;  %v4726_v61 = vld [vmem:[#allocation2 + $0x280] sm:$0xff]  }
 0x21a   :  { %v1136_v2 = vrot.slane %v5088_v63, 7  ;;  %v5093_v3 = vmax.f32 %v994_v1, 0.0  ;;  %v1002_v10 = vpack.c.bf16 %v5088_v63, %v5086_v62  ;;  %v1148_v34 = vrot.slane %v5088_v63, 1  ;;  %v5142_v62 = vld [vmem:[#allocation2 + $0x278] sm:$0xff]  }
 0x21b   :  { %v5144_v63 = vld [vmem:[#allocation2 + $0x2f8] sm:$0xff]  }
 0x21c   :  { %v1134_v6 = vrot.slane %v5093_v3, 7  ;;  %v1146_v7 = vrot.slane %v5093_v3, 1  ;;  %v1001_v8 = vpack.c.bf16 %v5093_v3, %v5090_v0  ;;  %v1140_v14 = vsel %vm83_vm1, %v1136_v2, %v1133_v5  ;;  %v3544_v0 = vld [vmem:[%s5489_s4] ss:$0 sm:$0xff] }
 0x21d   :  { %v1149_v39 = vsel %vm100_vm2, %v1147_v4, %v1148_v34  ;;  %v1152_v41 = vsel %vm100_vm2, %v1148_v34, %v1145_v9  ;;  %v1137_v43 = vsel %vm83_vm1, %v1135_v36, %v1136_v2  ;;  %v605_v1 = vadd.f32 %v5075_v33, %v3544_v0 }
 0x21e   :  { %4249 = vmatprep.mubr.bf16.mxu1 %v1001_v8  ;;  %4269 = vmatprep.mubr.bf16.mxu0 %v1001_v8  ;;  %v1139_v13 = vsel %vm83_vm1, %v1133_v5, %v1134_v6  ;;  %v1150_v15 = vsel %vm100_vm2, %v1146_v7, %v1147_v4  ;;  %v1151_v18 = vsel %vm100_vm2, %v1145_v9, %v1146_v7 }
 0x21f   :  { %4250 = vmatmul.mubr.bf16.vlgmr.msra.gmra.mxu1 %v1002_v10  ;;  %4270 = vmatmul.mubr.bf16.vlgmr.msra.gmra.mxu0 %v1002_v10  ;;  %v3623_v17 = vpack.c.bf16 %v1139_v13, %v1140_v14  ;;  %v3639_v19 = vpack.c.bf16 %v1150_v15, %v1151_v18  ;;  %v1138_v42 = vsel %vm83_vm1, %v1134_v6, %v1135_v36 }
 0x220   :  { %4274 = vmatpush3.bf16.msra.mxu1 %v4695_v31  ;;  %4294 = vmatpush3.bf16.msra.mxu0 %v4696_v32  ;;  %v4709_v31 = vld [vmem:[#allocation2 + $0x180] sm:$0xff]   ;;  %v3627_v44 = vpack.c.bf16 %v1137_v43, %v1138_v42  ;;  %v3643_v45 = vpack.c.bf16 %v1152_v41, %v1149_v39  ;;  %v597_v3 = vadd.f32 %v3544_v0, %v5077_v35 }
 0x221   :  { %4289 = vmatprep.mubr.msk.bf16.mxu1 %vm4983_vm4, %v3623_v17  ;;  %4275 = vmatprep.subr.bf16.mxu1 %v4697_v12  ;;  %v4710_v32 = vld [vmem:[#allocation2 + $0x200] sm:$0xff]   ;;  %v608_v6 = vadd.f32 %v5079_v38, %v3544_v0  ;;  %v600_v9 = vadd.f32 %v3544_v0, %v5081_v40  ;;  %v4732_v0 = vld [vmem:[#allocation2 + $0x2e8] sm:$0xff]  }
 0x222   :  { %4309 = vmatprep.mubr.msk.bf16.mxu0 %vm4994_vm6, %v3639_v19  ;;  %4295 = vmatprep.subr.bf16.mxu0 %v4698_v16  ;;  %v3646_v40 = vld [vmem:[%s5487_s2 + $0x2] ss:$0 sm:$0xff] }
 0x224   :  { %4276 = vmatpush3.bf16.msra.mxu1 %v4697_v12  ;;  %4296 = vmatpush3.bf16.msra.mxu0 %v4698_v16 }
 0x225   :  { %4277 = vmatprep.subr.bf16.mxu1 %v4699_v20  ;;  %4297 = vmatprep.subr.bf16.mxu0 %v4700_v21 }
 0x228   :  { %4278 = vmatpush3.bf16.msra.mxu1 %v4699_v20  ;;  %4298 = vmatpush3.bf16.msra.mxu0 %v4700_v21 }
 0x229   :  { %4279 = vmatprep.subr.bf16.mxu1 %v4701_v22  ;;  %4299 = vmatprep.subr.bf16.mxu0 %v4702_v23 }
 0x22c   :  { %4280 = vmatpush3.bf16.msra.mxu1 %v4701_v22  ;;  %4300 = vmatpush3.bf16.msra.mxu0 %v4702_v23 }
 0x22d   :  { %4281 = vmatprep.subr.bf16.mxu1 %v4703_v24  ;;  %4301 = vmatprep.subr.bf16.mxu0 %v4704_v26 }
 0x230   :  { %4282 = vmatpush3.bf16.msra.mxu1 %v4703_v24  ;;  %4302 = vmatpush3.bf16.msra.mxu0 %v4704_v26 }
 0x231   :  { %4283 = vmatprep.subr.bf16.mxu1 %v4705_v27  ;;  %4303 = vmatprep.subr.bf16.mxu0 %v4706_v28 }
 0x234   :  { %4284 = vmatpush3.bf16.msra.mxu1 %v4705_v27  ;;  %4304 = vmatpush3.bf16.msra.mxu0 %v4706_v28 }
 0x235   :  { %4285 = vmatprep.subr.bf16.mxu1 %v4707_v29  ;;  %4305 = vmatprep.subr.bf16.mxu0 %v4708_v30 }
 0x238   :  { %4286 = vmatpush3.bf16.msra.mxu1 %v4707_v29  ;;  %4306 = vmatpush3.bf16.msra.mxu0 %v4708_v30 }
 0x239   :  { %4287 = vmatprep.subr.bf16.mxu1 %v4709_v31  ;;  %4307 = vmatprep.subr.bf16.mxu0 %v4710_v32 }
 0x23c   :  { %4288 = vmatpush3.bf16.msra.mxu1 %v4709_v31  ;;  %4308 = vmatpush3.bf16.msra.mxu0 %v4710_v32 }
 0x23d   :  { %4313 = vmatprep.subr.bf16.mxu1 %v4711_v46  ;;  %4333 = vmatprep.subr.bf16.mxu0 %v4712_v47 }
 0x23f   :  { %4290 = vmatmul.mubr.msk.bf16.vlgmr.msra.gmra.mxu1 %vm4983_vm4, %v3627_v44  ;;  %4310 = vmatmul.mubr.msk.bf16.vlgmr.msra.gmra.mxu0 %vm4994_vm6, %v3643_v45 }
 0x240   :  { %4314 = vmatpush3.bf16.msra.mxu1 %v4711_v46  ;;  %4334 = vmatpush3.bf16.msra.mxu0 %v4712_v47 }
 0x241   :  { %4315 = vmatprep.subr.bf16.mxu1 %v4713_v48  ;;  %4335 = vmatprep.subr.bf16.mxu0 %v4714_v49 }
 0x244   :  { %4316 = vmatpush3.bf16.msra.mxu1 %v4713_v48  ;;  %4336 = vmatpush3.bf16.msra.mxu0 %v4714_v49 }
 0x245   :  { %4317 = vmatprep.subr.bf16.mxu1 %v4715_v50  ;;  %4337 = vmatprep.subr.bf16.mxu0 %v4716_v51 }
 0x248   :  { %4318 = vmatpush3.bf16.msra.mxu1 %v4715_v50  ;;  %4338 = vmatpush3.bf16.msra.mxu0 %v4716_v51 }
 0x249   :  { %4319 = vmatprep.subr.bf16.mxu1 %v4717_v52  ;;  %4339 = vmatprep.subr.bf16.mxu0 %v4718_v53 }
 0x24c   :  { %4320 = vmatpush3.bf16.msra.mxu1 %v4717_v52  ;;  %4340 = vmatpush3.bf16.msra.mxu0 %v4718_v53  ;;  %v4729_v53 = vld [vmem:[#allocation2 + $0x270] sm:$0xff]  }
 0x24d   :  { %4321 = vmatprep.subr.bf16.mxu1 %v4719_v54  ;;  %4341 = vmatprep.subr.bf16.mxu0 %v4720_v55 }
 0x250   :  { %4322 = vmatpush3.bf16.msra.mxu1 %v4719_v54  ;;  %4342 = vmatpush3.bf16.msra.mxu0 %v4720_v55 }
 0x251   :  { %4323 = vmatprep.subr.bf16.mxu1 %v4721_v56  ;;  %4343 = vmatprep.subr.bf16.mxu0 %v4722_v57 }
 0x254   :  { %4324 = vmatpush3.bf16.msra.mxu1 %v4721_v56  ;;  %4344 = vmatpush3.bf16.msra.mxu0 %v4722_v57  ;;  %v4730_v57 = vld [vmem:[#allocation2 + $0x2f0] sm:$0xff]  }
 0x255   :  { %4325 = vmatprep.subr.bf16.mxu1 %v4723_v58  ;;  %4345 = vmatprep.subr.bf16.mxu0 %v4724_v59 }
 0x258   :  { %4326 = vmatpush3.bf16.msra.mxu1 %v4723_v58  ;;  %4346 = vmatpush3.bf16.msra.mxu0 %v4724_v59 }
 0x259   :  { %4327 = vmatprep.subr.bf16.mxu1 %v4725_v60  ;;  %4347 = vmatprep.subr.bf16.mxu0 %v4726_v61 }
 0x25c   :  { %4328 = vmatpush3.bf16.msra.mxu1 %v4725_v60  ;;  %4348 = vmatpush3.bf16.msra.mxu0 %v4726_v61  ;;  %v4731_v61 = vld [vmem:[#allocation2 + $0x268] sm:$0xff]  }
 0x25d   :  { %4353 = vmatprep.subr.bf16.mxu1 %v5142_v62  ;;  %4373 = vmatprep.subr.bf16.mxu0 %v5144_v63 }
 0x2df   :  { %v4251_v2 = vpop.f32.mrf.mxu1  ;;  %v4271_v14 = vpop.f32.mrf.mxu0 }
 0x2e0   :  { %v5153_v4 = vadd.f32 %v4251_v2, %v605_v1  ;;  %v4733_v1 = vld [vmem:[#allocation2 + $0x260] sm:$0xff]  }
 0x2e1   :  { %v1102_v5 = vpop.f32.mrf.mxu1  ;;  %v1275_v33 = vpop.f32.mrf.mxu0  ;;  %v4734_v2 = vld [vmem:[#allocation2 + $0x2e0] sm:$0xff]  }
 0x2e2   :  { %v5156_v7 = vadd.f32 %v1102_v5, %v597_v3  ;;  %v4737_v3 = vld [vmem:[#allocation2 + $0x250] sm:$0xff]  }
 0x2e3   :  { %v4252_v8 = vpop.f32.mrf.mxu1  ;;  %v4272_v15 = vpop.f32.mrf.mxu0  ;;  %v4738_v5 = vld [vmem:[#allocation2 + $0x2d0] sm:$0xff]  }
 0x2e4   :  { %v5159_v10 = vadd.f32 %v4252_v8, %v608_v6  ;;  %v4739_v6 = vld [vmem:[#allocation2 + $0x248] sm:$0xff]  }
 0x2e5   :  { %v1105_v12 = vpop.f32.mrf.mxu1  ;;  %v1278_v16 = vpop.f32.mrf.mxu0  ;;  %v4740_v8 = vld [vmem:[#allocation2 + $0x2c8] sm:$0xff]  }
 0x2e6   :  { %v5161_v13 = vadd.f32 %v1105_v12, %v600_v9  ;;  %v4741_v9 = vld [vmem:[#allocation2 + $0x240] sm:$0xff]  }
 0x2e7   :  { %v4742_v12 = vld [vmem:[#allocation2 + $0x2c0] sm:$0xff]  }
 0x2ff   :  { %v4291_v35 = vpop.f32.mrf.mxu1  ;;  %v4311_v17 = vpop.f32.mrf.mxu0 }
 0x300   :  { %v1381_v18 = vadd.f32 %v4291_v35, %v4271_v14 }
 0x301   :  { %v1372_v19 = vpop.f32.mrf.mxu1  ;;  %v1488_v20 = vpop.f32.mrf.mxu0 }
 0x302   :  { %v1505_v38 = vadd.f32 %v4311_v17, %v1381_v18  ;;  %v1373_v21 = vadd.f32 %v1372_v19, %v1275_v33 }
 0x303   :  { %v4292_v22 = vpop.f32.mrf.mxu1  ;;  %v4312_v26 = vpop.f32.mrf.mxu0 }
 0x304   :  { %v1503_v23 = vadd.f32 %v1488_v20, %v1373_v21  ;;  %v1384_v24 = vadd.f32 %v4292_v22, %v4272_v15  ;;  %v1517_v28 = vadd.f32 %v3646_v40, %v1505_v38  ;;  %v4743_v20 = vld [vmem:[#allocation5 + $0xf8] sm:$0xff]   ;;  %v4745_v21 = vld [vmem:[#allocation5 + $0xf0] sm:$0xff]   ;;  %v4747_v22 = vld [vmem:[#allocation5 + $0xe8] sm:$0xff]  }
 0x305   :  { %v1375_v27 = vpop.f32.mrf.mxu1  ;;  %v1491_v34 = vpop.f32.mrf.mxu0  ;;  %v4744_v38 = vld [vmem:[#allocation2 + $0x378] sm:$0xff]  }
 0x306   :  { %v1506_v29 = vadd.f32 %v4312_v26, %v1384_v24  ;;  %v1376_v30 = vadd.f32 %v1375_v27, %v1278_v16  ;;  %v1515_v31 = vadd.f32 %v3646_v40, %v1503_v23  ;;  %v5166_v39 = vmax.f32 %v1517_v28, 0.0  ;;  %v4748_v23 = vld [vmem:[#allocation2 + $0x368] sm:$0xff]   ;;  %v4749_v24 = vld [vmem:[#allocation5 + $0xe0] sm:$0xff]   ;;  %v4751_v27 = vld [vmem:[#allocation5 + $0xd8] sm:$0xff]  }
 0x307   :  { %v4750_v26 = vld [vmem:[#allocation2 + $0x360] sm:$0xff]   ;;  %v4752_v28 = vld [vmem:[#allocation2 + $0x358] sm:$0xff]  }
 0x308   :  { %v1518_v32 = vadd.f32 %v3646_v40, %v1506_v29  ;;  %v1504_v36 = vadd.f32 %v1491_v34, %v1376_v30  ;;  %v5170_v42 = vmax.f32 %v1515_v31, 0.0  ;;  %v1669_v46 = vrot.slane %v5166_v39, 1  ;;  %v4753_v29 = vld [vmem:[#allocation5 + $0xd0] sm:$0xff]   ;;  %v4755_v31 = vld [vmem:[#allocation5 + $0xc8] sm:$0xff]   ;;  %v4757_v34 = vld [vmem:[#allocation5 + $0xc0] sm:$0xff]  }
 0x309   :  { %v1657_v33 = vrot.slane %v5166_v39, 7  ;;  %v4754_v30 = vld [vmem:[#allocation2 + $0x350] sm:$0xff]  }
 0x30a   :  { %v5168_v41 = vmax.f32 %v1518_v32, 0.0  ;;  %v1516_v43 = vadd.f32 %v3646_v40, %v1504_v36  ;;  %v1655_v47 = vrot.slane %v5170_v42, 7  ;;  %v1667_v51 = vrot.slane %v5170_v42, 1  ;;  %v4746_v40 = vld [vmem:[#allocation2 + $0x370] sm:$0xff]   ;;  %v4756_v32 = vld [vmem:[#allocation2 + $0x348] sm:$0xff]   ;;  %v4758_v36 = vld [vmem:[#allocation2 + $0x340] sm:$0xff]  }
 0x30c   :  { %v1658_v44 = vrot.slane %v5168_v41, 7  ;;  %v5173_v45 = vmax.f32 %v1516_v43, 0.0  ;;  %v1524_v52 = vpack.c.bf16 %v5168_v41, %v5166_v39  ;;  %v1670_v14 = vrot.slane %v5168_v41, 1  ;;  %v5224_v39 = vld [vmem:[#allocation2 + $0x338] sm:$0xff]  }
 0x30d   :  { %v5226_v41 = vld [vmem:[#allocation2 + $0x3b8] sm:$0xff]  }
 0x30e   :  { %v1656_v48 = vrot.slane %v5173_v45, 7  ;;  %v1668_v49 = vrot.slane %v5173_v45, 1  ;;  %v1523_v50 = vpack.c.bf16 %v5173_v45, %v5170_v42  ;;  %v1662_v55 = vsel %vm83_vm1, %v1658_v44, %v1655_v47  ;;  %v3604_v42 = vld [vmem:[%s5489_s4 + $0x1] ss:$0 sm:$0xff] }
 0x30f   :  { %v1671_v15 = vsel %vm100_vm2, %v1669_v46, %v1670_v14  ;;  %v1674_v16 = vsel %vm100_vm2, %v1670_v14, %v1667_v51  ;;  %v1659_v17 = vsel %vm83_vm1, %v1657_v33, %v1658_v44  ;;  %v1131_v43 = vadd.f32 %v3604_v42, %v5153_v4 }
 0x310   :  { %4329 = vmatprep.mubr.bf16.mxu1 %v1523_v50  ;;  %4349 = vmatprep.mubr.bf16.mxu0 %v1523_v50  ;;  %v1661_v54 = vsel %vm83_vm1, %v1655_v47, %v1656_v48  ;;  %v1672_v56 = vsel %vm100_vm2, %v1668_v49, %v1669_v46  ;;  %v1673_v59 = vsel %vm100_vm2, %v1667_v51, %v1668_v49 }
 0x311   :  { %4330 = vmatmul.mubr.bf16.vlgmr.msra.gmra.mxu1 %v1524_v52  ;;  %4350 = vmatmul.mubr.bf16.vlgmr.msra.gmra.mxu0 %v1524_v52  ;;  %v3675_v58 = vpack.c.bf16 %v1661_v54, %v1662_v55  ;;  %v3691_v60 = vpack.c.bf16 %v1672_v56, %v1673_v59  ;;  %v1660_v35 = vsel %vm83_vm1, %v1656_v48, %v1657_v33 }
 0x312   :  { %4354 = vmatpush3.bf16.msra.mxu1 %v5142_v62  ;;  %4374 = vmatpush3.bf16.msra.mxu0 %v5144_v63  ;;  %v4735_v62 = vld [vmem:[#allocation2 + $0x258] sm:$0xff]   ;;  %v3679_v18 = vpack.c.bf16 %v1659_v17, %v1660_v35  ;;  %v3695_v19 = vpack.c.bf16 %v1674_v16, %v1671_v15  ;;  %v1129_v46 = vadd.f32 %v3604_v42, %v5156_v7 }
 0x313   :  { %4369 = vmatprep.mubr.msk.bf16.mxu1 %vm4983_vm4, %v3675_v58  ;;  %4355 = vmatprep.subr.bf16.mxu1 %v4729_v53  ;;  %v4736_v63 = vld [vmem:[#allocation2 + $0x2d8] sm:$0xff]   ;;  %v1132_v49 = vadd.f32 %v3604_v42, %v5159_v10  ;;  %v1130_v52 = vadd.f32 %v3604_v42, %v5161_v13  ;;  %v3698_v10 = vld [vmem:[%s5487_s2 + $0x3] ss:$0 sm:$0xff]  ;;  %v4764_v42 = vld [vmem:[#allocation2 + $0x3a8] sm:$0xff]  }
 0x314   :  { %4389 = vmatprep.mubr.msk.bf16.mxu0 %vm4994_vm6, %v3691_v60  ;;  %4375 = vmatprep.subr.bf16.mxu0 %v4730_v57 }
 0x316   :  { %4356 = vmatpush3.bf16.msra.mxu1 %v4729_v53  ;;  %4376 = vmatpush3.bf16.msra.mxu0 %v4730_v57 }
 0x317   :  { %4357 = vmatprep.subr.bf16.mxu1 %v4731_v61  ;;  %4377 = vmatprep.subr.bf16.mxu0 %v4732_v0 }
 0x31a   :  { %4358 = vmatpush3.bf16.msra.mxu1 %v4731_v61  ;;  %4378 = vmatpush3.bf16.msra.mxu0 %v4732_v0 }
 0x31b   :  { %4359 = vmatprep.subr.bf16.mxu1 %v4733_v1  ;;  %4379 = vmatprep.subr.bf16.mxu0 %v4734_v2 }
 0x31e   :  { %4360 = vmatpush3.bf16.msra.mxu1 %v4733_v1  ;;  %4380 = vmatpush3.bf16.msra.mxu0 %v4734_v2 }
 0x31f   :  { %4361 = vmatprep.subr.bf16.mxu1 %v4735_v62  ;;  %4381 = vmatprep.subr.bf16.mxu0 %v4736_v63 }
 0x322   :  { %4362 = vmatpush3.bf16.msra.mxu1 %v4735_v62  ;;  %4382 = vmatpush3.bf16.msra.mxu0 %v4736_v63 }
 0x323   :  { %4363 = vmatprep.subr.bf16.mxu1 %v4737_v3  ;;  %4383 = vmatprep.subr.bf16.mxu0 %v4738_v5 }
 0x326   :  { %4364 = vmatpush3.bf16.msra.mxu1 %v4737_v3  ;;  %4384 = vmatpush3.bf16.msra.mxu0 %v4738_v5 }
 0x327   :  { %4365 = vmatprep.subr.bf16.mxu1 %v4739_v6  ;;  %4385 = vmatprep.subr.bf16.mxu0 %v4740_v8 }
 0x32a   :  { %4366 = vmatpush3.bf16.msra.mxu1 %v4739_v6  ;;  %4386 = vmatpush3.bf16.msra.mxu0 %v4740_v8 }
 0x32b   :  { %4367 = vmatprep.subr.bf16.mxu1 %v4741_v9  ;;  %4387 = vmatprep.subr.bf16.mxu0 %v4742_v12 }
 0x32e   :  { %4368 = vmatpush3.bf16.msra.mxu1 %v4741_v9  ;;  %4388 = vmatpush3.bf16.msra.mxu0 %v4742_v12 }
 0x32f   :  { %4393 = vmatprep.subr.bf16.mxu1 %v4743_v20  ;;  %4413 = vmatprep.subr.bf16.mxu0 %v4744_v38 }
 0x331   :  { %4370 = vmatmul.mubr.msk.bf16.vlgmr.msra.gmra.mxu1 %vm4983_vm4, %v3679_v18  ;;  %4390 = vmatmul.mubr.msk.bf16.vlgmr.msra.gmra.mxu0 %vm4994_vm6, %v3695_v19 }
 0x332   :  { %4394 = vmatpush3.bf16.msra.mxu1 %v4743_v20  ;;  %4414 = vmatpush3.bf16.msra.mxu0 %v4744_v38 }
 0x333   :  { %4395 = vmatprep.subr.bf16.mxu1 %v4745_v21  ;;  %4415 = vmatprep.subr.bf16.mxu0 %v4746_v40 }
 0x336   :  { %4396 = vmatpush3.bf16.msra.mxu1 %v4745_v21  ;;  %4416 = vmatpush3.bf16.msra.mxu0 %v4746_v40 }
 0x337   :  { %4397 = vmatprep.subr.bf16.mxu1 %v4747_v22  ;;  %4417 = vmatprep.subr.bf16.mxu0 %v4748_v23 }
 0x33a   :  { %4398 = vmatpush3.bf16.msra.mxu1 %v4747_v22  ;;  %4418 = vmatpush3.bf16.msra.mxu0 %v4748_v23 }
 0x33b   :  { %4399 = vmatprep.subr.bf16.mxu1 %v4749_v24  ;;  %4419 = vmatprep.subr.bf16.mxu0 %v4750_v26 }
 0x33e   :  { %4400 = vmatpush3.bf16.msra.mxu1 %v4749_v24  ;;  %4420 = vmatpush3.bf16.msra.mxu0 %v4750_v26  ;;  %v4761_v26 = vld [vmem:[#allocation2 + $0x330] sm:$0xff]  }
 0x33f   :  { %4401 = vmatprep.subr.bf16.mxu1 %v4751_v27  ;;  %4421 = vmatprep.subr.bf16.mxu0 %v4752_v28 }
 0x342   :  { %4402 = vmatpush3.bf16.msra.mxu1 %v4751_v27  ;;  %4422 = vmatpush3.bf16.msra.mxu0 %v4752_v28 }
 0x343   :  { %4403 = vmatprep.subr.bf16.mxu1 %v4753_v29  ;;  %4423 = vmatprep.subr.bf16.mxu0 %v4754_v30 }
 0x346   :  { %4404 = vmatpush3.bf16.msra.mxu1 %v4753_v29  ;;  %4424 = vmatpush3.bf16.msra.mxu0 %v4754_v30  ;;  %v4762_v30 = vld [vmem:[#allocation2 + $0x3b0] sm:$0xff]  }
 0x347   :  { %4405 = vmatprep.subr.bf16.mxu1 %v4755_v31  ;;  %4425 = vmatprep.subr.bf16.mxu0 %v4756_v32 }
 0x34a   :  { %4406 = vmatpush3.bf16.msra.mxu1 %v4755_v31  ;;  %4426 = vmatpush3.bf16.msra.mxu0 %v4756_v32 }
 0x34b   :  { %4407 = vmatprep.subr.bf16.mxu1 %v4757_v34  ;;  %4427 = vmatprep.subr.bf16.mxu0 %v4758_v36 }
 0x34e   :  { %4408 = vmatpush3.bf16.msra.mxu1 %v4757_v34  ;;  %4428 = vmatpush3.bf16.msra.mxu0 %v4758_v36  ;;  %v4763_v36 = vld [vmem:[#allocation2 + $0x328] sm:$0xff]  }
 0x34f   :  { %4433 = vmatprep.subr.bf16.mxu1 %v5224_v39  ;;  %4453 = vmatprep.subr.bf16.mxu0 %v5226_v41 }
 0x3d1   :  { %v4331_v44 = vpop.f32.mrf.mxu1  ;;  %v4351_v55 = vpop.f32.mrf.mxu0 }
 0x3d2   :  { %v5234_v45 = vadd.f32 %v4331_v44, %v1131_v43  ;;  %v4765_v43 = vld [vmem:[#allocation2 + $0x320] sm:$0xff]  }
 0x3d3   :  { %v1624_v47 = vpop.f32.mrf.mxu1  ;;  %v1797_v4 = vpop.f32.mrf.mxu0  ;;  %v4766_v44 = vld [vmem:[#allocation2 + $0x3a0] sm:$0xff]  }
 0x3d4   :  { %v5237_v48 = vadd.f32 %v1624_v47, %v1129_v46  ;;  %v4769_v46 = vld [vmem:[#allocation2 + $0x310] sm:$0xff]  }
 0x3d5   :  { %v4332_v50 = vpop.f32.mrf.mxu1  ;;  %v4352_v56 = vpop.f32.mrf.mxu0  ;;  %v4770_v47 = vld [vmem:[#allocation2 + $0x390] sm:$0xff]  }
 0x3d6   :  { %v5240_v51 = vadd.f32 %v4332_v50, %v1132_v49  ;;  %v4771_v49 = vld [vmem:[#allocation2 + $0x308] sm:$0xff]  }
 0x3d7   :  { %v1627_v53 = vpop.f32.mrf.mxu1  ;;  %v1800_v57 = vpop.f32.mrf.mxu0  ;;  %v4772_v50 = vld [vmem:[#allocation2 + $0x388] sm:$0xff]  }
 0x3d8   :  { %v5243_v54 = vadd.f32 %v1627_v53, %v1130_v52  ;;  %v4773_v52 = vld [vmem:[#allocation2 + $0x300] sm:$0xff]  }
 0x3d9   :  { %v4774_v53 = vld [vmem:[#allocation2 + $0x380] sm:$0xff]  }
 0x3f1   :  { %v4371_v58 = vpop.f32.mrf.mxu1  ;;  %v4391_v59 = vpop.f32.mrf.mxu0 }
 0x3f2   :  { %v1903_v7 = vadd.f32 %v4371_v58, %v4351_v55 }
 0x3f3   :  { %v1894_v60 = vpop.f32.mrf.mxu1  ;;  %v2010_v61 = vpop.f32.mrf.mxu0 }
 0x3f4   :  { %v2027_v0 = vadd.f32 %v4391_v59, %v1903_v7  ;;  %v1895_v1 = vadd.f32 %v1894_v60, %v1797_v4 }
 0x3f5   :  { %v4372_v2 = vpop.f32.mrf.mxu1  ;;  %v4392_v63 = vpop.f32.mrf.mxu0 }
 0x3f6   :  { %v2025_v13 = vadd.f32 %v2010_v61, %v1895_v1  ;;  %v1906_v62 = vadd.f32 %v4372_v2, %v4352_v56  ;;  %v2039_v5 = vadd.f32 %v3698_v10, %v2027_v0  ;;  %v4775_v61 = vld [vmem:[#allocation5 + $0x138] sm:$0xff]   ;;  %v4777_v1 = vld [vmem:[#allocation5 + $0x130] sm:$0xff]   ;;  %v4779_v2 = vld [vmem:[#allocation5 + $0x128] sm:$0xff]  }
 0x3f7   :  { %v1897_v3 = vpop.f32.mrf.mxu1  ;;  %v2013_v14 = vpop.f32.mrf.mxu0  ;;  %v4776_v0 = vld [vmem:[#allocation2 + $0x438] sm:$0xff]  }
 0x3f8   :  { %v2028_v6 = vadd.f32 %v4392_v63, %v1906_v62  ;;  %v1898_v8 = vadd.f32 %v1897_v3, %v1800_v57  ;;  %v2037_v9 = vadd.f32 %v3698_v10, %v2025_v13  ;;  %v5248_v15 = vmax.f32 %v2039_v5, 0.0  ;;  %v4780_v13 = vld [vmem:[#allocation2 + $0x428] sm:$0xff]   ;;  %v4781_v62 = vld [vmem:[#allocation5 + $0x120] sm:$0xff]   ;;  %v4783_v3 = vld [vmem:[#allocation5 + $0x118] sm:$0xff]  }
 0x3f9   :  { %v4782_v63 = vld [vmem:[#allocation2 + $0x420] sm:$0xff]   ;;  %v4784_v5 = vld [vmem:[#allocation2 + $0x418] sm:$0xff]  }
 0x3fa   :  { %v2040_v12 = vadd.f32 %v3698_v10, %v2028_v6  ;;  %v2026_v33 = vadd.f32 %v2013_v14, %v1898_v8  ;;  %v5252_v35 = vmax.f32 %v2037_v9, 0.0  ;;  %v2191_v20 = vrot.slane %v5248_v15, 1  ;;  %v4785_v6 = vld [vmem:[#allocation5 + $0x110] sm:$0xff]   ;;  %v4787_v9 = vld [vmem:[#allocation5 + $0x108] sm:$0xff]   ;;  %v4789_v14 = vld [vmem:[#allocation5 + $0x100] sm:$0xff]  }
 0x3fb   :  { %v2179_v4 = vrot.slane %v5248_v15, 7  ;;  %v4786_v8 = vld [vmem:[#allocation2 + $0x410] sm:$0xff]  }
 0x3fc   :  { %v5250_v16 = vmax.f32 %v2040_v12, 0.0  ;;  %v2038_v17 = vadd.f32 %v3698_v10, %v2026_v33  ;;  %v2177_v38 = vrot.slane %v5252_v35, 7  ;;  %v2189_v23 = vrot.slane %v5252_v35, 1  ;;  %v4778_v10 = vld [vmem:[#allocation2 + $0x430] sm:$0xff]   ;;  %v4788_v12 = vld [vmem:[#allocation2 + $0x408] sm:$0xff]   ;;  %v4790_v33 = vld [vmem:[#allocation2 + $0x400] sm:$0xff]  }
 0x3fe   :  { %v2180_v18 = vrot.slane %v5250_v16, 7  ;;  %v5255_v19 = vmax.f32 %v2038_v17, 0.0  ;;  %v2046_v24 = vpack.c.bf16 %v5250_v16, %v5248_v15  ;;  %v2192_v55 = vrot.slane %v5250_v16, 1  ;;  %v5306_v15 = vld [vmem:[#allocation2 + $0x3f8] sm:$0xff]  }
 0x3ff   :  { %v5308_v16 = vld [vmem:[#allocation2 + $0x478] sm:$0xff]  }
 0x400   :  { %v2178_v21 = vrot.slane %v5255_v19, 7  ;;  %v2190_v40 = vrot.slane %v5255_v19, 1  ;;  %v2045_v22 = vpack.c.bf16 %v5255_v19, %v5252_v35  ;;  %v2184_v28 = vsel %vm83_vm1, %v2180_v18, %v2177_v38  ;;  %v3656_v35 = vld [vmem:[%s5489_s4 + $0x2] ss:$0 sm:$0xff] }
 0x401   :  { %v2193_v56 = vsel %vm100_vm2, %v2191_v20, %v2192_v55  ;;  %v2196_v57 = vsel %vm100_vm2, %v2192_v55, %v2189_v23  ;;  %v2181_v59 = vsel %vm83_vm1, %v2179_v4, %v2180_v18  ;;  %v1653_v17 = vadd.f32 %v3656_v35, %v5234_v45 }
 0x402   :  { %4409 = vmatprep.mubr.bf16.mxu1 %v2045_v22  ;;  %4429 = vmatprep.mubr.bf16.mxu0 %v2045_v22  ;;  %v2183_v27 = vsel %vm83_vm1, %v2177_v38, %v2178_v21  ;;  %v2194_v29 = vsel %vm100_vm2, %v2190_v40, %v2191_v20  ;;  %v2195_v32 = vsel %vm100_vm2, %v2189_v23, %v2190_v40 }
 0x403   :  { %4410 = vmatmul.mubr.bf16.vlgmr.msra.gmra.mxu1 %v2046_v24  ;;  %4430 = vmatmul.mubr.bf16.vlgmr.msra.gmra.mxu0 %v2046_v24  ;;  %v3727_v31 = vpack.c.bf16 %v2183_v27, %v2184_v28  ;;  %v3743_v34 = vpack.c.bf16 %v2194_v29, %v2195_v32  ;;  %v2182_v58 = vsel %vm83_vm1, %v2178_v21, %v2179_v4 }
 0x404   :  { %4434 = vmatpush3.bf16.msra.mxu1 %v5224_v39  ;;  %4454 = vmatpush3.bf16.msra.mxu0 %v5226_v41  ;;  %v4767_v39 = vld [vmem:[#allocation2 + $0x318] sm:$0xff]   ;;  %v3731_v7 = vpack.c.bf16 %v2181_v59, %v2182_v58  ;;  %v3747_v60 = vpack.c.bf16 %v2196_v57, %v2193_v56  ;;  %v1651_v20 = vadd.f32 %v3656_v35, %v5237_v48 }
 0x405   :  { %4449 = vmatprep.mubr.msk.bf16.mxu1 %vm4983_vm4, %v3727_v31  ;;  %4435 = vmatprep.subr.bf16.mxu1 %v4761_v26  ;;  %v4768_v41 = vld [vmem:[#allocation2 + $0x398] sm:$0xff]   ;;  %v1654_v40 = vadd.f32 %v3656_v35, %v5240_v51  ;;  %v1652_v24 = vadd.f32 %v3656_v35, %v5243_v54  ;;  %v3750_v51 = vld [vmem:[%s5487_s2 + $0x4] ss:$0 sm:$0xff]  ;;  %v4796_v35 = vld [vmem:[#allocation2 + $0x468] sm:$0xff]  }
 0x406   :  { %4469 = vmatprep.mubr.msk.bf16.mxu0 %vm4994_vm6, %v3743_v34  ;;  %4455 = vmatprep.subr.bf16.mxu0 %v4762_v30 }
 0x408   :  { %4436 = vmatpush3.bf16.msra.mxu1 %v4761_v26  ;;  %4456 = vmatpush3.bf16.msra.mxu0 %v4762_v30 }
 0x409   :  { %4437 = vmatprep.subr.bf16.mxu1 %v4763_v36  ;;  %4457 = vmatprep.subr.bf16.mxu0 %v4764_v42 }
 0x40c   :  { %4438 = vmatpush3.bf16.msra.mxu1 %v4763_v36  ;;  %4458 = vmatpush3.bf16.msra.mxu0 %v4764_v42 }
 0x40d   :  { %4439 = vmatprep.subr.bf16.mxu1 %v4765_v43  ;;  %4459 = vmatprep.subr.bf16.mxu0 %v4766_v44 }
 0x410   :  { %4440 = vmatpush3.bf16.msra.mxu1 %v4765_v43  ;;  %4460 = vmatpush3.bf16.msra.mxu0 %v4766_v44 }
 0x411   :  { %4441 = vmatprep.subr.bf16.mxu1 %v4767_v39  ;;  %4461 = vmatprep.subr.bf16.mxu0 %v4768_v41 }
 0x414   :  { %4442 = vmatpush3.bf16.msra.mxu1 %v4767_v39  ;;  %4462 = vmatpush3.bf16.msra.mxu0 %v4768_v41 }
 0x415   :  { %4443 = vmatprep.subr.bf16.mxu1 %v4769_v46  ;;  %4463 = vmatprep.subr.bf16.mxu0 %v4770_v47 }
 0x418   :  { %4444 = vmatpush3.bf16.msra.mxu1 %v4769_v46  ;;  %4464 = vmatpush3.bf16.msra.mxu0 %v4770_v47 }
 0x419   :  { %4445 = vmatprep.subr.bf16.mxu1 %v4771_v49  ;;  %4465 = vmatprep.subr.bf16.mxu0 %v4772_v50 }
 0x41c   :  { %4446 = vmatpush3.bf16.msra.mxu1 %v4771_v49  ;;  %4466 = vmatpush3.bf16.msra.mxu0 %v4772_v50 }
 0x41d   :  { %4447 = vmatprep.subr.bf16.mxu1 %v4773_v52  ;;  %4467 = vmatprep.subr.bf16.mxu0 %v4774_v53 }
 0x420   :  { %4448 = vmatpush3.bf16.msra.mxu1 %v4773_v52  ;;  %4468 = vmatpush3.bf16.msra.mxu0 %v4774_v53 }
 0x421   :  { %4473 = vmatprep.subr.bf16.mxu1 %v4775_v61  ;;  %4493 = vmatprep.subr.bf16.mxu0 %v4776_v0 }
 0x423   :  { %4450 = vmatmul.mubr.msk.bf16.vlgmr.msra.gmra.mxu1 %vm4983_vm4, %v3731_v7  ;;  %4470 = vmatmul.mubr.msk.bf16.vlgmr.msra.gmra.mxu0 %vm4994_vm6, %v3747_v60 }
 0x424   :  { %4474 = vmatpush3.bf16.msra.mxu1 %v4775_v61  ;;  %4494 = vmatpush3.bf16.msra.mxu0 %v4776_v0 }
 0x425   :  { %4475 = vmatprep.subr.bf16.mxu1 %v4777_v1  ;;  %4495 = vmatprep.subr.bf16.mxu0 %v4778_v10 }
 0x428   :  { %4476 = vmatpush3.bf16.msra.mxu1 %v4777_v1  ;;  %4496 = vmatpush3.bf16.msra.mxu0 %v4778_v10 }
 0x429   :  { %4477 = vmatprep.subr.bf16.mxu1 %v4779_v2  ;;  %4497 = vmatprep.subr.bf16.mxu0 %v4780_v13 }
 0x42c   :  { %4478 = vmatpush3.bf16.msra.mxu1 %v4779_v2  ;;  %4498 = vmatpush3.bf16.msra.mxu0 %v4780_v13 }
 0x42d   :  { %4479 = vmatprep.subr.bf16.mxu1 %v4781_v62  ;;  %4499 = vmatprep.subr.bf16.mxu0 %v4782_v63 }
 0x430   :  { %4480 = vmatpush3.bf16.msra.mxu1 %v4781_v62  ;;  %4500 = vmatpush3.bf16.msra.mxu0 %v4782_v63  ;;  %v4793_v63 = vld [vmem:[#allocation2 + $0x3f0] sm:$0xff]  }
 0x431   :  { %4481 = vmatprep.subr.bf16.mxu1 %v4783_v3  ;;  %4501 = vmatprep.subr.bf16.mxu0 %v4784_v5 }
 0x434   :  { %4482 = vmatpush3.bf16.msra.mxu1 %v4783_v3  ;;  %4502 = vmatpush3.bf16.msra.mxu0 %v4784_v5 }
 0x435   :  { %4483 = vmatprep.subr.bf16.mxu1 %v4785_v6  ;;  %4503 = vmatprep.subr.bf16.mxu0 %v4786_v8 }
 0x438   :  { %4484 = vmatpush3.bf16.msra.mxu1 %v4785_v6  ;;  %4504 = vmatpush3.bf16.msra.mxu0 %v4786_v8  ;;  %v4794_v8 = vld [vmem:[#allocation2 + $0x470] sm:$0xff]  }
 0x439   :  { %4485 = vmatprep.subr.bf16.mxu1 %v4787_v9  ;;  %4505 = vmatprep.subr.bf16.mxu0 %v4788_v12 }
 0x43c   :  { %4486 = vmatpush3.bf16.msra.mxu1 %v4787_v9  ;;  %4506 = vmatpush3.bf16.msra.mxu0 %v4788_v12 }
 0x43d   :  { %4487 = vmatprep.subr.bf16.mxu1 %v4789_v14  ;;  %4507 = vmatprep.subr.bf16.mxu0 %v4790_v33 }
 0x440   :  { %4488 = vmatpush3.bf16.msra.mxu1 %v4789_v14  ;;  %4508 = vmatpush3.bf16.msra.mxu0 %v4790_v33  ;;  %v4795_v33 = vld [vmem:[#allocation2 + $0x3e8] sm:$0xff]  }
 0x441   :  { %4513 = vmatprep.subr.bf16.mxu1 %v5306_v15  ;;  %4533 = vmatprep.subr.bf16.mxu0 %v5308_v16 }
 0x4c3   :  { %v4411_v18 = vpop.f32.mrf.mxu1  ;;  %v4431_v28 = vpop.f32.mrf.mxu0 }
 0x4c4   :  { %v5316_v19 = vadd.f32 %v4411_v18, %v1653_v17  ;;  %v4797_v17 = vld [vmem:[#allocation2 + $0x3e0] sm:$0xff]  }
 0x4c5   :  { %v2146_v38 = vpop.f32.mrf.mxu1  ;;  %v2319_v45 = vpop.f32.mrf.mxu0  ;;  %v4798_v18 = vld [vmem:[#allocation2 + $0x460] sm:$0xff]  }
 0x4c6   :  { %v5319_v21 = vadd.f32 %v2146_v38, %v1651_v20  ;;  %v4801_v20 = vld [vmem:[#allocation2 + $0x3d0] sm:$0xff]  }
 0x4c7   :  { %v4412_v22 = vpop.f32.mrf.mxu1  ;;  %v4432_v29 = vpop.f32.mrf.mxu0  ;;  %v4802_v38 = vld [vmem:[#allocation2 + $0x450] sm:$0xff]  }
 0x4c8   :  { %v5322_v23 = vadd.f32 %v4412_v22, %v1654_v40  ;;  %v4803_v40 = vld [vmem:[#allocation2 + $0x3c8] sm:$0xff]  }
 0x4c9   :  { %v2149_v26 = vpop.f32.mrf.mxu1  ;;  %v2322_v30 = vpop.f32.mrf.mxu0  ;;  %v4804_v22 = vld [vmem:[#allocation2 + $0x448] sm:$0xff]  }
 0x4ca   :  { %v5325_v27 = vadd.f32 %v2149_v26, %v1652_v24  ;;  %v4805_v24 = vld [vmem:[#allocation2 + $0x3c0] sm:$0xff]  }
 0x4cb   :  { %v4806_v26 = vld [vmem:[#allocation2 + $0x440] sm:$0xff]  }
 0x4e3   :  { %v4451_v31 = vpop.f32.mrf.mxu1  ;;  %v4471_v32 = vpop.f32.mrf.mxu0 }
 0x4e4   :  { %v2425_v48 = vadd.f32 %v4451_v31, %v4431_v28 }
 0x4e5   :  { %v2416_v34 = vpop.f32.mrf.mxu1  ;;  %v2532_v36 = vpop.f32.mrf.mxu0 }
 0x4e6   :  { %v2549_v42 = vadd.f32 %v4471_v32, %v2425_v48  ;;  %v2417_v43 = vadd.f32 %v2416_v34, %v2319_v45 }
 0x4e7   :  { %v4452_v44 = vpop.f32.mrf.mxu1  ;;  %v4472_v41 = vpop.f32.mrf.mxu0 }
 0x4e8   :  { %v2547_v54 = vadd.f32 %v2532_v36, %v2417_v43  ;;  %v2428_v39 = vadd.f32 %v4452_v44, %v4432_v29  ;;  %v2561_v47 = vadd.f32 %v3750_v51, %v2549_v42  ;;  %v4807_v36 = vld [vmem:[#allocation5 + $0x178] sm:$0xff]   ;;  %v4809_v43 = vld [vmem:[#allocation5 + $0x170] sm:$0xff]   ;;  %v4814_v44 = vld [vmem:[%s5490_s5 + $0x20] sm:$0xff]  }
 0x4e9   :  { %v2419_v46 = vpop.f32.mrf.mxu1  ;;  %v2535_v55 = vpop.f32.mrf.mxu0  ;;  %v4808_v42 = vld [vmem:[%s5490_s5 + $0x38] sm:$0xff]  }
 0x4ea   :  { %v2550_v49 = vadd.f32 %v4472_v41, %v2428_v39  ;;  %v2420_v50 = vadd.f32 %v2419_v46, %v2322_v30  ;;  %v2559_v52 = vadd.f32 %v3750_v51, %v2547_v54  ;;  %v5330_v56 = vmax.f32 %v2561_v47, 0.0  ;;  %v4815_v54 = vld [vmem:[#allocation5 + $0x158] sm:$0xff]   ;;  %v4817_v41 = vld [vmem:[#allocation5 + $0x150] sm:$0xff]   ;;  %v4819_v47 = vld [vmem:[#allocation5 + $0x148] sm:$0xff]  }
 0x4eb   :  { %v4816_v39 = vld [vmem:[%s5490_s5 + $0x18] sm:$0xff]   ;;  %v4818_v46 = vld [vmem:[%s5490_s5 + $0x10] sm:$0xff]  }
 0x4ec   :  { %v2562_v53 = vadd.f32 %v3750_v51, %v2550_v49  ;;  %v2548_v4 = vadd.f32 %v2535_v55, %v2420_v50  ;;  %v5334_v58 = vmax.f32 %v2559_v52, 0.0  ;;  %v2713_v61 = vrot.slane %v5330_v56, 1  ;;  %v4820_v49 = vld [vmem:[%s5490_s5 + $0x8] sm:$0xff]   ;;  %v4821_v50 = vld [vmem:[#allocation5 + $0x140] sm:$0xff]  }
 0x4ed   :  { %v2701_v45 = vrot.slane %v5330_v56, 7  ;;  %v4822_v52 = vld [vmem:[%s5490_s5] sm:$0xff]  }
 0x4ee   :  { %v5332_v57 = vmax.f32 %v2562_v53, 0.0  ;;  %v2560_v59 = vadd.f32 %v3750_v51, %v2548_v4  ;;  %v2699_v0 = vrot.slane %v5334_v58, 7  ;;  %v2711_v13 = vrot.slane %v5334_v58, 1  ;;  %v4813_v51 = vld [vmem:[#allocation5 + $0x160] sm:$0xff]   ;;  %v4823_v53 = vld [vmem:[%s5492_s7 + $0x38] sm:$0xff]  }
 0x4ef   :  { %v3708_v55 = vld [vmem:[%s5489_s4 + $0x3] ss:$0 sm:$0xff] }
 0x4f0   :  { %v2702_v7 = vrot.slane %v5332_v57, 7  ;;  %v5337_v60 = vmax.f32 %v2560_v59, 0.0  ;;  %v2568_v62 = vpack.c.bf16 %v5332_v57, %v5330_v56  ;;  %v2714_v28 = vrot.slane %v5332_v57, 1 }
 0x4f1   :  { %v2175_v4 = vadd.f32 %v3708_v55, %v5316_v19 }
 0x4f2   :  { %v2700_v1 = vrot.slane %v5337_v60, 7  ;;  %v2712_v10 = vrot.slane %v5337_v60, 1  ;;  %v2567_v2 = vpack.c.bf16 %v5337_v60, %v5334_v58  ;;  %v2706_v5 = vsel %vm83_vm1, %v2702_v7, %v2699_v0 }
 0x4f3   :  { %v2715_v29 = vsel %vm100_vm2, %v2713_v61, %v2714_v28  ;;  %v2718_v30 = vsel %vm100_vm2, %v2714_v28, %v2711_v13  ;;  %v2703_v32 = vsel %vm83_vm1, %v2701_v45, %v2702_v7  ;;  %v2173_v58 = vadd.f32 %v3708_v55, %v5319_v21 }
 0x4f4   :  { %4489 = vmatprep.mubr.bf16.mxu1 %v2567_v2  ;;  %4509 = vmatprep.mubr.bf16.mxu0 %v2567_v2  ;;  %v2705_v3 = vsel %vm83_vm1, %v2699_v0, %v2700_v1  ;;  %v2716_v6 = vsel %vm100_vm2, %v2712_v10, %v2713_v61  ;;  %v2717_v12 = vsel %vm100_vm2, %v2711_v13, %v2712_v10 }
 0x4f5   :  { %4490 = vmatmul.mubr.bf16.vlgmr.msra.gmra.mxu1 %v2568_v62  ;;  %4510 = vmatmul.mubr.bf16.vlgmr.msra.gmra.mxu0 %v2568_v62  ;;  %v3779_v9 = vpack.c.bf16 %v2705_v3, %v2706_v5  ;;  %v3795_v14 = vpack.c.bf16 %v2716_v6, %v2717_v12  ;;  %v2704_v31 = vsel %vm83_vm1, %v2700_v1, %v2701_v45 }
 0x4f6   :  { %4514 = vmatpush3.bf16.msra.mxu1 %v5306_v15  ;;  %4534 = vmatpush3.bf16.msra.mxu0 %v5308_v16  ;;  %v4799_v15 = vld [vmem:[#allocation2 + $0x3d8] sm:$0xff]   ;;  %v3783_v48 = vpack.c.bf16 %v2703_v32, %v2704_v31  ;;  %v3799_v34 = vpack.c.bf16 %v2718_v30, %v2715_v29  ;;  %v2176_v60 = vadd.f32 %v3708_v55, %v5322_v23  ;;  %v4824_v32 = vld [vmem:[%s5492_s7 + $0x30] sm:$0xff]  }
 0x4f7   :  { %4529 = vmatprep.mubr.msk.bf16.mxu1 %vm4983_vm4, %v3779_v9  ;;  %4515 = vmatprep.subr.bf16.mxu1 %v4793_v63  ;;  %v4800_v16 = vld [vmem:[#allocation2 + $0x458] sm:$0xff]   ;;  %v2174_v1 = vadd.f32 %v3708_v55, %v5325_v27  ;;  %v3802_v27 = vld [vmem:[%s5487_s2 + $0x5] ss:$0 sm:$0xff] }
 0x4f8   :  { %4549 = vmatprep.mubr.msk.bf16.mxu0 %vm4994_vm6, %v3795_v14  ;;  %4535 = vmatprep.subr.bf16.mxu0 %v4794_v8 }
 0x4fa   :  { %4516 = vmatpush3.bf16.msra.mxu1 %v4793_v63  ;;  %4536 = vmatpush3.bf16.msra.mxu0 %v4794_v8 }
 0x4fb   :  { %4517 = vmatprep.subr.bf16.mxu1 %v4795_v33  ;;  %4537 = vmatprep.subr.bf16.mxu0 %v4796_v35 }
 0x4fe   :  { %4518 = vmatpush3.bf16.msra.mxu1 %v4795_v33  ;;  %4538 = vmatpush3.bf16.msra.mxu0 %v4796_v35 }
 0x4ff   :  { %4519 = vmatprep.subr.bf16.mxu1 %v4797_v17  ;;  %4539 = vmatprep.subr.bf16.mxu0 %v4798_v18 }
 0x502   :  { %4520 = vmatpush3.bf16.msra.mxu1 %v4797_v17  ;;  %4540 = vmatpush3.bf16.msra.mxu0 %v4798_v18 }
 0x503   :  { %4521 = vmatprep.subr.bf16.mxu1 %v4799_v15  ;;  %4541 = vmatprep.subr.bf16.mxu0 %v4800_v16 }
 0x506   :  { %4522 = vmatpush3.bf16.msra.mxu1 %v4799_v15  ;;  %4542 = vmatpush3.bf16.msra.mxu0 %v4800_v16 }
 0x507   :  { %4523 = vmatprep.subr.bf16.mxu1 %v4801_v20  ;;  %4543 = vmatprep.subr.bf16.mxu0 %v4802_v38 }
 0x50a   :  { %4524 = vmatpush3.bf16.msra.mxu1 %v4801_v20  ;;  %4544 = vmatpush3.bf16.msra.mxu0 %v4802_v38 }
 0x50b   :  { %4525 = vmatprep.subr.bf16.mxu1 %v4803_v40  ;;  %4545 = vmatprep.subr.bf16.mxu0 %v4804_v22 }
 0x50e   :  { %4526 = vmatpush3.bf16.msra.mxu1 %v4803_v40  ;;  %4546 = vmatpush3.bf16.msra.mxu0 %v4804_v22 }
 0x50f   :  { %4527 = vmatprep.subr.bf16.mxu1 %v4805_v24  ;;  %4547 = vmatprep.subr.bf16.mxu0 %v4806_v26 }
 0x512   :  { %4528 = vmatpush3.bf16.msra.mxu1 %v4805_v24  ;;  %4548 = vmatpush3.bf16.msra.mxu0 %v4806_v26 }
 0x513   :  { %4553 = vmatprep.subr.bf16.mxu1 %v4807_v36  ;;  %4573 = vmatprep.subr.bf16.mxu0 %v4808_v42 }
 0x515   :  { %4530 = vmatmul.mubr.msk.bf16.vlgmr.msra.gmra.mxu1 %vm4983_vm4, %v3783_v48  ;;  %4550 = vmatmul.mubr.msk.bf16.vlgmr.msra.gmra.mxu0 %vm4994_vm6, %v3799_v34  ;;  %v4825_v48 = vld [vmem:[%s5492_s7 + $0x28] sm:$0xff]   ;;  %v4826_v34 = vld [vmem:[%s5492_s7 + $0x20] sm:$0xff]  }
 0x516   :  { %4554 = vmatpush3.bf16.msra.mxu1 %v4807_v36  ;;  %4574 = vmatpush3.bf16.msra.mxu0 %v4808_v42  ;;  %v4827_v36 = vld [vmem:[%s5492_s7 + $0x18] sm:$0xff]   ;;  %v4828_v42 = vld [vmem:[%s5492_s7 + $0x10] sm:$0xff]  }
 0x517   :  { %4555 = vmatprep.subr.bf16.mxu1 %v4809_v43  ;;  %4575 = vmatprep.subr.bf16.mxu0 %v4810_v11 }
 0x51a   :  { %4556 = vmatpush3.bf16.msra.mxu1 %v4809_v43  ;;  %4576 = vmatpush3.bf16.msra.mxu0 %v4810_v11  ;;  %v4829_v43 = vld [vmem:[%s5492_s7 + $0x8] sm:$0xff]   ;;  %v4830_v11 = vld [vmem:[%s5492_s7] sm:$0xff]   ;;  %s4904_s7 = smov [#allocation7]  }
 0x51b   :  { %4557 = vmatprep.subr.bf16.mxu1 %v4811_v25  ;;  %4577 = vmatprep.subr.bf16.mxu0 %v4812_v37  ;;  %s3484_s12 = sshll.u32 %s4904_s7, 4  ;;  %s3485_s12 = int_to_ptr.vmem [resolvable:$true] %s3484_s12 }
 0x51c   :  { %p4878_p11 = scmp.lt.s32.totalorder %s3485_s12, %s3485_s12 }
 0x51e   :  { %4558 = vmatpush3.bf16.msra.mxu1 %v4811_v25  ;;  %4578 = vmatpush3.bf16.msra.mxu0 %v4812_v37  ;;  %v3813_v25 = vld [vmem:[%s5491_s6] ss:$0 sm:$0xff]  ;;  %s4873_s6 = scalar_lea.vmem %s3485_s12, 512 }
 0x51f   :  { %4559 = vmatprep.subr.bf16.mxu1 %v4813_v51  ;;  %4579 = vmatprep.subr.bf16.mxu0 %v4814_v44  ;;  %p4874_p10 = scmp.ne.s32.totalorder %s3485_s12, %s4873_s6  ;;  %p4879_p12 = scmp.lt.s32.totalorder %s4873_s6, %s4873_s6 }
 0x521   :  { %p4880_p13 = por %p4879_p12, %p4878_p11 }
 0x522   :  { %4560 = vmatpush3.bf16.msra.mxu1 %v4813_v51  ;;  %4580 = vmatpush3.bf16.msra.mxu0 %v4814_v44 }
 0x523   :  { %4561 = vmatprep.subr.bf16.mxu1 %v4815_v54  ;;  %4581 = vmatprep.subr.bf16.mxu0 %v4816_v39  ;;  %p4881_p0 = pnand %p4880_p13, %p4874_p10 }
 0x526   :  { %4562 = vmatpush3.bf16.msra.mxu1 %v4815_v54  ;;  %4582 = vmatpush3.bf16.msra.mxu0 %v4816_v39 }
 0x527   :  { %4563 = vmatprep.subr.bf16.mxu1 %v4817_v41  ;;  %4583 = vmatprep.subr.bf16.mxu0 %v4818_v46 }
 0x52a   :  { %4564 = vmatpush3.bf16.msra.mxu1 %v4817_v41  ;;  %4584 = vmatpush3.bf16.msra.mxu0 %v4818_v46 }
 0x52b   :  { %4565 = vmatprep.subr.bf16.mxu1 %v4819_v47  ;;  %4585 = vmatprep.subr.bf16.mxu0 %v4820_v49 }
 0x52e   :  { %4566 = vmatpush3.bf16.msra.mxu1 %v4819_v47  ;;  %4586 = vmatpush3.bf16.msra.mxu0 %v4820_v49 }
 0x52f   :  { %4567 = vmatprep.subr.bf16.mxu1 %v4821_v50  ;;  %4587 = vmatprep.subr.bf16.mxu0 %v4822_v52 }
 0x532   :  { %4568 = vmatpush3.bf16.msra.mxu1 %v4821_v50  ;;  %4588 = vmatpush3.bf16.msra.mxu0 %v4822_v52 }
 0x533   :  { %4593 = vmatprep.subr.bf16.mxu1 %v4823_v53 }
 0x5b5   :  { %v4491_v56 = vpop.f32.mrf.mxu1  ;;  %v4511_v13 = vpop.f32.mrf.mxu0 }
 0x5b6   :  { %v5419_v57 = vadd.f32 %v4491_v56, %v2175_v4 }
 0x5b7   :  { %v2668_v59 = vpop.f32.mrf.mxu1  ;;  %v2841_v19 = vpop.f32.mrf.mxu0 }
 0x5b8   :  { %v5422_v7 = vadd.f32 %v2668_v59, %v2173_v58 }
 0x5b9   :  { %v4492_v61 = vpop.f32.mrf.mxu1  ;;  %v4512_v62 = vpop.f32.mrf.mxu0 }
 0x5ba   :  { %v5425_v0 = vadd.f32 %v4492_v61, %v2176_v60 }
 0x5bb   :  { %v2671_v10 = vpop.f32.mrf.mxu1  ;;  %v2844_v63 = vpop.f32.mrf.mxu0 }
 0x5bc   :  { %v5428_v2 = vadd.f32 %v2671_v10, %v2174_v1 }
 0x5d5   :  { %v4531_v3 = vpop.f32.mrf.mxu1  ;;  %v4551_v5 = vpop.f32.mrf.mxu0 }
 0x5d6   :  { %v2947_v21 = vadd.f32 %v4531_v3, %v4511_v13 }
 0x5d7   :  { %v2938_v6 = vpop.f32.mrf.mxu1  ;;  %v3054_v8 = vpop.f32.mrf.mxu0 }
 0x5d8   :  { %v2939_v9 = vadd.f32 %v2938_v6, %v2841_v19  ;;  %v3071_v35 = vadd.f32 %v4551_v5, %v2947_v21 }
 0x5d9   :  { %v4532_v12 = vpop.f32.mrf.mxu1  ;;  %v4552_v23 = vpop.f32.mrf.mxu0 }
 0x5da   :  { %v3069_v14 = vadd.f32 %v3054_v8, %v2939_v9  ;;  %v2950_v33 = vadd.f32 %v4532_v12, %v4512_v62  ;;  %v3083_v22 = vadd.f32 %v3802_v27, %v3071_v35 }
 0x5db   :  { %v2941_v17 = vpop.f32.mrf.mxu1  ;;  %v3057_v16 = vpop.f32.mrf.mxu0 }
 0x5dc   :  { %v3072_v18 = vadd.f32 %v4552_v23, %v2950_v33  ;;  %v2942_v15 = vadd.f32 %v2941_v17, %v2844_v63  ;;  %v3081_v20 = vadd.f32 %v3802_v27, %v3069_v14  ;;  %v3087_v29 = vmax.f32 %v3083_v22, 0.0 }
 0x5de   :  { %v3084_v38 = vadd.f32 %v3802_v27, %v3072_v18  ;;  %v3070_v40 = vadd.f32 %v3057_v16, %v2942_v15  ;;  %v3085_v28 = vmax.f32 %v3081_v20, 0.0 }
 0x5e0   :  { %v3082_v24 = vadd.f32 %v3802_v27, %v3070_v40  ;;  %v3088_v26 = vmax.f32 %v3084_v38, 0.0 }
 0x5e2   :  { %v3086_v45 = vmax.f32 %v3082_v24, 0.0  ;;  %v3090_v31 = vpack.c.bf16 %v3088_v26, %v3087_v29 }
 0x5e4   :  { %v3089_v30 = vpack.c.bf16 %v3086_v45, %v3085_v28 }
 0x5e6   :  { %4569 = vmatprep.mubr.bf16.mxu1 %v3089_v30  ;;  %4589 = vmatprep.mubr.bf16.mxu0 %v3089_v30 }
 0x5e7   :  { %4570 = vmatmul.mubr.bf16.vlgmr.msra.gmra.mxu1 %v3090_v31  ;;  %4590 = vmatmul.mubr.bf16.vlgmr.msra.gmra.mxu0 %v3090_v31 }
 0x5e8   :  { %4594 = vmatpush3.bf16.msra.mxu1 %v4823_v53 }
 0x5e9   :  { %4595 = vmatprep.subr.bf16.mxu1 %v4824_v32 }
 0x5ec   :  { %4596 = vmatpush3.bf16.msra.mxu1 %v4824_v32 }
 0x5ed   :  { %4597 = vmatprep.subr.bf16.mxu1 %v4825_v48 }
 0x5f0   :  { %4598 = vmatpush3.bf16.msra.mxu1 %v4825_v48 }
 0x5f1   :  { %4599 = vmatprep.subr.bf16.mxu1 %v4826_v34 }
 0x5f4   :  { %4600 = vmatpush3.bf16.msra.mxu1 %v4826_v34 }
 0x5f5   :  { %4601 = vmatprep.subr.bf16.mxu1 %v4827_v36 }
 0x5f8   :  { %4602 = vmatpush3.bf16.msra.mxu1 %v4827_v36 }
 0x5f9   :  { %4603 = vmatprep.subr.bf16.mxu1 %v4828_v42 }
 0x5fc   :  { %4604 = vmatpush3.bf16.msra.mxu1 %v4828_v42 }
 0x5fd   :  { %4605 = vmatprep.subr.bf16.mxu1 %v4829_v43 }
 0x600   :  { %4606 = vmatpush3.bf16.msra.mxu1 %v4829_v43 }
 0x601   :  { %4607 = vmatprep.subr.bf16.mxu1 %v4830_v11 }
 0x604   :  { %4608 = vmatpush3.bf16.msra.mxu1 %v4830_v11 }
 0x6a7   :  { %v4591_v37 = vpop.f32.mrf.mxu0 }
 0x6a8   :  { %v3335_v51 = vadd.f32 %v4591_v37, %v3813_v25 }
 0x6a9   :  { %v3326_v44 = vpop.f32.mrf.mxu0 }
 0x6aa   :  { %3343 = vst [vmem:[#allocation7 + $0x10] sm:$0xff] %v3335_v51  ;;  %v3327_v54 = vadd.f32 %v3813_v25, %v3326_v44 }
 0x6ab   :  { %v4592_v39 = vpop.f32.mrf.mxu0 }
 0x6ac   :  { %3341 = vst [vmem:[#allocation7] sm:$0xff] %v3327_v54  ;;  %v3338_v41 = vadd.f32 %v4592_v39, %v3813_v25 }
 0x6ad   :  { %v3329_v46 = vpop.f32.mrf.mxu0 }
 0x6ae   :  { %3344 = vst [vmem:[#allocation7 + $0x18] sm:$0xff] %v3338_v41  ;;  %v3330_v47 = vadd.f32 %v3813_v25, %v3329_v46  ;;  %v3346_v50 = vpack.c.bf16 %v3338_v41, %v3335_v51 }
 0x6b0   :  { %3342 = vst [vmem:[#allocation7 + $0x8] sm:$0xff] %v3330_v47  ;;  %v3345_v49 = vpack.c.bf16 %v3330_v47, %v3327_v54 }
 0x6b2   :  { %4609 = vmatprep.mubr.bf16.mxu1 %v3345_v49 }
 0x6b3   :  { %4610 = vmatmul.mubr.bf16.vlgmr.msra.gmra.mxu1 %v3346_v50 }
 0x6b4   :  { %4884 = shalt.err (!%p4881_p0)
}
 0x6b5   :  { %s4905_s13 = smov 128   ;;  %s4906_s14 = smov 8   ;;  %v4571_v52 = vpop.f32.mrf.mxu1  ;;  %v3760_v53 = vld [vmem:[%s5489_s4 + $0x4] ss:$0 sm:$0xff]  ;;  %v3812_v60 = vld [vmem:[%s5489_s4 + $0x5] ss:$0 sm:$0xff] }
 0x6b6   :  { %3490 = dma.vmem_to_hbm [thread:$0]  %s3485_s12, 512, %s5494_s9, [#allocation4], %s4905_s13, %s4905_s13, %s4906_s14   ;;  %v2697_v4 = vadd.f32 %v3760_v53, %v5419_v57  ;;  %v2695_v59 = vadd.f32 %v3760_v53, %v5422_v7  ;;  %v2698_v1 = vadd.f32 %v3760_v53, %v5425_v0  ;;  %v2696_v19 = vadd.f32 %v3760_v53, %v5428_v2 }
 0x6b7   :  { %v3190_v55 = vpop.f32.mrf.mxu1  ;;  %v3830_v57 = vld [vmem:[%s5493_s8] ss:$0 sm:$0xff] }
 0x6b8   :  { %v3207_v58 = vadd.f32 %v4571_v52, %v2697_v4  ;;  %v3205_v61 = vadd.f32 %v3190_v55, %v2695_v59 }
 0x6b9   :  { %v4572_v56 = vpop.f32.mrf.mxu1 }
 0x6ba   :  { %v3208_v13 = vadd.f32 %v4572_v56, %v2698_v1  ;;  %v3219_v62 = vadd.f32 %v3812_v60, %v3207_v58  ;;  %v3217_v7 = vadd.f32 %v3812_v60, %v3205_v61 }
 0x6bb   :  { %v3193_v10 = vpop.f32.mrf.mxu1 }
 0x6bc   :  { %v3206_v3 = vadd.f32 %v3193_v10, %v2696_v19  ;;  %v3220_v9 = vadd.f32 %v3812_v60, %v3208_v13 }
 0x6be   :  { %v3218_v23 = vadd.f32 %v3812_v60, %v3206_v3 }
 0x773   :  { %v4611_v63 = vpop.f32.mrf.mxu1 }
 0x774   :  { %v3462_v5 = vadd.f32 %v4611_v63, %v3219_v62 }
 0x775   :  { %v3445_v21 = vpop.f32.mrf.mxu1 }
 0x776   :  { %v3473_v6 = vadd.f32 %v3830_v57, %v3462_v5  ;;  %v3460_v8 = vadd.f32 %v3445_v21, %v3217_v7 }
 0x777   :  { %v4612_v12 = vpop.f32.mrf.mxu1 }
 0x778   :  { %3477 = vst [vmem:[%s5495_s10 + $0x10] sm:$0xff] %v3473_v6  ;;  %v3471_v0 = vadd.f32 %v3830_v57, %v3460_v8  ;;  %v3463_v2 = vadd.f32 %v4612_v12, %v3220_v9 }
 0x779   :  { %v3448_v14 = vpop.f32.mrf.mxu1 }
 0x77a   :  { %3475 = vst [vmem:[%s5495_s10] sm:$0xff] %v3471_v0  ;;  %v3474_v33 = vadd.f32 %v3830_v57, %v3463_v2  ;;  %v3461_v35 = vadd.f32 %v3448_v14, %v3218_v23 }
 0x77c   :  { %3478 = vst [vmem:[%s5495_s10 + $0x18] sm:$0xff] %v3474_v33  ;;  %v3472_v17 = vadd.f32 %v3830_v57, %v3461_v35 }
 0x77e   :  { %3476 = vst [vmem:[%s5495_s10 + $0x8] sm:$0xff] %v3472_v17 }
 0x77f   :  { %4897 = dma.done.wait [#allocation4], 512  }
 0x780   :  { %4898 = vsyncadd [#allocation4], 4294966784 }
 0x781   :  { %3498 = vsyncpa [#allocation3], 1 }
 0x782   :  { %3499 = vsyncpa [#allocation6], 1 }
 0x783   :  { %3500 = vsyncpa [#allocation4], 1 }

</bundles_post_ra>
